<compile_context>
chip_gen: v5e
topology: v5e:2x2
jax: 0.10.0
libtpu: 0.0.40
codegen_flags: <defaults>
</compile_context>

<pallas_src>
import functools

import jax
import jax.numpy as jnp
from jax import lax
from jax.experimental import pallas as pl
from jax.experimental.pallas import tpu as pltpu


# ----------------------------------------------------------------------------
# Small helpers
# ----------------------------------------------------------------------------
def _round_up(x, m):
    return ((x + m - 1) // m) * m


def _pick_tile(dim, cap, step):
    """Largest multiple of `step` that divides `dim`, capped at `cap`.
    `dim` is assumed to be a multiple of `step`."""
    best = step
    t = step
    cap = min(cap, dim)
    while t <= cap:
        if dim % t == 0:
            best = t
        t += step
    return best


def _vmem_limit(block_bytes, headroom=4 << 20, floor=16 << 20, ceil=64 << 20):
    """Scoped-VMEM budget derived from the actual block footprint (v5e 16 MiB /
    v7x 32 MiB scoped defaults are too tight / too loose respectively)."""
    return int(min(max(2 * block_bytes + headroom, floor), ceil))


# ----------------------------------------------------------------------------
# Tiled matmul + bias kernel:  (N, K) @ (K, M) + b  ->  (N, M)
# Used for (a) the hoisted LSTM input projection and (b) the final vocab FC.
# Both grid axes are independent -> "parallel" (megacore / 2-TC sharding).
# ----------------------------------------------------------------------------
def _matmul_bias_kernel(x_ref, w_ref, b_ref, o_ref, *, mxu_dtype):
    acc = jnp.dot(
        x_ref[...].astype(mxu_dtype),
        w_ref[...].astype(mxu_dtype),
        preferred_element_type=jnp.float32,
    )
    o_ref[...] = (acc + b_ref[...]).astype(o_ref.dtype)


def matmul_bias(x, w, b, *, row_cap=512, col_cap=512,
                stream_weight_once=False, mxu_dtype=jnp.float32):
    """x: (N, K) f32, w: (K, M) f32, b: (1, M) f32 -> (N, M) f32.

    N must be a multiple of 8 and M a multiple of 128 (K is untiled).
    stream_weight_once=True puts the row axis innermost so each (K, tm) weight
    block is DMA'd from HBM exactly once (use when M >> N, e.g. the vocab FC);
    mxu_dtype=bf16 casts MXU operands in-kernel (f32 accumulation).
    """
    N, K = x.shape
    M = w.shape[1]
    tn = _pick_tile(N, row_cap, 8)
    tm = _pick_tile(M, col_cap, 128)
    kernel = functools.partial(_matmul_bias_kernel, mxu_dtype=mxu_dtype)

    if stream_weight_once:
        grid = (M // tm, N // tn)   # rows innermost: weight block index is constant there
        x_spec = pl.BlockSpec((tn, K), lambda j, i: (i, 0))
        w_spec = pl.BlockSpec((K, tm), lambda j, i: (0, j))
        b_spec = pl.BlockSpec((1, tm), lambda j, i: (0, j))
        o_spec = pl.BlockSpec((tn, tm), lambda j, i: (i, j))
    else:
        grid = (N // tn, M // tm)
        x_spec = pl.BlockSpec((tn, K), lambda i, j: (i, 0))
        w_spec = pl.BlockSpec((K, tm), lambda i, j: (0, j))
        b_spec = pl.BlockSpec((1, tm), lambda i, j: (0, j))
        o_spec = pl.BlockSpec((tn, tm), lambda i, j: (i, j))

    block_bytes = 4 * 2 * (tn * K + K * tm + tm + tn * tm)   # double-buffered f32 blocks
    return pl.pallas_call(
        kernel,
        out_shape=jax.ShapeDtypeStruct((N, M), jnp.float32),
        grid_spec=pltpu.PrefetchScalarGridSpec(
            num_scalar_prefetch=0,
            grid=grid,
            in_specs=[x_spec, w_spec, b_spec],
            out_specs=o_spec,
        ),
        compiler_params=pltpu.CompilerParams(
            dimension_semantics=("parallel", "parallel"),
            vmem_limit_bytes=_vmem_limit(block_bytes),
        ),
    )(x, w, b)


# ----------------------------------------------------------------------------
# LSTM recurrence kernel (time-major, batch-blocked).
#   gates_x : (Tp, Bp, 4*Hp)  precomputed  x @ W_ih^T + (b_ih + b_hh)
#   w_hh_t  : (Hp, 4*Hp)      loop-invariant, single-buffered
# Grid: (batch blocks [parallel], time blocks [arbitrary/serial]).
# h/c carried in VMEM scratch across time blocks; per-timestep access is a dense
# (Bb, 4Hp) load / (Bb, Hp) store on the leading (untiled) time axis.
# PyTorch gate order in the packed 4H axis: i, f, g, o (each padded to Hp lanes).
# ----------------------------------------------------------------------------
def _lstm_kernel(gx_ref, whh_ref, out_ref, h_sc, c_sc, *, hdim, tb):
    @pl.when(pl.program_id(1) == 0)       # start of every sequence (time block 0)
    def _():
        h_sc[...] = jnp.zeros_like(h_sc)
        c_sc[...] = jnp.zeros_like(c_sc)

    def step(tt, carry):
        h, c = carry
        gates = gx_ref[tt] + jnp.dot(
            h, whh_ref[...], preferred_element_type=jnp.float32
        )  # (Bb, 4*Hp)
        i_g = jax.nn.sigmoid(gates[:, 0 * hdim:1 * hdim])
        f_g = jax.nn.sigmoid(gates[:, 1 * hdim:2 * hdim])
        g_g = jnp.tanh(gates[:, 2 * hdim:3 * hdim])
        o_g = jax.nn.sigmoid(gates[:, 3 * hdim:4 * hdim])
        c = f_g * c + i_g * g_g
        h = o_g * jnp.tanh(c)
        out_ref[tt] = h.astype(out_ref.dtype)   # dense (Bb, Hp) store
        return h, c

    h, c = lax.fori_loop(0, tb, step, (h_sc[...], c_sc[...]), unroll=True)
    h_sc[...] = h
    c_sc[...] = c


def lstm_recurrence(gates_x, w_hh_t, hdim, *, batch_cap=64, time_cap=16):
    """gates_x: (Tp, Bp, 4*hdim) f32 (time-major). Returns (Tp, Bp, hdim) f32."""
    Tp, Bp, G = gates_x.shape
    Bb = _pick_tile(Bp, batch_cap, 8)     # batch rows per grid block
    tb = _pick_tile(Tp, time_cap, 8)      # timesteps per grid block
    kernel = functools.partial(_lstm_kernel, hdim=hdim, tb=tb)

    block_bytes = 4 * (
        2 * (tb * Bb * G)        # gx block, double-buffered
        + 2 * (tb * Bb * hdim)   # out block, double-buffered
        + hdim * G               # W_hh, single buffer
        + 2 * Bb * hdim          # h/c scratch
    )
    return pl.pallas_call(
        kernel,
        out_shape=jax.ShapeDtypeStruct((Tp, Bp, hdim), jnp.float32),
        grid_spec=pltpu.PrefetchScalarGridSpec(
            num_scalar_prefetch=0,
            grid=(Bp // Bb, Tp // tb),
            in_specs=[
                pl.BlockSpec((tb, Bb, G), lambda b, t: (t, b, 0)),
                # Loop-invariant recurrent weight: one buffer is enough.
                pl.BlockSpec((hdim, G), lambda b, t: (0, 0),
                             pipeline_mode=pl.Buffered(1)),
            ],
            out_specs=pl.BlockSpec((tb, Bb, hdim), lambda b, t: (t, b, 0)),
            scratch_shapes=[
                pltpu.VMEM((Bb, hdim), jnp.float32),  # h (carried across time blocks)
                pltpu.VMEM((Bb, hdim), jnp.float32),  # c
            ],
        ),
        compiler_params=pltpu.CompilerParams(
            # Batch blocks are independent (sharded across TCs on v7x); time is serial.
            dimension_semantics=("parallel", "arbitrary"),
            vmem_limit_bytes=_vmem_limit(block_bytes),
        ),
    )(gates_x, w_hh_t)


# ----------------------------------------------------------------------------
# Weight packing: pad each gate's H block to Hp so in-kernel gate slices are
# 128-lane aligned.  Bias (b_ih + b_hh) is folded into the input projection.
# Zero padding keeps padded hidden lanes exactly 0 through the recurrence.
# ----------------------------------------------------------------------------
def _pack_lstm_weights(w_ih, w_hh, b_ih, b_hh, hdim_pad):
    H4, E = w_ih.shape
    H = H4 // 4
    pad_h = hdim_pad - H
    w_ih_t = jnp.transpose(w_ih).reshape(E, 4, H)
    w_ih_t = jnp.pad(w_ih_t, ((0, 0), (0, 0), (0, pad_h))).reshape(E, 4 * hdim_pad)
    w_hh_t = jnp.transpose(w_hh).reshape(H, 4, H)
    w_hh_t = jnp.pad(w_hh_t, ((0, pad_h), (0, 0), (0, pad_h))).reshape(
        hdim_pad, 4 * hdim_pad)
    b = (b_ih + b_hh).reshape(4, H)
    b = jnp.pad(b, ((0, 0), (0, pad_h))).reshape(1, 4 * hdim_pad)
    return w_ih_t, w_hh_t, b


# ----------------------------------------------------------------------------
# DecoderRNN forward
# ----------------------------------------------------------------------------
@functools.partial(jax.jit, static_argnames=("fc_bf16",))
def decoder_rnn_forward(params, features, captions, fc_bf16=False):
    """features: (B, E) f32, captions: (B, L) int32 -> logits (B, L, V) f32."""
    B, E = features.shape
    T = captions.shape[1]        # sequence length: 1 image step + (L-1) caption tokens
    V, H = params["fc_w"].shape

    Bp = _round_up(B, 8)
    Hp = _round_up(H, 128)
    Vp = _round_up(V, 128)
    Tp = _round_up(T, 8)

    # Embedding lookup + concat (JAX glue), then go TIME-MAJOR: the recurrence then
    # reads/writes whole (Bb, 4Hp)/(Bb, Hp) slabs per timestep.  Transposing x here
    # is tiny (B*T*E) compared with transposing logits (B*T*V).
    emb = jnp.take(params["embedding"], captions[:, :-1], axis=0)   # (B, T-1, E)
    x = jnp.concatenate([features[:, None, :], emb], axis=1)        # (B, T, E)
    x = jnp.pad(x, ((0, Bp - B), (0, Tp - T), (0, 0)))              # (Bp, Tp, E)
    x_tm = jnp.transpose(x, (1, 0, 2))                              # (Tp, Bp, E)

    # Gate-padded weights (zero padding keeps padded lanes/rows exactly zero).
    w_ih_t, w_hh_t, b_gates = _pack_lstm_weights(
        params["w_ih"], params["w_hh"], params["b_ih"], params["b_hh"], Hp)
    w_fc_t = jnp.pad(jnp.transpose(params["fc_w"]), ((0, Hp - H), (0, Vp - V)))
    b_fc = jnp.pad(params["fc_b"], (0, Vp - V)).reshape(1, Vp)

    # 1) Hoisted input projection + bias for every timestep (fully parallel matmul).
    gates_x = matmul_bias(x_tm.reshape(Tp * Bp, E), w_ih_t, b_gates)
    gates_x = gates_x.reshape(Tp, Bp, 4 * Hp)
    # TODO(synk): optionally store gates_x in bf16 / fuse the projection into the
    # recurrence kernel to halve or remove its HBM round trip (breaks 1e-4 check).

    # 2) Serial recurrence: only h @ W_hh^T per step stays on the critical path.
    h_seq = lstm_recurrence(gates_x, w_hh_t, Hp)                    # (Tp, Bp, Hp)

    # 3) Vocab FC.  Transpose the (small) hidden sequence back to batch-major so the
    #    logits come out batch-first without transposing the much larger B*T*V tensor.
    #    Row axis innermost -> the (Hp, Vp) weight streams from HBM exactly once.
    h_bm = jnp.transpose(h_seq, (1, 0, 2)).reshape(Bp * Tp, Hp)     # (Bp*Tp, Hp)
    fc_dtype = jnp.bfloat16 if fc_bf16 else jnp.float32
    logits = matmul_bias(h_bm, w_fc_t, b_fc,
                         stream_weight_once=True, mxu_dtype=fc_dtype)
    logits = logits.reshape(Bp, Tp, Vp)

    return logits[:B, :T, :V]   # (B, T, V), batch_first like PyTorch


# ----------------------------------------------------------------------------
# Pure-JAX reference (for correctness check)
# ----------------------------------------------------------------------------
def decoder_rnn_ref(params, features, captions):
    emb = jnp.take(params["embedding"], captions[:, :-1], axis=0)
    x = jnp.concatenate([features[:, None, :], emb], axis=1)  # (B, T, E)
    B, T, E = x.shape
    H = params["w_hh"].shape[1]
    h = jnp.zeros((B, H), jnp.float32)
    c = jnp.zeros((B, H), jnp.float32)
    outs = []
    for t in range(T):
        gates = (x[:, t] @ params["w_ih"].T + params["b_ih"]
                 + h @ params["w_hh"].T + params["b_hh"])
        i_g = jax.nn.sigmoid(gates[:, 0 * H:1 * H])
        f_g = jax.nn.sigmoid(gates[:, 1 * H:2 * H])
        g_g = jnp.tanh(gates[:, 2 * H:3 * H])
        o_g = jax.nn.sigmoid(gates[:, 3 * H:4 * H])
        c = f_g * c + i_g * g_g
        h = o_g * jnp.tanh(c)
        outs.append(h)
    h_seq = jnp.stack(outs, axis=1)  # (B, T, H)
    return h_seq @ params["fc_w"].T + params["fc_b"]


if __name__ == "__main__":
    # Small, deterministic config.
    embed_size, hidden_size, vocab_size = 32, 32, 64
    batch, cap_len = 2, 8  # captions length L -> sequence length T = L

    key = jax.random.PRNGKey(0)
    ks = jax.random.split(key, 9)
    scale = 0.1
    params = {
        "embedding": scale * jax.random.normal(ks[0], (vocab_size, embed_size), jnp.float32),
        "w_ih": scale * jax.random.normal(ks[1], (4 * hidden_size, embed_size), jnp.float32),
        "w_hh": scale * jax.random.normal(ks[2], (4 * hidden_size, hidden_size), jnp.float32),
        "b_ih": scale * jax.random.normal(ks[3], (4 * hidden_size,), jnp.float32),
        "b_hh": scale * jax.random.normal(ks[4], (4 * hidden_size,), jnp.float32),
        "fc_w": scale * jax.random.normal(ks[5], (vocab_size, hidden_size), jnp.float32),
        "fc_b": scale * jax.random.normal(ks[6], (vocab_size,), jnp.float32),
    }

    features = jax.random.normal(ks[7], (batch, embed_size), jnp.float32)
    captions = jax.random.randint(ks[8], (batch, cap_len), 0, vocab_size, jnp.int32)

    ref = decoder_rnn_ref(params, features, captions)

    # f32 path: strict check.
    logits = jax.block_until_ready(decoder_rnn_forward(params, features, captions))
    assert logits.shape == (batch, cap_len, vocab_size), logits.shape
    assert jnp.allclose(logits, ref, atol=1e-4, rtol=1e-4), \
        float(jnp.max(jnp.abs(logits - ref)))

    # bf16 MXU inputs on the vocab FC (f32 accumulation): looser tolerance.
    logits_bf16 = jax.block_until_ready(
        decoder_rnn_forward(params, features, captions, fc_bf16=True))
    assert jnp.allclose(logits_bf16, ref, atol=5e-2, rtol=5e-2), \
        float(jnp.max(jnp.abs(logits_bf16 - ref)))

    print("KERNEL_OK")
</pallas_src>

<mosaic_0001>
module attributes {stable_mosaic.version = 11 : i64} {
  func.func @_lstm_kernel(%arg0: i32, %arg1: i32, %arg2: memref<8x8x512xf32, #tpu.memory_space<vmem>>, %arg3: memref<128x512xf32, #tpu.memory_space<vmem>>, %arg4: memref<8x8x128xf32, #tpu.memory_space<vmem>>, %arg5: memref<8x128xf32, #tpu.memory_space<vmem>>, %arg6: memref<8x128xf32, #tpu.memory_space<vmem>>) attributes {dimension_semantics = [#tpu.dimension_semantics<parallel>, #tpu.dimension_semantics<arbitrary>], iteration_bounds = array<i64: 1, 1>, scalar_prefetch = 0 : i64, scratch_operands = 2 : i64, tpu.core_type = #tpu.core_type<tc>, window_params = [{transform_indices = @transform_0, window_bounds = array<i64: 8, 8, 512>}, {pipeline_mode = #tpu.pipeline_mode<synchronous>, transform_indices = @transform_1, window_bounds = array<i64: 128, 512>}, {transform_indices = @transform_2, window_bounds = array<i64: 8, 8, 128>}]} {
    %c0_i32 = arith.constant 0 : i32
    %0 = arith.cmpi eq, %arg1, %c0_i32 : i32
    %1 = arith.extui %0 : i1 to i32
    %c0_i32_0 = arith.constant 0 : i32
    %2 = arith.cmpi ne, %1, %c0_i32_0 : i32
    scf.if %2 {
      %cst_88 = arith.constant 0.000000e+00 : f32
      %287 = vector.broadcast %cst_88 : f32 to vector<8x128xf32>
      %c0_89 = arith.constant 0 : index
      %c0_90 = arith.constant 0 : index
      %288 = vector.load %arg5[%c0_89, %c0_90] : memref<8x128xf32, #tpu.memory_space<vmem>>, vector<8x128xf32>
      tpu.vector_store %arg5[%c0_89, %c0_90], %287 {strides = array<i32>} : memref<8x128xf32, #tpu.memory_space<vmem>>, vector<8x128xf32>,
      %cst_91 = arith.constant 0.000000e+00 : f32
      %289 = vector.broadcast %cst_91 : f32 to vector<8x128xf32>
      %c0_92 = arith.constant 0 : index
      %c0_93 = arith.constant 0 : index
      %290 = vector.load %arg6[%c0_92, %c0_93] : memref<8x128xf32, #tpu.memory_space<vmem>>, vector<8x128xf32>
      tpu.vector_store %arg6[%c0_92, %c0_93], %289 {strides = array<i32>} : memref<8x128xf32, #tpu.memory_space<vmem>>, vector<8x128xf32>,
    } else {
    }
    %c0 = arith.constant 0 : index
    %c0_1 = arith.constant 0 : index
    %3 = vector.load %arg5[%c0, %c0_1] : memref<8x128xf32, #tpu.memory_space<vmem>>, vector<8x128xf32>
    %c0_2 = arith.constant 0 : index
    %c0_3 = arith.constant 0 : index
    %4 = vector.load %arg6[%c0_2, %c0_3] : memref<8x128xf32, #tpu.memory_space<vmem>>, vector<8x128xf32>
    %c0_i32_4 = arith.constant 0 : i32
    %5 = arith.index_cast %c0_i32_4 : i32 to index
    %c0_5 = arith.constant 0 : index
    %c0_6 = arith.constant 0 : index
    %6 = vector.load %arg2[%5, %c0_5, %c0_6] : memref<8x8x512xf32, #tpu.memory_space<vmem>>, vector<1x8x512xf32>
    %7 = vector.shape_cast %6 : vector<1x8x512xf32> to vector<8x512xf32>
    %c0_7 = arith.constant 0 : index
    %c0_8 = arith.constant 0 : index
    %8 = vector.load %arg3[%c0_7, %c0_8] : memref<128x512xf32, #tpu.memory_space<vmem>>, vector<128x512xf32>
    %cst = arith.constant dense<0.000000e+00> : vector<8x512xf32>
    %9 = tpu.matmul %3, %8, %cst {dimension_numbers = #tpu.dot_dimension_numbers<[1], [0], [0], [1], [0, 0, 1, 1], [], []>} : vector<8x128xf32>, vector<128x512xf32>, vector<8x512xf32> -> vector<8x512xf32>
    %10 = arith.addf %7, %9 : vector<8x512xf32>
    %11 = vector.extract_strided_slice %10 {offsets = [0, 0], sizes = [8, 128], strides = [1, 1]} : vector<8x512xf32> to vector<8x128xf32>
    %12 = arith.negf %11 : vector<8x128xf32>
    %13 = math.exp %12 : vector<8x128xf32>
    %cst_9 = arith.constant 1.000000e+00 : f32
    %14 = vector.broadcast %cst_9 : f32 to vector<8x128xf32>
    %15 = arith.addf %14, %13 : vector<8x128xf32>
    %16 = arith.divf %14, %15 : vector<8x128xf32>
    %17 = vector.extract_strided_slice %10 {offsets = [0, 128], sizes = [8, 128], strides = [1, 1]} : vector<8x512xf32> to vector<8x128xf32>
    %18 = arith.negf %17 : vector<8x128xf32>
    %19 = math.exp %18 : vector<8x128xf32>
    %cst_10 = arith.constant 1.000000e+00 : f32
    %20 = vector.broadcast %cst_10 : f32 to vector<8x128xf32>
    %21 = arith.addf %20, %19 : vector<8x128xf32>
    %22 = arith.divf %20, %21 : vector<8x128xf32>
    %23 = vector.extract_strided_slice %10 {offsets = [0, 256], sizes = [8, 128], strides = [1, 1]} : vector<8x512xf32> to vector<8x128xf32>
    %24 = math.tanh %23 : vector<8x128xf32>
    %25 = vector.extract_strided_slice %10 {offsets = [0, 384], sizes = [8, 128], strides = [1, 1]} : vector<8x512xf32> to vector<8x128xf32>
    %26 = arith.negf %25 : vector<8x128xf32>
    %27 = math.exp %26 : vector<8x128xf32>
    %cst_11 = arith.constant 1.000000e+00 : f32
    %28 = vector.broadcast %cst_11 : f32 to vector<8x128xf32>
    %29 = arith.addf %28, %27 : vector<8x128xf32>
    %30 = arith.divf %28, %29 : vector<8x128xf32>
    %31 = arith.mulf %22, %4 : vector<8x128xf32>
    %32 = arith.mulf %16, %24 : vector<8x128xf32>
    %33 = arith.addf %31, %32 : vector<8x128xf32>
    %34 = math.tanh %33 : vector<8x128xf32>
    %35 = arith.mulf %30, %34 : vector<8x128xf32>
    %36 = arith.index_cast %c0_i32_4 : i32 to index
    %c0_12 = arith.constant 0 : index
    %c0_13 = arith.constant 0 : index
    %37 = vector.load %arg4[%36, %c0_12, %c0_13] : memref<8x8x128xf32, #tpu.memory_space<vmem>>, vector<1x8x128xf32>
    %38 = vector.shape_cast %37 : vector<1x8x128xf32> to vector<8x128xf32>
    %39 = vector.shape_cast %35 : vector<8x128xf32> to vector<1x8x128xf32>
    tpu.vector_store %arg4[%36, %c0_12, %c0_13], %39 {strides = array<i32>} : memref<8x8x128xf32, #tpu.memory_space<vmem>>, vector<1x8x128xf32>,
    %c1_i32 = arith.constant 1 : i32
    %40 = arith.index_cast %c1_i32 : i32 to index
    %c0_14 = arith.constant 0 : index
    %c0_15 = arith.constant 0 : index
    %41 = vector.load %arg2[%40, %c0_14, %c0_15] : memref<8x8x512xf32, #tpu.memory_space<vmem>>, vector<1x8x512xf32>
    %42 = vector.shape_cast %41 : vector<1x8x512xf32> to vector<8x512xf32>
    %c0_16 = arith.constant 0 : index
    %c0_17 = arith.constant 0 : index
    %43 = vector.load %arg3[%c0_16, %c0_17] : memref<128x512xf32, #tpu.memory_space<vmem>>, vector<128x512xf32>
    %cst_18 = arith.constant dense<0.000000e+00> : vector<8x512xf32>
    %44 = tpu.matmul %35, %43, %cst_18 {dimension_numbers = #tpu.dot_dimension_numbers<[1], [0], [0], [1], [0, 0, 1, 1], [], []>} : vector<8x128xf32>, vector<128x512xf32>, vector<8x512xf32> -> vector<8x512xf32>
    %45 = arith.addf %42, %44 : vector<8x512xf32>
    %46 = vector.extract_strided_slice %45 {offsets = [0, 0], sizes = [8, 128], strides = [1, 1]} : vector<8x512xf32> to vector<8x128xf32>
    %47 = arith.negf %46 : vector<8x128xf32>
    %48 = math.exp %47 : vector<8x128xf32>
    %cst_19 = arith.constant 1.000000e+00 : f32
    %49 = vector.broadcast %cst_19 : f32 to vector<8x128xf32>
    %50 = arith.addf %49, %48 : vector<8x128xf32>
    %51 = arith.divf %49, %50 : vector<8x128xf32>
    %52 = vector.extract_strided_slice %45 {offsets = [0, 128], sizes = [8, 128], strides = [1, 1]} : vector<8x512xf32> to vector<8x128xf32>
    %53 = arith.negf %52 : vector<8x128xf32>
    %54 = math.exp %53 : vector<8x128xf32>
    %cst_20 = arith.constant 1.000000e+00 : f32
    %55 = vector.broadcast %cst_20 : f32 to vector<8x128xf32>
    %56 = arith.addf %55, %54 : vector<8x128xf32>
    %57 = arith.divf %55, %56 : vector<8x128xf32>
    %58 = vector.extract_strided_slice %45 {offsets = [0, 256], sizes = [8, 128], strides = [1, 1]} : vector<8x512xf32> to vector<8x128xf32>
    %59 = math.tanh %58 : vector<8x128xf32>
    %60 = vector.extract_strided_slice %45 {offsets = [0, 384], sizes = [8, 128], strides = [1, 1]} : vector<8x512xf32> to vector<8x128xf32>
    %61 = arith.negf %60 : vector<8x128xf32>
    %62 = math.exp %61 : vector<8x128xf32>
    %cst_21 = arith.constant 1.000000e+00 : f32
    %63 = vector.broadcast %cst_21 : f32 to vector<8x128xf32>
    %64 = arith.addf %63, %62 : vector<8x128xf32>
    %65 = arith.divf %63, %64 : vector<8x128xf32>
    %66 = arith.mulf %57, %33 : vector<8x128xf32>
    %67 = arith.mulf %51, %59 : vector<8x128xf32>
    %68 = arith.addf %66, %67 : vector<8x128xf32>
    %69 = math.tanh %68 : vector<8x128xf32>
    %70 = arith.mulf %65, %69 : vector<8x128xf32>
    %71 = arith.index_cast %c1_i32 : i32 to index
    %c0_22 = arith.constant 0 : index
    %c0_23 = arith.constant 0 : index
    %72 = vector.load %arg4[%71, %c0_22, %c0_23] : memref<8x8x128xf32, #tpu.memory_space<vmem>>, vector<1x8x128xf32>
    %73 = vector.shape_cast %72 : vector<1x8x128xf32> to vector<8x128xf32>
    %74 = vector.shape_cast %70 : vector<8x128xf32> to vector<1x8x128xf32>
    tpu.vector_store %arg4[%71, %c0_22, %c0_23], %74 {strides = array<i32>} : memref<8x8x128xf32, #tpu.memory_space<vmem>>, vector<1x8x128xf32>,
    %c2_i32 = arith.constant 2 : i32
    %75 = arith.index_cast %c2_i32 : i32 to index
    %c0_24 = arith.constant 0 : index
    %c0_25 = arith.constant 0 : index
    %76 = vector.load %arg2[%75, %c0_24, %c0_25] : memref<8x8x512xf32, #tpu.memory_space<vmem>>, vector<1x8x512xf32>
    %77 = vector.shape_cast %76 : vector<1x8x512xf32> to vector<8x512xf32>
    %c0_26 = arith.constant 0 : index
    %c0_27 = arith.constant 0 : index
    %78 = vector.load %arg3[%c0_26, %c0_27] : memref<128x512xf32, #tpu.memory_space<vmem>>, vector<128x512xf32>
    %cst_28 = arith.constant dense<0.000000e+00> : vector<8x512xf32>
    %79 = tpu.matmul %70, %78, %cst_28 {dimension_numbers = #tpu.dot_dimension_numbers<[1], [0], [0], [1], [0, 0, 1, 1], [], []>} : vector<8x128xf32>, vector<128x512xf32>, vector<8x512xf32> -> vector<8x512xf32>
    %80 = arith.addf %77, %79 : vector<8x512xf32>
    %81 = vector.extract_strided_slice %80 {offsets = [0, 0], sizes = [8, 128], strides = [1, 1]} : vector<8x512xf32> to vector<8x128xf32>
    %82 = arith.negf %81 : vector<8x128xf32>
    %83 = math.exp %82 : vector<8x128xf32>
    %cst_29 = arith.constant 1.000000e+00 : f32
    %84 = vector.broadcast %cst_29 : f32 to vector<8x128xf32>
    %85 = arith.addf %84, %83 : vector<8x128xf32>
    %86 = arith.divf %84, %85 : vector<8x128xf32>
    %87 = vector.extract_strided_slice %80 {offsets = [0, 128], sizes = [8, 128], strides = [1, 1]} : vector<8x512xf32> to vector<8x128xf32>
    %88 = arith.negf %87 : vector<8x128xf32>
    %89 = math.exp %88 : vector<8x128xf32>
    %cst_30 = arith.constant 1.000000e+00 : f32
    %90 = vector.broadcast %cst_30 : f32 to vector<8x128xf32>
    %91 = arith.addf %90, %89 : vector<8x128xf32>
    %92 = arith.divf %90, %91 : vector<8x128xf32>
    %93 = vector.extract_strided_slice %80 {offsets = [0, 256], sizes = [8, 128], strides = [1, 1]} : vector<8x512xf32> to vector<8x128xf32>
    %94 = math.tanh %93 : vector<8x128xf32>
    %95 = vector.extract_strided_slice %80 {offsets = [0, 384], sizes = [8, 128], strides = [1, 1]} : vector<8x512xf32> to vector<8x128xf32>
    %96 = arith.negf %95 : vector<8x128xf32>
    %97 = math.exp %96 : vector<8x128xf32>
    %cst_31 = arith.constant 1.000000e+00 : f32
    %98 = vector.broadcast %cst_31 : f32 to vector<8x128xf32>
    %99 = arith.addf %98, %97 : vector<8x128xf32>
    %100 = arith.divf %98, %99 : vector<8x128xf32>
    %101 = arith.mulf %92, %68 : vector<8x128xf32>
    %102 = arith.mulf %86, %94 : vector<8x128xf32>
    %103 = arith.addf %101, %102 : vector<8x128xf32>
    %104 = math.tanh %103 : vector<8x128xf32>
    %105 = arith.mulf %100, %104 : vector<8x128xf32>
    %106 = arith.index_cast %c2_i32 : i32 to index
    %c0_32 = arith.constant 0 : index
    %c0_33 = arith.constant 0 : index
    %107 = vector.load %arg4[%106, %c0_32, %c0_33] : memref<8x8x128xf32, #tpu.memory_space<vmem>>, vector<1x8x128xf32>
    %108 = vector.shape_cast %107 : vector<1x8x128xf32> to vector<8x128xf32>
    %109 = vector.shape_cast %105 : vector<8x128xf32> to vector<1x8x128xf32>
    tpu.vector_store %arg4[%106, %c0_32, %c0_33], %109 {strides = array<i32>} : memref<8x8x128xf32, #tpu.memory_space<vmem>>, vector<1x8x128xf32>,
    %c3_i32 = arith.constant 3 : i32
    %110 = arith.index_cast %c3_i32 : i32 to index
    %c0_34 = arith.constant 0 : index
    %c0_35 = arith.constant 0 : index
    %111 = vector.load %arg2[%110, %c0_34, %c0_35] : memref<8x8x512xf32, #tpu.memory_space<vmem>>, vector<1x8x512xf32>
    %112 = vector.shape_cast %111 : vector<1x8x512xf32> to vector<8x512xf32>
    %c0_36 = arith.constant 0 : index
    %c0_37 = arith.constant 0 : index
    %113 = vector.load %arg3[%c0_36, %c0_37] : memref<128x512xf32, #tpu.memory_space<vmem>>, vector<128x512xf32>
    %cst_38 = arith.constant dense<0.000000e+00> : vector<8x512xf32>
    %114 = tpu.matmul %105, %113, %cst_38 {dimension_numbers = #tpu.dot_dimension_numbers<[1], [0], [0], [1], [0, 0, 1, 1], [], []>} : vector<8x128xf32>, vector<128x512xf32>, vector<8x512xf32> -> vector<8x512xf32>
    %115 = arith.addf %112, %114 : vector<8x512xf32>
    %116 = vector.extract_strided_slice %115 {offsets = [0, 0], sizes = [8, 128], strides = [1, 1]} : vector<8x512xf32> to vector<8x128xf32>
    %117 = arith.negf %116 : vector<8x128xf32>
    %118 = math.exp %117 : vector<8x128xf32>
    %cst_39 = arith.constant 1.000000e+00 : f32
    %119 = vector.broadcast %cst_39 : f32 to vector<8x128xf32>
    %120 = arith.addf %119, %118 : vector<8x128xf32>
    %121 = arith.divf %119, %120 : vector<8x128xf32>
    %122 = vector.extract_strided_slice %115 {offsets = [0, 128], sizes = [8, 128], strides = [1, 1]} : vector<8x512xf32> to vector<8x128xf32>
    %123 = arith.negf %122 : vector<8x128xf32>
    %124 = math.exp %123 : vector<8x128xf32>
    %cst_40 = arith.constant 1.000000e+00 : f32
    %125 = vector.broadcast %cst_40 : f32 to vector<8x128xf32>
    %126 = arith.addf %125, %124 : vector<8x128xf32>
    %127 = arith.divf %125, %126 : vector<8x128xf32>
    %128 = vector.extract_strided_slice %115 {offsets = [0, 256], sizes = [8, 128], strides = [1, 1]} : vector<8x512xf32> to vector<8x128xf32>
    %129 = math.tanh %128 : vector<8x128xf32>
    %130 = vector.extract_strided_slice %115 {offsets = [0, 384], sizes = [8, 128], strides = [1, 1]} : vector<8x512xf32> to vector<8x128xf32>
    %131 = arith.negf %130 : vector<8x128xf32>
    %132 = math.exp %131 : vector<8x128xf32>
    %cst_41 = arith.constant 1.000000e+00 : f32
    %133 = vector.broadcast %cst_41 : f32 to vector<8x128xf32>
    %134 = arith.addf %133, %132 : vector<8x128xf32>
    %135 = arith.divf %133, %134 : vector<8x128xf32>
    %136 = arith.mulf %127, %103 : vector<8x128xf32>
    %137 = arith.mulf %121, %129 : vector<8x128xf32>
    %138 = arith.addf %136, %137 : vector<8x128xf32>
    %139 = math.tanh %138 : vector<8x128xf32>
    %140 = arith.mulf %135, %139 : vector<8x128xf32>
    %141 = arith.index_cast %c3_i32 : i32 to index
    %c0_42 = arith.constant 0 : index
    %c0_43 = arith.constant 0 : index
    %142 = vector.load %arg4[%141, %c0_42, %c0_43] : memref<8x8x128xf32, #tpu.memory_space<vmem>>, vector<1x8x128xf32>
    %143 = vector.shape_cast %142 : vector<1x8x128xf32> to vector<8x128xf32>
    %144 = vector.shape_cast %140 : vector<8x128xf32> to vector<1x8x128xf32>
    tpu.vector_store %arg4[%141, %c0_42, %c0_43], %144 {strides = array<i32>} : memref<8x8x128xf32, #tpu.memory_space<vmem>>, vector<1x8x128xf32>,
    %c4_i32 = arith.constant 4 : i32
    %145 = arith.index_cast %c4_i32 : i32 to index
    %c0_44 = arith.constant 0 : index
    %c0_45 = arith.constant 0 : index
    %146 = vector.load %arg2[%145, %c0_44, %c0_45] : memref<8x8x512xf32, #tpu.memory_space<vmem>>, vector<1x8x512xf32>
    %147 = vector.shape_cast %146 : vector<1x8x512xf32> to vector<8x512xf32>
    %c0_46 = arith.constant 0 : index
    %c0_47 = arith.constant 0 : index
    %148 = vector.load %arg3[%c0_46, %c0_47] : memref<128x512xf32, #tpu.memory_space<vmem>>, vector<128x512xf32>
    %cst_48 = arith.constant dense<0.000000e+00> : vector<8x512xf32>
    %149 = tpu.matmul %140, %148, %cst_48 {dimension_numbers = #tpu.dot_dimension_numbers<[1], [0], [0], [1], [0, 0, 1, 1], [], []>} : vector<8x128xf32>, vector<128x512xf32>, vector<8x512xf32> -> vector<8x512xf32>
    %150 = arith.addf %147, %149 : vector<8x512xf32>
    %151 = vector.extract_strided_slice %150 {offsets = [0, 0], sizes = [8, 128], strides = [1, 1]} : vector<8x512xf32> to vector<8x128xf32>
    %152 = arith.negf %151 : vector<8x128xf32>
    %153 = math.exp %152 : vector<8x128xf32>
    %cst_49 = arith.constant 1.000000e+00 : f32
    %154 = vector.broadcast %cst_49 : f32 to vector<8x128xf32>
    %155 = arith.addf %154, %153 : vector<8x128xf32>
    %156 = arith.divf %154, %155 : vector<8x128xf32>
    %157 = vector.extract_strided_slice %150 {offsets = [0, 128], sizes = [8, 128], strides = [1, 1]} : vector<8x512xf32> to vector<8x128xf32>
    %158 = arith.negf %157 : vector<8x128xf32>
    %159 = math.exp %158 : vector<8x128xf32>
    %cst_50 = arith.constant 1.000000e+00 : f32
    %160 = vector.broadcast %cst_50 : f32 to vector<8x128xf32>
    %161 = arith.addf %160, %159 : vector<8x128xf32>
    %162 = arith.divf %160, %161 : vector<8x128xf32>
    %163 = vector.extract_strided_slice %150 {offsets = [0, 256], sizes = [8, 128], strides = [1, 1]} : vector<8x512xf32> to vector<8x128xf32>
    %164 = math.tanh %163 : vector<8x128xf32>
    %165 = vector.extract_strided_slice %150 {offsets = [0, 384], sizes = [8, 128], strides = [1, 1]} : vector<8x512xf32> to vector<8x128xf32>
    %166 = arith.negf %165 : vector<8x128xf32>
    %167 = math.exp %166 : vector<8x128xf32>
    %cst_51 = arith.constant 1.000000e+00 : f32
    %168 = vector.broadcast %cst_51 : f32 to vector<8x128xf32>
    %169 = arith.addf %168, %167 : vector<8x128xf32>
    %170 = arith.divf %168, %169 : vector<8x128xf32>
    %171 = arith.mulf %162, %138 : vector<8x128xf32>
    %172 = arith.mulf %156, %164 : vector<8x128xf32>
    %173 = arith.addf %171, %172 : vector<8x128xf32>
    %174 = math.tanh %173 : vector<8x128xf32>
    %175 = arith.mulf %170, %174 : vector<8x128xf32>
    %176 = arith.index_cast %c4_i32 : i32 to index
    %c0_52 = arith.constant 0 : index
    %c0_53 = arith.constant 0 : index
    %177 = vector.load %arg4[%176, %c0_52, %c0_53] : memref<8x8x128xf32, #tpu.memory_space<vmem>>, vector<1x8x128xf32>
    %178 = vector.shape_cast %177 : vector<1x8x128xf32> to vector<8x128xf32>
    %179 = vector.shape_cast %175 : vector<8x128xf32> to vector<1x8x128xf32>
    tpu.vector_store %arg4[%176, %c0_52, %c0_53], %179 {strides = array<i32>} : memref<8x8x128xf32, #tpu.memory_space<vmem>>, vector<1x8x128xf32>,
    %c5_i32 = arith.constant 5 : i32
    %180 = arith.index_cast %c5_i32 : i32 to index
    %c0_54 = arith.constant 0 : index
    %c0_55 = arith.constant 0 : index
    %181 = vector.load %arg2[%180, %c0_54, %c0_55] : memref<8x8x512xf32, #tpu.memory_space<vmem>>, vector<1x8x512xf32>
    %182 = vector.shape_cast %181 : vector<1x8x512xf32> to vector<8x512xf32>
    %c0_56 = arith.constant 0 : index
    %c0_57 = arith.constant 0 : index
    %183 = vector.load %arg3[%c0_56, %c0_57] : memref<128x512xf32, #tpu.memory_space<vmem>>, vector<128x512xf32>
    %cst_58 = arith.constant dense<0.000000e+00> : vector<8x512xf32>
    %184 = tpu.matmul %175, %183, %cst_58 {dimension_numbers = #tpu.dot_dimension_numbers<[1], [0], [0], [1], [0, 0, 1, 1], [], []>} : vector<8x128xf32>, vector<128x512xf32>, vector<8x512xf32> -> vector<8x512xf32>
    %185 = arith.addf %182, %184 : vector<8x512xf32>
    %186 = vector.extract_strided_slice %185 {offsets = [0, 0], sizes = [8, 128], strides = [1, 1]} : vector<8x512xf32> to vector<8x128xf32>
    %187 = arith.negf %186 : vector<8x128xf32>
    %188 = math.exp %187 : vector<8x128xf32>
    %cst_59 = arith.constant 1.000000e+00 : f32
    %189 = vector.broadcast %cst_59 : f32 to vector<8x128xf32>
    %190 = arith.addf %189, %188 : vector<8x128xf32>
    %191 = arith.divf %189, %190 : vector<8x128xf32>
    %192 = vector.extract_strided_slice %185 {offsets = [0, 128], sizes = [8, 128], strides = [1, 1]} : vector<8x512xf32> to vector<8x128xf32>
    %193 = arith.negf %192 : vector<8x128xf32>
    %194 = math.exp %193 : vector<8x128xf32>
    %cst_60 = arith.constant 1.000000e+00 : f32
    %195 = vector.broadcast %cst_60 : f32 to vector<8x128xf32>
    %196 = arith.addf %195, %194 : vector<8x128xf32>
    %197 = arith.divf %195, %196 : vector<8x128xf32>
    %198 = vector.extract_strided_slice %185 {offsets = [0, 256], sizes = [8, 128], strides = [1, 1]} : vector<8x512xf32> to vector<8x128xf32>
    %199 = math.tanh %198 : vector<8x128xf32>
    %200 = vector.extract_strided_slice %185 {offsets = [0, 384], sizes = [8, 128], strides = [1, 1]} : vector<8x512xf32> to vector<8x128xf32>
    %201 = arith.negf %200 : vector<8x128xf32>
    %202 = math.exp %201 : vector<8x128xf32>
    %cst_61 = arith.constant 1.000000e+00 : f32
    %203 = vector.broadcast %cst_61 : f32 to vector<8x128xf32>
    %204 = arith.addf %203, %202 : vector<8x128xf32>
    %205 = arith.divf %203, %204 : vector<8x128xf32>
    %206 = arith.mulf %197, %173 : vector<8x128xf32>
    %207 = arith.mulf %191, %199 : vector<8x128xf32>
    %208 = arith.addf %206, %207 : vector<8x128xf32>
    %209 = math.tanh %208 : vector<8x128xf32>
    %210 = arith.mulf %205, %209 : vector<8x128xf32>
    %211 = arith.index_cast %c5_i32 : i32 to index
    %c0_62 = arith.constant 0 : index
    %c0_63 = arith.constant 0 : index
    %212 = vector.load %arg4[%211, %c0_62, %c0_63] : memref<8x8x128xf32, #tpu.memory_space<vmem>>, vector<1x8x128xf32>
    %213 = vector.shape_cast %212 : vector<1x8x128xf32> to vector<8x128xf32>
    %214 = vector.shape_cast %210 : vector<8x128xf32> to vector<1x8x128xf32>
    tpu.vector_store %arg4[%211, %c0_62, %c0_63], %214 {strides = array<i32>} : memref<8x8x128xf32, #tpu.memory_space<vmem>>, vector<1x8x128xf32>,
    %c6_i32 = arith.constant 6 : i32
    %215 = arith.index_cast %c6_i32 : i32 to index
    %c0_64 = arith.constant 0 : index
    %c0_65 = arith.constant 0 : index
    %216 = vector.load %arg2[%215, %c0_64, %c0_65] : memref<8x8x512xf32, #tpu.memory_space<vmem>>, vector<1x8x512xf32>
    %217 = vector.shape_cast %216 : vector<1x8x512xf32> to vector<8x512xf32>
    %c0_66 = arith.constant 0 : index
    %c0_67 = arith.constant 0 : index
    %218 = vector.load %arg3[%c0_66, %c0_67] : memref<128x512xf32, #tpu.memory_space<vmem>>, vector<128x512xf32>
    %cst_68 = arith.constant dense<0.000000e+00> : vector<8x512xf32>
    %219 = tpu.matmul %210, %218, %cst_68 {dimension_numbers = #tpu.dot_dimension_numbers<[1], [0], [0], [1], [0, 0, 1, 1], [], []>} : vector<8x128xf32>, vector<128x512xf32>, vector<8x512xf32> -> vector<8x512xf32>
    %220 = arith.addf %217, %219 : vector<8x512xf32>
    %221 = vector.extract_strided_slice %220 {offsets = [0, 0], sizes = [8, 128], strides = [1, 1]} : vector<8x512xf32> to vector<8x128xf32>
    %222 = arith.negf %221 : vector<8x128xf32>
    %223 = math.exp %222 : vector<8x128xf32>
    %cst_69 = arith.constant 1.000000e+00 : f32
    %224 = vector.broadcast %cst_69 : f32 to vector<8x128xf32>
    %225 = arith.addf %224, %223 : vector<8x128xf32>
    %226 = arith.divf %224, %225 : vector<8x128xf32>
    %227 = vector.extract_strided_slice %220 {offsets = [0, 128], sizes = [8, 128], strides = [1, 1]} : vector<8x512xf32> to vector<8x128xf32>
    %228 = arith.negf %227 : vector<8x128xf32>
    %229 = math.exp %228 : vector<8x128xf32>
    %cst_70 = arith.constant 1.000000e+00 : f32
    %230 = vector.broadcast %cst_70 : f32 to vector<8x128xf32>
    %231 = arith.addf %230, %229 : vector<8x128xf32>
    %232 = arith.divf %230, %231 : vector<8x128xf32>
    %233 = vector.extract_strided_slice %220 {offsets = [0, 256], sizes = [8, 128], strides = [1, 1]} : vector<8x512xf32> to vector<8x128xf32>
    %234 = math.tanh %233 : vector<8x128xf32>
    %235 = vector.extract_strided_slice %220 {offsets = [0, 384], sizes = [8, 128], strides = [1, 1]} : vector<8x512xf32> to vector<8x128xf32>
    %236 = arith.negf %235 : vector<8x128xf32>
    %237 = math.exp %236 : vector<8x128xf32>
    %cst_71 = arith.constant 1.000000e+00 : f32
    %238 = vector.broadcast %cst_71 : f32 to vector<8x128xf32>
    %239 = arith.addf %238, %237 : vector<8x128xf32>
    %240 = arith.divf %238, %239 : vector<8x128xf32>
    %241 = arith.mulf %232, %208 : vector<8x128xf32>
    %242 = arith.mulf %226, %234 : vector<8x128xf32>
    %243 = arith.addf %241, %242 : vector<8x128xf32>
    %244 = math.tanh %243 : vector<8x128xf32>
    %245 = arith.mulf %240, %244 : vector<8x128xf32>
    %246 = arith.index_cast %c6_i32 : i32 to index
    %c0_72 = arith.constant 0 : index
    %c0_73 = arith.constant 0 : index
    %247 = vector.load %arg4[%246, %c0_72, %c0_73] : memref<8x8x128xf32, #tpu.memory_space<vmem>>, vector<1x8x128xf32>
    %248 = vector.shape_cast %247 : vector<1x8x128xf32> to vector<8x128xf32>
    %249 = vector.shape_cast %245 : vector<8x128xf32> to vector<1x8x128xf32>
    tpu.vector_store %arg4[%246, %c0_72, %c0_73], %249 {strides = array<i32>} : memref<8x8x128xf32, #tpu.memory_space<vmem>>, vector<1x8x128xf32>,
    %c7_i32 = arith.constant 7 : i32
    %250 = arith.index_cast %c7_i32 : i32 to index
    %c0_74 = arith.constant 0 : index
    %c0_75 = arith.constant 0 : index
    %251 = vector.load %arg2[%250, %c0_74, %c0_75] : memref<8x8x512xf32, #tpu.memory_space<vmem>>, vector<1x8x512xf32>
    %252 = vector.shape_cast %251 : vector<1x8x512xf32> to vector<8x512xf32>
    %c0_76 = arith.constant 0 : index
    %c0_77 = arith.constant 0 : index
    %253 = vector.load %arg3[%c0_76, %c0_77] : memref<128x512xf32, #tpu.memory_space<vmem>>, vector<128x512xf32>
    %cst_78 = arith.constant dense<0.000000e+00> : vector<8x512xf32>
    %254 = tpu.matmul %245, %253, %cst_78 {dimension_numbers = #tpu.dot_dimension_numbers<[1], [0], [0], [1], [0, 0, 1, 1], [], []>} : vector<8x128xf32>, vector<128x512xf32>, vector<8x512xf32> -> vector<8x512xf32>
    %255 = arith.addf %252, %254 : vector<8x512xf32>
    %256 = vector.extract_strided_slice %255 {offsets = [0, 0], sizes = [8, 128], strides = [1, 1]} : vector<8x512xf32> to vector<8x128xf32>
    %257 = arith.negf %256 : vector<8x128xf32>
    %258 = math.exp %257 : vector<8x128xf32>
    %cst_79 = arith.constant 1.000000e+00 : f32
    %259 = vector.broadcast %cst_79 : f32 to vector<8x128xf32>
    %260 = arith.addf %259, %258 : vector<8x128xf32>
    %261 = arith.divf %259, %260 : vector<8x128xf32>
    %262 = vector.extract_strided_slice %255 {offsets = [0, 128], sizes = [8, 128], strides = [1, 1]} : vector<8x512xf32> to vector<8x128xf32>
    %263 = arith.negf %262 : vector<8x128xf32>
    %264 = math.exp %263 : vector<8x128xf32>
    %cst_80 = arith.constant 1.000000e+00 : f32
    %265 = vector.broadcast %cst_80 : f32 to vector<8x128xf32>
    %266 = arith.addf %265, %264 : vector<8x128xf32>
    %267 = arith.divf %265, %266 : vector<8x128xf32>
    %268 = vector.extract_strided_slice %255 {offsets = [0, 256], sizes = [8, 128], strides = [1, 1]} : vector<8x512xf32> to vector<8x128xf32>
    %269 = math.tanh %268 : vector<8x128xf32>
    %270 = vector.extract_strided_slice %255 {offsets = [0, 384], sizes = [8, 128], strides = [1, 1]} : vector<8x512xf32> to vector<8x128xf32>
    %271 = arith.negf %270 : vector<8x128xf32>
    %272 = math.exp %271 : vector<8x128xf32>
    %cst_81 = arith.constant 1.000000e+00 : f32
    %273 = vector.broadcast %cst_81 : f32 to vector<8x128xf32>
    %274 = arith.addf %273, %272 : vector<8x128xf32>
    %275 = arith.divf %273, %274 : vector<8x128xf32>
    %276 = arith.mulf %267, %243 : vector<8x128xf32>
    %277 = arith.mulf %261, %269 : vector<8x128xf32>
    %278 = arith.addf %276, %277 : vector<8x128xf32>
    %279 = math.tanh %278 : vector<8x128xf32>
    %280 = arith.mulf %275, %279 : vector<8x128xf32>
    %281 = arith.index_cast %c7_i32 : i32 to index
    %c0_82 = arith.constant 0 : index
    %c0_83 = arith.constant 0 : index
    %282 = vector.load %arg4[%281, %c0_82, %c0_83] : memref<8x8x128xf32, #tpu.memory_space<vmem>>, vector<1x8x128xf32>
    %283 = vector.shape_cast %282 : vector<1x8x128xf32> to vector<8x128xf32>
    %284 = vector.shape_cast %280 : vector<8x128xf32> to vector<1x8x128xf32>
    tpu.vector_store %arg4[%281, %c0_82, %c0_83], %284 {strides = array<i32>} : memref<8x8x128xf32, #tpu.memory_space<vmem>>, vector<1x8x128xf32>,
    %c8_i32 = arith.constant 8 : i32
    %c0_84 = arith.constant 0 : index
    %c0_85 = arith.constant 0 : index
    %285 = vector.load %arg5[%c0_84, %c0_85] : memref<8x128xf32, #tpu.memory_space<vmem>>, vector<8x128xf32>
    tpu.vector_store %arg5[%c0_84, %c0_85], %280 {strides = array<i32>} : memref<8x128xf32, #tpu.memory_space<vmem>>, vector<8x128xf32>,
    %c0_86 = arith.constant 0 : index
    %c0_87 = arith.constant 0 : index
    %286 = vector.load %arg6[%c0_86, %c0_87] : memref<8x128xf32, #tpu.memory_space<vmem>>, vector<8x128xf32>
    tpu.vector_store %arg6[%c0_86, %c0_87], %278 {strides = array<i32>} : memref<8x128xf32, #tpu.memory_space<vmem>>, vector<8x128xf32>,
    return
  }
  func.func @transform_0(%arg0: i32, %arg1: i32) -> (i32, i32, i32) {
    %c0_i32 = arith.constant 0 : i32
    %c0_i32_0 = arith.constant 0 : i32
    return %arg1, %arg0, %c0_i32 : i32, i32, i32
  }
  func.func @transform_1(%arg0: i32, %arg1: i32) -> (i32, i32) {
    %c0_i32 = arith.constant 0 : i32
    %c0_i32_0 = arith.constant 0 : i32
    %c0_i32_1 = arith.constant 0 : i32
    return %c0_i32, %c0_i32_0 : i32, i32
  }
  func.func @transform_2(%arg0: i32, %arg1: i32) -> (i32, i32, i32) {
    %c0_i32 = arith.constant 0 : i32
    %c0_i32_0 = arith.constant 0 : i32
    return %arg1, %arg0, %c0_i32 : i32, i32, i32
  }
}

module attributes {stable_mosaic.version = 11 : i64} {
  func.func @_matmul_bias_kernel(%arg0: i32, %arg1: i32, %arg2: memref<64x32xf32, #tpu.memory_space<vmem>>, %arg3: memref<32x512xf32, #tpu.memory_space<vmem>>, %arg4: memref<1x512xf32, #tpu.memory_space<vmem>>, %arg5: memref<64x512xf32, #tpu.memory_space<vmem>>) attributes {dimension_semantics = [#tpu.dimension_semantics<parallel>, #tpu.dimension_semantics<parallel>], iteration_bounds = array<i64: 1, 1>, scalar_prefetch = 0 : i64, scratch_operands = 0 : i64, tpu.core_type = #tpu.core_type<tc>, window_params = [{transform_indices = @transform_0, window_bounds = array<i64: 64, 32>}, {transform_indices = @transform_1, window_bounds = array<i64: 32, 512>}, {transform_indices = @transform_2, window_bounds = array<i64: 1, 512>}, {transform_indices = @transform_3, window_bounds = array<i64: 64, 512>}]} {
    %c0 = arith.constant 0 : index
    %c0_0 = arith.constant 0 : index
    %0 = vector.load %arg2[%c0, %c0_0] : memref<64x32xf32, #tpu.memory_space<vmem>>, vector<64x32xf32>
    %c0_1 = arith.constant 0 : index
    %c0_2 = arith.constant 0 : index
    %1 = vector.load %arg3[%c0_1, %c0_2] : memref<32x512xf32, #tpu.memory_space<vmem>>, vector<32x512xf32>
    %cst = arith.constant dense<0.000000e+00> : vector<64x512xf32>
    %2 = tpu.matmul %0, %1, %cst {dimension_numbers = #tpu.dot_dimension_numbers<[1], [0], [0], [1], [0, 0, 1, 1], [], []>} : vector<64x32xf32>, vector<32x512xf32>, vector<64x512xf32> -> vector<64x512xf32>
    %c0_3 = arith.constant 0 : index
    %c0_4 = arith.constant 0 : index
    %3 = vector.load %arg4[%c0_3, %c0_4] : memref<1x512xf32, #tpu.memory_space<vmem>>, vector<1x512xf32>
    %4 = vector.broadcast %3 : vector<1x512xf32> to vector<64x512xf32>
    %5 = arith.addf %2, %4 : vector<64x512xf32>
    %c0_5 = arith.constant 0 : index
    %c0_6 = arith.constant 0 : index
    %6 = vector.load %arg5[%c0_5, %c0_6] : memref<64x512xf32, #tpu.memory_space<vmem>>, vector<64x512xf32>
    tpu.vector_store %arg5[%c0_5, %c0_6], %5 {strides = array<i32>} : memref<64x512xf32, #tpu.memory_space<vmem>>, vector<64x512xf32>,
    return
  }
  func.func @transform_0(%arg0: i32, %arg1: i32) -> (i32, i32) {
    %c0_i32 = arith.constant 0 : i32
    %c0_i32_0 = arith.constant 0 : i32
    return %arg0, %c0_i32 : i32, i32
  }
  func.func @transform_1(%arg0: i32, %arg1: i32) -> (i32, i32) {
    %c0_i32 = arith.constant 0 : i32
    %c0_i32_0 = arith.constant 0 : i32
    return %c0_i32, %arg1 : i32, i32
  }
  func.func @transform_2(%arg0: i32, %arg1: i32) -> (i32, i32) {
    %c0_i32 = arith.constant 0 : i32
    %c0_i32_0 = arith.constant 0 : i32
    return %c0_i32, %arg1 : i32, i32
  }
  func.func @transform_3(%arg0: i32, %arg1: i32) -> (i32, i32) {
    %c0_i32 = arith.constant 0 : i32
    return %arg0, %arg1 : i32, i32
  }
}

module attributes {stable_mosaic.version = 11 : i64} {
  func.func @_matmul_bias_kernel(%arg0: i32, %arg1: i32, %arg2: memref<64x128xf32, #tpu.memory_space<vmem>>, %arg3: memref<128x128xf32, #tpu.memory_space<vmem>>, %arg4: memref<1x128xf32, #tpu.memory_space<vmem>>, %arg5: memref<64x128xf32, #tpu.memory_space<vmem>>) attributes {dimension_semantics = [#tpu.dimension_semantics<parallel>, #tpu.dimension_semantics<parallel>], iteration_bounds = array<i64: 1, 1>, scalar_prefetch = 0 : i64, scratch_operands = 0 : i64, tpu.core_type = #tpu.core_type<tc>, window_params = [{transform_indices = @transform_0, window_bounds = array<i64: 64, 128>}, {transform_indices = @transform_1, window_bounds = array<i64: 128, 128>}, {transform_indices = @transform_2, window_bounds = array<i64: 1, 128>}, {transform_indices = @transform_3, window_bounds = array<i64: 64, 128>}]} {
    %c0 = arith.constant 0 : index
    %c0_0 = arith.constant 0 : index
    %0 = vector.load %arg2[%c0, %c0_0] : memref<64x128xf32, #tpu.memory_space<vmem>>, vector<64x128xf32>
    %c0_1 = arith.constant 0 : index
    %c0_2 = arith.constant 0 : index
    %1 = vector.load %arg3[%c0_1, %c0_2] : memref<128x128xf32, #tpu.memory_space<vmem>>, vector<128x128xf32>
    %cst = arith.constant dense<0.000000e+00> : vector<64x128xf32>
    %2 = tpu.matmul %0, %1, %cst {dimension_numbers = #tpu.dot_dimension_numbers<[1], [0], [0], [1], [0, 0, 1, 1], [], []>} : vector<64x128xf32>, vector<128x128xf32>, vector<64x128xf32> -> vector<64x128xf32>
    %c0_3 = arith.constant 0 : index
    %c0_4 = arith.constant 0 : index
    %3 = vector.load %arg4[%c0_3, %c0_4] : memref<1x128xf32, #tpu.memory_space<vmem>>, vector<1x128xf32>
    %4 = vector.broadcast %3 : vector<1x128xf32> to vector<64x128xf32>
    %5 = arith.addf %2, %4 : vector<64x128xf32>
    %c0_5 = arith.constant 0 : index
    %c0_6 = arith.constant 0 : index
    %6 = vector.load %arg5[%c0_5, %c0_6] : memref<64x128xf32, #tpu.memory_space<vmem>>, vector<64x128xf32>
    tpu.vector_store %arg5[%c0_5, %c0_6], %5 {strides = array<i32>} : memref<64x128xf32, #tpu.memory_space<vmem>>, vector<64x128xf32>,
    return
  }
  func.func @transform_0(%arg0: i32, %arg1: i32) -> (i32, i32) {
    %c0_i32 = arith.constant 0 : i32
    %c0_i32_0 = arith.constant 0 : i32
    return %arg1, %c0_i32 : i32, i32
  }
  func.func @transform_1(%arg0: i32, %arg1: i32) -> (i32, i32) {
    %c0_i32 = arith.constant 0 : i32
    %c0_i32_0 = arith.constant 0 : i32
    return %c0_i32, %arg0 : i32, i32
  }
  func.func @transform_2(%arg0: i32, %arg1: i32) -> (i32, i32) {
    %c0_i32 = arith.constant 0 : i32
    %c0_i32_0 = arith.constant 0 : i32
    return %c0_i32, %arg0 : i32, i32
  }
  func.func @transform_3(%arg0: i32, %arg1: i32) -> (i32, i32) {
    %c0_i32 = arith.constant 0 : i32
    return %arg1, %arg0 : i32, i32
  }
}

</mosaic_0001>

<bundles_post_ra>
// kernel: decoder_rnn_forward.5
= control target key start
LH: loop header
LB: loop body
LE: loop exit
PB: predicated region body
PF: predicated region fallthrough
CT: control target
= control target key end

     0   :  { %s263_s1 = inlined_call_operand.vmem [shape: f32[128,128], index: 1, kind: input, shape index: {}]   ;;  %s264_s2 = inlined_call_operand.vmem [shape: f32[1,128], index: 2, kind: input, shape index: {}]   ;;  %s265_s0 = inlined_call_operand.vmem [shape: f32[64,128], index: 0, kind: input, shape index: {}]   ;;  %s266_s3 = inlined_call_operand.vmem [shape: f32[64,128], index: 3, kind: output, shape index: {}]  }
   0x1   :  { %v37_v0 = vld [vmem:[%s263_s1 + $0x78] sm:$0xff]  ;;  %v36_v1 = vld [vmem:[%s263_s1 + $0x70] sm:$0xff]  ;;  %v35_v2 = vld [vmem:[%s263_s1 + $0x68] sm:$0xff] }
   0x2   :  { %96 = vmatpush.msra.mxu2 %v37_v0  ;;  %97 = vmatpush.msra.mxu3 %v37_v0  ;;  %v34_v3 = vld [vmem:[%s263_s1 + $0x60] sm:$0xff]  ;;  %v33_v4 = vld [vmem:[%s263_s1 + $0x58] sm:$0xff]  ;;  %v32_v5 = vld [vmem:[%s263_s1 + $0x50] sm:$0xff] }
   0x3   :  { %42 = vmatpush.msra.mxu0 %v37_v0  ;;  %95 = vmatpush.msra.mxu1 %v37_v0  ;;  %v31_v6 = vld [vmem:[%s263_s1 + $0x48] sm:$0xff]  ;;  %v30_v7 = vld [vmem:[%s263_s1 + $0x40] sm:$0xff]  ;;  %v29_v8 = vld [vmem:[%s263_s1 + $0x38] sm:$0xff] }
   0x4   :  { %99 = vmatpush.msra.mxu2 %v36_v1  ;;  %100 = vmatpush.msra.mxu3 %v36_v1  ;;  %v28_v9 = vld [vmem:[%s263_s1 + $0x30] sm:$0xff]  ;;  %v27_v10 = vld [vmem:[%s263_s1 + $0x28] sm:$0xff]  ;;  %v26_v11 = vld [vmem:[%s263_s1 + $0x20] sm:$0xff] }
   0x5   :  { %43 = vmatpush.msra.mxu0 %v36_v1  ;;  %98 = vmatpush.msra.mxu1 %v36_v1  ;;  %v25_v12 = vld [vmem:[%s263_s1 + $0x18] sm:$0xff]  ;;  %v24_v13 = vld [vmem:[%s263_s1 + $0x10] sm:$0xff]  ;;  %v23_v14 = vld [vmem:[%s263_s1 + $0x8] sm:$0xff] }
   0x6   :  { %102 = vmatpush.msra.mxu2 %v35_v2  ;;  %103 = vmatpush.msra.mxu3 %v35_v2  ;;  %v22_v15 = vld [vmem:[%s263_s1] sm:$0xff]  ;;  %v20_v17 = vld [vmem:[%s265_s0 + $0x30] sm:$0xff]  ;;  %v19_v20 = vld [vmem:[%s265_s0 + $0x28] sm:$0xff] }
   0x7   :  { %44 = vmatpush.msra.mxu0 %v35_v2  ;;  %101 = vmatpush.msra.mxu1 %v35_v2  ;;  %v18_v16 = vld [vmem:[%s265_s0 + $0x20] sm:$0xff]  ;;  %v16_v19 = vld [vmem:[%s265_s0 + $0x10] sm:$0xff]  ;;  %v21_v21 = vld [vmem:[%s265_s0 + $0x38] sm:$0xff] }
   0x8   :  { %105 = vmatpush.msra.mxu2 %v34_v3  ;;  %106 = vmatpush.msra.mxu3 %v34_v3  ;;  %v14_v18 = vld [vmem:[%s265_s0] sm:$0xff]  ;;  %v15_v22 = vld [vmem:[%s265_s0 + $0x8] sm:$0xff]  ;;  %v17_v23 = vld [vmem:[%s265_s0 + $0x18] sm:$0xff] }
   0x9   :  { %45 = vmatpush.msra.mxu0 %v34_v3  ;;  %104 = vmatpush.msra.mxu1 %v34_v3  ;;  %v143_v24 = vld [vmem:[%s264_s2] ss:$0 sm:$0xff] }
   0xa   :  { %108 = vmatpush.msra.mxu2 %v33_v4  ;;  %109 = vmatpush.msra.mxu3 %v33_v4 }
   0xb   :  { %46 = vmatpush.msra.mxu0 %v33_v4  ;;  %107 = vmatpush.msra.mxu1 %v33_v4 }
   0xc   :  { %111 = vmatpush.msra.mxu2 %v32_v5  ;;  %112 = vmatpush.msra.mxu3 %v32_v5 }
   0xd   :  { %47 = vmatpush.msra.mxu0 %v32_v5  ;;  %110 = vmatpush.msra.mxu1 %v32_v5 }
   0xe   :  { %114 = vmatpush.msra.mxu2 %v31_v6  ;;  %115 = vmatpush.msra.mxu3 %v31_v6 }
   0xf   :  { %48 = vmatpush.msra.mxu0 %v31_v6  ;;  %113 = vmatpush.msra.mxu1 %v31_v6 }
  0x10   :  { %117 = vmatpush.msra.mxu2 %v30_v7  ;;  %118 = vmatpush.msra.mxu3 %v30_v7 }
  0x11   :  { %49 = vmatpush.msra.mxu0 %v30_v7  ;;  %116 = vmatpush.msra.mxu1 %v30_v7 }
  0x12   :  { %120 = vmatpush.msra.mxu2 %v29_v8  ;;  %121 = vmatpush.msra.mxu3 %v29_v8 }
  0x13   :  { %50 = vmatpush.msra.mxu0 %v29_v8  ;;  %119 = vmatpush.msra.mxu1 %v29_v8 }
  0x14   :  { %123 = vmatpush.msra.mxu2 %v28_v9  ;;  %124 = vmatpush.msra.mxu3 %v28_v9 }
  0x15   :  { %51 = vmatpush.msra.mxu0 %v28_v9  ;;  %122 = vmatpush.msra.mxu1 %v28_v9 }
  0x16   :  { %126 = vmatpush.msra.mxu2 %v27_v10  ;;  %127 = vmatpush.msra.mxu3 %v27_v10 }
  0x17   :  { %52 = vmatpush.msra.mxu0 %v27_v10  ;;  %125 = vmatpush.msra.mxu1 %v27_v10 }
  0x18   :  { %129 = vmatpush.msra.mxu2 %v26_v11  ;;  %130 = vmatpush.msra.mxu3 %v26_v11 }
  0x19   :  { %53 = vmatpush.msra.mxu0 %v26_v11  ;;  %128 = vmatpush.msra.mxu1 %v26_v11 }
  0x1a   :  { %132 = vmatpush.msra.mxu2 %v25_v12  ;;  %133 = vmatpush.msra.mxu3 %v25_v12 }
  0x1b   :  { %54 = vmatpush.msra.mxu0 %v25_v12  ;;  %131 = vmatpush.msra.mxu1 %v25_v12 }
  0x1c   :  { %135 = vmatpush.msra.mxu2 %v24_v13  ;;  %136 = vmatpush.msra.mxu3 %v24_v13 }
  0x1d   :  { %55 = vmatpush.msra.mxu0 %v24_v13  ;;  %134 = vmatpush.msra.mxu1 %v24_v13 }
  0x1e   :  { %138 = vmatpush.msra.mxu2 %v23_v14  ;;  %139 = vmatpush.msra.mxu3 %v23_v14 }
  0x1f   :  { %56 = vmatpush.msra.mxu0 %v23_v14  ;;  %137 = vmatpush.msra.mxu1 %v23_v14 }
  0x20   :  { %141 = vmatpush.msra.mxu2 %v22_v15  ;;  %142 = vmatpush.msra.mxu3 %v22_v15 }
  0x21   :  { %70 = vmatmul.f32.vlgmr.msra.gmra.mxu2 %v18_v16  ;;  %76 = vmatmul.f32.vlgmr.msra.gmra.mxu3 %v20_v17 }
  0x22   :  { %57 = vmatpush.msra.mxu0 %v22_v15  ;;  %140 = vmatpush.msra.mxu1 %v22_v15 }
  0x23   :  { %58 = vmatmul.f32.vlgmr.msra.gmra.mxu0 %v14_v18  ;;  %64 = vmatmul.f32.vlgmr.msra.gmra.mxu1 %v16_v19 }
  0x29   :  { %73 = vmatmul.f32.gmra.mxu2 %v19_v20  ;;  %79 = vmatmul.f32.gmra.mxu3 %v21_v21 }
  0x2b   :  { %61 = vmatmul.f32.gmra.mxu0 %v15_v22  ;;  %67 = vmatmul.f32.gmra.mxu1 %v17_v23 }
  0xa0   :  { %v59_v25 = vpop.f32.mrf.mxu0  ;;  %v65_v26 = vpop.f32.mrf.mxu1 }
  0xa1   :  { %v60_v27 = vadd.f32 %v143_v24, %v59_v25  ;;  %v66_v28 = vadd.f32 %v143_v24, %v65_v26 }
  0xa3   :  { %83 = vst [vmem:[%s266_s3] sm:$0xff] %v60_v27 }
  0xa4   :  { %85 = vst [vmem:[%s266_s3 + $0x10] sm:$0xff] %v66_v28  ;;  %v71_v29 = vpop.f32.mrf.mxu2  ;;  %v77_v30 = vpop.f32.mrf.mxu3 }
  0xa5   :  { %v72_v31 = vadd.f32 %v143_v24, %v71_v29  ;;  %v78_v32 = vadd.f32 %v143_v24, %v77_v30 }
  0xa7   :  { %87 = vst [vmem:[%s266_s3 + $0x20] sm:$0xff] %v72_v31 }
  0xa8   :  { %89 = vst [vmem:[%s266_s3 + $0x30] sm:$0xff] %v78_v32  ;;  %v62_v33 = vpop.f32.mrf.mxu0  ;;  %v68_v34 = vpop.f32.mrf.mxu1 }
  0xa9   :  { %v63_v35 = vadd.f32 %v143_v24, %v62_v33  ;;  %v69_v36 = vadd.f32 %v143_v24, %v68_v34 }
  0xab   :  { %84 = vst [vmem:[%s266_s3 + $0x8] sm:$0xff] %v63_v35 }
  0xac   :  { %86 = vst [vmem:[%s266_s3 + $0x18] sm:$0xff] %v69_v36  ;;  %v74_v37 = vpop.f32.mrf.mxu2  ;;  %v80_v38 = vpop.f32.mrf.mxu3 }
  0xad   :  { %v75_v39 = vadd.f32 %v143_v24, %v74_v37  ;;  %v81_v40 = vadd.f32 %v143_v24, %v80_v38 }
  0xaf   :  { %88 = vst [vmem:[%s266_s3 + $0x28] sm:$0xff] %v75_v39 }
  0xb0   :  { %90 = vst [vmem:[%s266_s3 + $0x38] sm:$0xff] %v81_v40 }

// kernel: decoder_rnn_forward.3
= control target key start
LH: loop header
LB: loop body
LE: loop exit
PB: predicated region body
PF: predicated region fallthrough
CT: control target
= control target key end

     0   :  { %vm48_vm0 = vcmask 261120   ;;  %s568_s1 = inlined_call_operand.vmem [shape: f32[32,512], index: 1, kind: input, shape index: {}]   ;;  %s569_s0 = inlined_call_operand.vmem [shape: f32[64,32], index: 0, kind: input, shape index: {}]   ;;  %s570_s2 = inlined_call_operand.vmem [shape: f32[1,512], index: 2, kind: input, shape index: {}]   ;;  %s571_s3 = inlined_call_operand.vmem [shape: f32[64,512], index: 3, kind: output, shape index: {}]  }
   0x1   :  { %v36_v0 = vld [vmem:[%s568_s1 + $0x70] sm:$0xff]  ;;  %v37_v1 = vld [vmem:[%s568_s1 + $0x78] sm:$0xff]  ;;  %v34_v6 = vld [vmem:[%s568_s1 + $0x60] sm:$0xff] }
   0x2   :  { %v32_v2 = vld [vmem:[%s568_s1 + $0x50] sm:$0xff]  ;;  %167 = vmatpush.msra.mxu2 %v36_v0  ;;  %208 = vmatpush.msra.mxu3 %v37_v1  ;;  %v33_v3 = vld [vmem:[%s568_s1 + $0x58] sm:$0xff]  ;;  %v35_v7 = vld [vmem:[%s568_s1 + $0x68] sm:$0xff] }
   0x3   :  { %v28_v4 = vld [vmem:[%s568_s1 + $0x30] sm:$0xff]  ;;  %v29_v5 = vld [vmem:[%s568_s1 + $0x38] sm:$0xff]  ;;  %v30_v8 = vld [vmem:[%s568_s1 + $0x40] sm:$0xff]  ;;  %85 = vmatpush.msra.mxu0 %v34_v6  ;;  %126 = vmatpush.msra.mxu1 %v35_v7 }
   0x4   :  { %168 = vmatpush.msra.mxu2 %v32_v2  ;;  %209 = vmatpush.msra.mxu3 %v33_v3  ;;  %v24_v9 = vld [vmem:[%s568_s1 + $0x10] sm:$0xff]  ;;  %v25_v10 = vld [vmem:[%s568_s1 + $0x18] sm:$0xff]  ;;  %v31_v11 = vld [vmem:[%s568_s1 + $0x48] sm:$0xff] }
   0x5   :  { %v14_v12 = vld [vmem:[%s569_s0] sm:$0xff]  ;;  %86 = vmatpush.msra.mxu0 %v30_v8  ;;  %127 = vmatpush.msra.mxu1 %v31_v11  ;;  %v27_v14 = vld [vmem:[%s568_s1 + $0x28] sm:$0xff]  ;;  %v16_v18 = vld [vmem:[%s569_s0 + $0x10] sm:$0xff] }
   0x6   :  { %169 = vmatpush.msra.mxu2 %v28_v4  ;;  %210 = vmatpush.msra.mxu3 %v29_v5  ;;  %v26_v13 = vld [vmem:[%s568_s1 + $0x20] sm:$0xff]  ;;  %v23_v16 = vld [vmem:[%s568_s1 + $0x8] sm:$0xff]  ;;  %v17_v19 = vld [vmem:[%s569_s0 + $0x18] sm:$0xff] }
   0x7   :  { %v22_v15 = vld [vmem:[%s568_s1] sm:$0xff]  ;;  %87 = vmatpush.msra.mxu0 %v26_v13  ;;  %128 = vmatpush.msra.mxu1 %v27_v14  ;;  %v15_v17 = vld [vmem:[%s569_s0 + $0x8] sm:$0xff]  ;;  %v20_v22 = vld [vmem:[%s569_s0 + $0x30] sm:$0xff] }
   0x8   :  { %170 = vmatpush.msra.mxu2 %v24_v9  ;;  %211 = vmatpush.msra.mxu3 %v25_v10  ;;  %v18_v20 = vld [vmem:[%s569_s0 + $0x20] sm:$0xff]  ;;  %v19_v21 = vld [vmem:[%s569_s0 + $0x28] sm:$0xff]  ;;  %v21_v23 = vld [vmem:[%s569_s0 + $0x38] sm:$0xff] }
   0x9   :  { %289 = vmatmul.msk.f32.vlgmr.msra.gmra.mxu2 %vm48_vm0, %v14_v12  ;;  %297 = vmatmul.msk.f32.vlgmr.msra.gmra.mxu3 %vm48_vm0, %v14_v12  ;;  %v38_v24 = vld [vmem:[%s570_s2] sm:$0xf] }
   0xa   :  { %88 = vmatpush.msra.mxu0 %v22_v15  ;;  %129 = vmatpush.msra.mxu1 %v23_v16  ;;  %v432_v25 = vperm.slane %v38_v24, 0  ;;  %v434_v26 = vperm.slane %v38_v24, 1  ;;  %v436_v27 = vperm.slane %v38_v24, 2  ;;  %v438_v28 = vperm.slane %v38_v24, 3 }
   0xb   :  { %273 = vmatmul.msk.f32.vlgmr.msra.gmra.mxu0 %vm48_vm0, %v14_v12  ;;  %281 = vmatmul.msk.f32.vlgmr.msra.gmra.mxu1 %vm48_vm0, %v14_v12 }
  0x11   :  { %290 = vmatmul.msk.f32.gmra.mxu2 %vm48_vm0, %v15_v17  ;;  %298 = vmatmul.msk.f32.gmra.mxu3 %vm48_vm0, %v15_v17 }
  0x13   :  { %274 = vmatmul.msk.f32.gmra.mxu0 %vm48_vm0, %v15_v17  ;;  %282 = vmatmul.msk.f32.gmra.mxu1 %vm48_vm0, %v15_v17 }
  0x19   :  { %291 = vmatmul.msk.f32.gmra.mxu2 %vm48_vm0, %v16_v18  ;;  %299 = vmatmul.msk.f32.gmra.mxu3 %vm48_vm0, %v16_v18 }
  0x1b   :  { %275 = vmatmul.msk.f32.gmra.mxu0 %vm48_vm0, %v16_v18  ;;  %283 = vmatmul.msk.f32.gmra.mxu1 %vm48_vm0, %v16_v18 }
  0x21   :  { %292 = vmatmul.msk.f32.gmra.mxu2 %vm48_vm0, %v17_v19  ;;  %300 = vmatmul.msk.f32.gmra.mxu3 %vm48_vm0, %v17_v19 }
  0x23   :  { %276 = vmatmul.msk.f32.gmra.mxu0 %vm48_vm0, %v17_v19  ;;  %284 = vmatmul.msk.f32.gmra.mxu1 %vm48_vm0, %v17_v19 }
  0x29   :  { %293 = vmatmul.msk.f32.gmra.mxu2 %vm48_vm0, %v18_v20  ;;  %301 = vmatmul.msk.f32.gmra.mxu3 %vm48_vm0, %v18_v20 }
  0x2b   :  { %277 = vmatmul.msk.f32.gmra.mxu0 %vm48_vm0, %v18_v20  ;;  %285 = vmatmul.msk.f32.gmra.mxu1 %vm48_vm0, %v18_v20 }
  0x31   :  { %294 = vmatmul.msk.f32.gmra.mxu2 %vm48_vm0, %v19_v21  ;;  %302 = vmatmul.msk.f32.gmra.mxu3 %vm48_vm0, %v19_v21 }
  0x33   :  { %278 = vmatmul.msk.f32.gmra.mxu0 %vm48_vm0, %v19_v21  ;;  %286 = vmatmul.msk.f32.gmra.mxu1 %vm48_vm0, %v19_v21 }
  0x39   :  { %295 = vmatmul.msk.f32.gmra.mxu2 %vm48_vm0, %v20_v22  ;;  %303 = vmatmul.msk.f32.gmra.mxu3 %vm48_vm0, %v20_v22 }
  0x3b   :  { %279 = vmatmul.msk.f32.gmra.mxu0 %vm48_vm0, %v20_v22  ;;  %287 = vmatmul.msk.f32.gmra.mxu1 %vm48_vm0, %v20_v22 }
  0x41   :  { %296 = vmatmul.msk.f32.gmra.mxu2 %vm48_vm0, %v21_v23  ;;  %304 = vmatmul.msk.f32.gmra.mxu3 %vm48_vm0, %v21_v23 }
  0x43   :  { %280 = vmatmul.msk.f32.gmra.mxu0 %vm48_vm0, %v21_v23  ;;  %288 = vmatmul.msk.f32.gmra.mxu1 %vm48_vm0, %v21_v23 }
  0x88   :  { %v90_v29 = vpop.f32.mrf.mxu0  ;;  %v131_v30 = vpop.f32.mrf.mxu1 }
  0x89   :  { %v91_v31 = vadd.f32 %v90_v29, %v432_v25  ;;  %v132_v32 = vadd.f32 %v131_v30, %v434_v26 }
  0x8b   :  { %237 = vst [vmem:[%s571_s3] sm:$0xff] %v91_v31 }
  0x8c   :  { %v172_v33 = vpop.f32.mrf.mxu2  ;;  %v213_v34 = vpop.f32.mrf.mxu3  ;;  %238 = vst [vmem:[%s571_s3 + $0x8] sm:$0xff] %v132_v32 }
  0x8d   :  { %v173_v35 = vadd.f32 %v172_v33, %v436_v27  ;;  %v214_v36 = vadd.f32 %v213_v34, %v438_v28 }
  0x8f   :  { %239 = vst [vmem:[%s571_s3 + $0x10] sm:$0xff] %v173_v35 }
  0x90   :  { %240 = vst [vmem:[%s571_s3 + $0x18] sm:$0xff] %v214_v36  ;;  %v93_v37 = vpop.f32.mrf.mxu0  ;;  %v134_v38 = vpop.f32.mrf.mxu1 }
  0x91   :  { %v94_v39 = vadd.f32 %v93_v37, %v432_v25  ;;  %v135_v40 = vadd.f32 %v134_v38, %v434_v26 }
  0x93   :  { %241 = vst [vmem:[%s571_s3 + $0x20] sm:$0xff] %v94_v39 }
  0x94   :  { %v175_v41 = vpop.f32.mrf.mxu2  ;;  %v216_v42 = vpop.f32.mrf.mxu3  ;;  %242 = vst [vmem:[%s571_s3 + $0x28] sm:$0xff] %v135_v40 }
  0x95   :  { %v176_v43 = vadd.f32 %v175_v41, %v436_v27  ;;  %v217_v44 = vadd.f32 %v216_v42, %v438_v28 }
  0x97   :  { %243 = vst [vmem:[%s571_s3 + $0x30] sm:$0xff] %v176_v43 }
  0x98   :  { %244 = vst [vmem:[%s571_s3 + $0x38] sm:$0xff] %v217_v44  ;;  %v96_v45 = vpop.f32.mrf.mxu0  ;;  %v137_v46 = vpop.f32.mrf.mxu1 }
  0x99   :  { %v97_v47 = vadd.f32 %v96_v45, %v432_v25  ;;  %v138_v48 = vadd.f32 %v137_v46, %v434_v26 }
  0x9b   :  { %245 = vst [vmem:[%s571_s3 + $0x40] sm:$0xff] %v97_v47 }
  0x9c   :  { %v178_v49 = vpop.f32.mrf.mxu2  ;;  %v219_v50 = vpop.f32.mrf.mxu3  ;;  %246 = vst [vmem:[%s571_s3 + $0x48] sm:$0xff] %v138_v48 }
  0x9d   :  { %v179_v51 = vadd.f32 %v178_v49, %v436_v27  ;;  %v220_v52 = vadd.f32 %v219_v50, %v438_v28 }
  0x9f   :  { %247 = vst [vmem:[%s571_s3 + $0x50] sm:$0xff] %v179_v51 }
  0xa0   :  { %248 = vst [vmem:[%s571_s3 + $0x58] sm:$0xff] %v220_v52  ;;  %v99_v53 = vpop.f32.mrf.mxu0  ;;  %v140_v54 = vpop.f32.mrf.mxu1 }
  0xa1   :  { %v100_v55 = vadd.f32 %v99_v53, %v432_v25  ;;  %v141_v56 = vadd.f32 %v140_v54, %v434_v26 }
  0xa3   :  { %249 = vst [vmem:[%s571_s3 + $0x60] sm:$0xff] %v100_v55 }
  0xa4   :  { %v181_v57 = vpop.f32.mrf.mxu2  ;;  %v222_v58 = vpop.f32.mrf.mxu3  ;;  %250 = vst [vmem:[%s571_s3 + $0x68] sm:$0xff] %v141_v56 }
  0xa5   :  { %v182_v59 = vadd.f32 %v181_v57, %v436_v27  ;;  %v223_v60 = vadd.f32 %v222_v58, %v438_v28 }
  0xa7   :  { %251 = vst [vmem:[%s571_s3 + $0x70] sm:$0xff] %v182_v59 }
  0xa8   :  { %252 = vst [vmem:[%s571_s3 + $0x78] sm:$0xff] %v223_v60  ;;  %v102_v61 = vpop.f32.mrf.mxu0  ;;  %v143_v62 = vpop.f32.mrf.mxu1 }
  0xa9   :  { %v103_v63 = vadd.f32 %v102_v61, %v432_v25  ;;  %v144_v0 = vadd.f32 %v143_v62, %v434_v26 }
  0xab   :  { %253 = vst [vmem:[%s571_s3 + $0x80] sm:$0xff] %v103_v63 }
  0xac   :  { %v184_v1 = vpop.f32.mrf.mxu2  ;;  %v225_v2 = vpop.f32.mrf.mxu3  ;;  %254 = vst [vmem:[%s571_s3 + $0x88] sm:$0xff] %v144_v0 }
  0xad   :  { %v185_v3 = vadd.f32 %v184_v1, %v436_v27  ;;  %v226_v4 = vadd.f32 %v225_v2, %v438_v28 }
  0xaf   :  { %255 = vst [vmem:[%s571_s3 + $0x90] sm:$0xff] %v185_v3 }
  0xb0   :  { %256 = vst [vmem:[%s571_s3 + $0x98] sm:$0xff] %v226_v4  ;;  %v105_v5 = vpop.f32.mrf.mxu0  ;;  %v146_v6 = vpop.f32.mrf.mxu1 }
  0xb1   :  { %v106_v7 = vadd.f32 %v105_v5, %v432_v25  ;;  %v147_v8 = vadd.f32 %v146_v6, %v434_v26 }
  0xb3   :  { %257 = vst [vmem:[%s571_s3 + $0xa0] sm:$0xff] %v106_v7 }
  0xb4   :  { %v187_v9 = vpop.f32.mrf.mxu2  ;;  %v228_v10 = vpop.f32.mrf.mxu3  ;;  %258 = vst [vmem:[%s571_s3 + $0xa8] sm:$0xff] %v147_v8 }
  0xb5   :  { %v188_v11 = vadd.f32 %v187_v9, %v436_v27  ;;  %v229_v12 = vadd.f32 %v228_v10, %v438_v28 }
  0xb7   :  { %259 = vst [vmem:[%s571_s3 + $0xb0] sm:$0xff] %v188_v11 }
  0xb8   :  { %260 = vst [vmem:[%s571_s3 + $0xb8] sm:$0xff] %v229_v12  ;;  %v108_v13 = vpop.f32.mrf.mxu0  ;;  %v149_v14 = vpop.f32.mrf.mxu1 }
  0xb9   :  { %v109_v15 = vadd.f32 %v108_v13, %v432_v25  ;;  %v150_v16 = vadd.f32 %v149_v14, %v434_v26 }
  0xbb   :  { %261 = vst [vmem:[%s571_s3 + $0xc0] sm:$0xff] %v109_v15 }
  0xbc   :  { %v190_v17 = vpop.f32.mrf.mxu2  ;;  %v231_v18 = vpop.f32.mrf.mxu3  ;;  %262 = vst [vmem:[%s571_s3 + $0xc8] sm:$0xff] %v150_v16 }
  0xbd   :  { %v191_v19 = vadd.f32 %v190_v17, %v436_v27  ;;  %v232_v20 = vadd.f32 %v231_v18, %v438_v28 }
  0xbf   :  { %263 = vst [vmem:[%s571_s3 + $0xd0] sm:$0xff] %v191_v19 }
  0xc0   :  { %264 = vst [vmem:[%s571_s3 + $0xd8] sm:$0xff] %v232_v20  ;;  %v111_v21 = vpop.f32.mrf.mxu0  ;;  %v152_v22 = vpop.f32.mrf.mxu1 }
  0xc1   :  { %v112_v23 = vadd.f32 %v111_v21, %v432_v25  ;;  %v153_v24 = vadd.f32 %v152_v22, %v434_v26 }
  0xc3   :  { %265 = vst [vmem:[%s571_s3 + $0xe0] sm:$0xff] %v112_v23 }
  0xc4   :  { %v193_v29 = vpop.f32.mrf.mxu2  ;;  %v234_v30 = vpop.f32.mrf.mxu3  ;;  %266 = vst [vmem:[%s571_s3 + $0xe8] sm:$0xff] %v153_v24 }
  0xc5   :  { %v194_v31 = vadd.f32 %v193_v29, %v436_v27  ;;  %v235_v32 = vadd.f32 %v234_v30, %v438_v28 }
  0xc7   :  { %267 = vst [vmem:[%s571_s3 + $0xf0] sm:$0xff] %v194_v31 }
  0xc8   :  { %268 = vst [vmem:[%s571_s3 + $0xf8] sm:$0xff] %v235_v32 }

// kernel: decoder_rnn_forward.4
= control target key start
LH: loop header
LB: loop body
LE: loop exit
PB: predicated region body
PF: predicated region fallthrough
CT: control target
= control target key end

     0   :  { %v1955_v60 = vmov 0.0   ;;  %s3651_s1 = inlined_call_operand.vmem [shape: f32[128,512], index: 1, kind: input, shape index: {}]   ;;  %s3652_s0 = inlined_call_operand.vmem [shape: f32[8,8,512], index: 0, kind: input, shape index: {}]   ;;  %s3653_s2 = inlined_call_operand.vmem [shape: f32[8,8,128], index: 2, kind: output, shape index: {}]  }
   0x1   :  { %v1974_v0 = vld [vmem:[%s3651_s1 + $0x1e0] sm:$0xff]  ;;  %v1979_v1 = vld [vmem:[%s3651_s1 + $0x1e8] sm:$0xff]  ;;  %v1984_v2 = vld [vmem:[%s3651_s1 + $0x1f8] sm:$0xff] }
   0x2   :  { %3687 = vst [vmem:[#allocation4_spill] sm:$0xff] %v1984_v2  ;;  %87 = vmatpush.msra.mxu0 %v1974_v0  ;;  %107 = vmatpush.msra.mxu1 %v1979_v1  ;;  %v1991_v3 = vld [vmem:[%s3651_s1 + $0x1c0] sm:$0xff]  ;;  %v1996_v4 = vld [vmem:[%s3651_s1 + $0x1c8] sm:$0xff]  ;;  %v2001_v5 = vld [vmem:[%s3651_s1 + $0x1d8] sm:$0xff] }
   0x3   :  { %147 = vmatpush.msra.mxu3 %v1984_v2  ;;  %v2007_v6 = vld [vmem:[%s3651_s1 + $0x1a0] sm:$0xff]  ;;  %v2012_v7 = vld [vmem:[%s3651_s1 + $0x1a8] sm:$0xff]  ;;  %v2019_v8 = vld [vmem:[%s3651_s1 + $0x1b8] sm:$0xff] }
   0x4   :  { %88 = vmatpush.msra.mxu0 %v1991_v3  ;;  %108 = vmatpush.msra.mxu1 %v1996_v4  ;;  %v2025_v9 = vld [vmem:[%s3651_s1 + $0x180] sm:$0xff]  ;;  %v2030_v10 = vld [vmem:[%s3651_s1 + $0x188] sm:$0xff]  ;;  %v2037_v11 = vld [vmem:[%s3651_s1 + $0x198] sm:$0xff] }
   0x5   :  { %148 = vmatpush.msra.mxu3 %v2001_v5  ;;  %v2043_v12 = vld [vmem:[%s3651_s1 + $0x160] sm:$0xff]  ;;  %v2048_v13 = vld [vmem:[%s3651_s1 + $0x168] sm:$0xff]  ;;  %v2055_v14 = vld [vmem:[%s3651_s1 + $0x178] sm:$0xff] }
   0x6   :  { %89 = vmatpush.msra.mxu0 %v2007_v6  ;;  %109 = vmatpush.msra.mxu1 %v2012_v7  ;;  %v2061_v15 = vld [vmem:[%s3651_s1 + $0x140] sm:$0xff]  ;;  %v2066_v16 = vld [vmem:[%s3651_s1 + $0x148] sm:$0xff]  ;;  %v2071_v17 = vld [vmem:[%s3651_s1 + $0x1f0] sm:$0xff] }
   0x7   :  { %149 = vmatpush.msra.mxu3 %v2019_v8  ;;  %v2078_v18 = vld [vmem:[%s3651_s1 + $0x158] sm:$0xff]  ;;  %v2083_v19 = vld [vmem:[%s3651_s1 + $0x1d0] sm:$0xff]  ;;  %v2089_v20 = vld [vmem:[%s3651_s1 + $0x120] sm:$0xff]  ;;  %127 = vmatpush.msra.mxu2 %v2071_v17 }
   0x8   :  { %90 = vmatpush.msra.mxu0 %v2025_v9  ;;  %110 = vmatpush.msra.mxu1 %v2030_v10  ;;  %v2094_v21 = vld [vmem:[%s3651_s1 + $0x128] sm:$0xff]  ;;  %v2102_v22 = vld [vmem:[%s3651_s1 + $0x138] sm:$0xff]  ;;  %v2107_v23 = vld [vmem:[%s3651_s1 + $0x1b0] sm:$0xff] }
   0x9   :  { %150 = vmatpush.msra.mxu3 %v2037_v11  ;;  %v2113_v24 = vld [vmem:[%s3651_s1 + $0x100] sm:$0xff]  ;;  %v2118_v25 = vld [vmem:[%s3651_s1 + $0x108] sm:$0xff]  ;;  %128 = vmatpush.msra.mxu2 %v2083_v19  ;;  %v2126_v26 = vld [vmem:[%s3651_s1 + $0x118] sm:$0xff] }
   0xa   :  { %91 = vmatpush.msra.mxu0 %v2043_v12  ;;  %111 = vmatpush.msra.mxu1 %v2048_v13  ;;  %v2131_v27 = vld [vmem:[%s3651_s1 + $0x190] sm:$0xff]  ;;  %v2137_v28 = vld [vmem:[%s3651_s1 + $0xe0] sm:$0xff]  ;;  %v2142_v29 = vld [vmem:[%s3651_s1 + $0xe8] sm:$0xff] }
   0xb   :  { %151 = vmatpush.msra.mxu3 %v2055_v14  ;;  %129 = vmatpush.msra.mxu2 %v2107_v23  ;;  %v2150_v30 = vld [vmem:[%s3651_s1 + $0xf8] sm:$0xff]  ;;  %v2155_v31 = vld [vmem:[%s3651_s1 + $0x170] sm:$0xff]  ;;  %v2161_v32 = vld [vmem:[%s3651_s1 + $0xc0] sm:$0xff] }
   0xc   :  { %92 = vmatpush.msra.mxu0 %v2061_v15  ;;  %112 = vmatpush.msra.mxu1 %v2066_v16  ;;  %v2166_v33 = vld [vmem:[%s3651_s1 + $0xc8] sm:$0xff]  ;;  %v2174_v34 = vld [vmem:[%s3651_s1 + $0xd8] sm:$0xff]  ;;  %v2179_v35 = vld [vmem:[%s3651_s1 + $0x150] sm:$0xff] }
   0xd   :  { %152 = vmatpush.msra.mxu3 %v2078_v18  ;;  %130 = vmatpush.msra.mxu2 %v2131_v27  ;;  %v2185_v36 = vld [vmem:[%s3651_s1 + $0xa0] sm:$0xff]  ;;  %v2190_v37 = vld [vmem:[%s3651_s1 + $0xa8] sm:$0xff]  ;;  %v2198_v38 = vld [vmem:[%s3651_s1 + $0xb8] sm:$0xff] }
   0xe   :  { %93 = vmatpush.msra.mxu0 %v2089_v20  ;;  %113 = vmatpush.msra.mxu1 %v2094_v21  ;;  %v2203_v39 = vld [vmem:[%s3651_s1 + $0x130] sm:$0xff]  ;;  %v2209_v40 = vld [vmem:[%s3651_s1 + $0x80] sm:$0xff]  ;;  %v2214_v41 = vld [vmem:[%s3651_s1 + $0x88] sm:$0xff] }
   0xf   :  { %153 = vmatpush.msra.mxu3 %v2102_v22  ;;  %131 = vmatpush.msra.mxu2 %v2155_v31  ;;  %v2222_v42 = vld [vmem:[%s3651_s1 + $0x98] sm:$0xff]  ;;  %v2227_v43 = vld [vmem:[%s3651_s1 + $0x110] sm:$0xff]  ;;  %v2233_v44 = vld [vmem:[%s3651_s1 + $0x60] sm:$0xff] }
  0x10   :  { %94 = vmatpush.msra.mxu0 %v2113_v24  ;;  %114 = vmatpush.msra.mxu1 %v2118_v25  ;;  %v2238_v45 = vld [vmem:[%s3651_s1 + $0x68] sm:$0xff]  ;;  %v2246_v46 = vld [vmem:[%s3651_s1 + $0x78] sm:$0xff]  ;;  %v2251_v47 = vld [vmem:[%s3651_s1 + $0xf0] sm:$0xff] }
  0x11   :  { %154 = vmatpush.msra.mxu3 %v2126_v26  ;;  %132 = vmatpush.msra.mxu2 %v2179_v35  ;;  %v2257_v48 = vld [vmem:[%s3651_s1 + $0x40] sm:$0xff]  ;;  %v2262_v49 = vld [vmem:[%s3651_s1 + $0x48] sm:$0xff]  ;;  %v2270_v50 = vld [vmem:[%s3651_s1 + $0x58] sm:$0xff] }
  0x12   :  { %95 = vmatpush.msra.mxu0 %v2137_v28  ;;  %115 = vmatpush.msra.mxu1 %v2142_v29  ;;  %v2275_v51 = vld [vmem:[%s3651_s1 + $0xd0] sm:$0xff]  ;;  %v2281_v52 = vld [vmem:[%s3651_s1 + $0x20] sm:$0xff]  ;;  %v2286_v53 = vld [vmem:[%s3651_s1 + $0x28] sm:$0xff] }
  0x13   :  { %155 = vmatpush.msra.mxu3 %v2150_v30  ;;  %133 = vmatpush.msra.mxu2 %v2203_v39  ;;  %v2294_v54 = vld [vmem:[%s3651_s1 + $0x38] sm:$0xff]  ;;  %v2299_v55 = vld [vmem:[%s3651_s1 + $0xb0] sm:$0xff]  ;;  %v2305_v56 = vld [vmem:[%s3651_s1] sm:$0xff] }
  0x14   :  { %96 = vmatpush.msra.mxu0 %v2161_v32  ;;  %116 = vmatpush.msra.mxu1 %v2166_v33  ;;  %v2310_v57 = vld [vmem:[%s3651_s1 + $0x8] sm:$0xff]  ;;  %v2318_v58 = vld [vmem:[%s3651_s1 + $0x18] sm:$0xff]  ;;  %v2327_v59 = vld [vmem:[%s3651_s1 + $0x90] sm:$0xff] }
  0x15   :  { %156 = vmatpush.msra.mxu3 %v2174_v34  ;;  %134 = vmatpush.msra.mxu2 %v2227_v43  ;;  %v2333_v61 = vld [vmem:[%s3651_s1 + $0x70] sm:$0xff] }
  0x16   :  { %97 = vmatpush.msra.mxu0 %v2185_v36  ;;  %117 = vmatpush.msra.mxu1 %v2190_v37  ;;  %v2340_v62 = vld [vmem:[%s3651_s1 + $0x50] sm:$0xff] }
  0x17   :  { %157 = vmatpush.msra.mxu3 %v2198_v38  ;;  %135 = vmatpush.msra.mxu2 %v2251_v47  ;;  %v2349_v63 = vld [vmem:[%s3651_s1 + $0x30] sm:$0xff] }
  0x18   :  { %98 = vmatpush.msra.mxu0 %v2209_v40  ;;  %118 = vmatpush.msra.mxu1 %v2214_v41 }
  0x19   :  { %158 = vmatpush.msra.mxu3 %v2222_v42  ;;  %136 = vmatpush.msra.mxu2 %v2275_v51 }
  0x1a   :  { %99 = vmatpush.msra.mxu0 %v2233_v44  ;;  %119 = vmatpush.msra.mxu1 %v2238_v45 }
  0x1b   :  { %159 = vmatpush.msra.mxu3 %v2246_v46  ;;  %137 = vmatpush.msra.mxu2 %v2299_v55 }
  0x1c   :  { %100 = vmatpush.msra.mxu0 %v2257_v48  ;;  %120 = vmatpush.msra.mxu1 %v2262_v49 }
  0x1d   :  { %160 = vmatpush.msra.mxu3 %v2270_v50  ;;  %138 = vmatpush.msra.mxu2 %v2327_v59 }
  0x1e   :  { %101 = vmatpush.msra.mxu0 %v2281_v52  ;;  %121 = vmatpush.msra.mxu1 %v2286_v53 }
  0x1f   :  { %161 = vmatpush.msra.mxu3 %v2294_v54  ;;  %139 = vmatpush.msra.mxu2 %v2333_v61 }
  0x20   :  { %102 = vmatpush.msra.mxu0 %v2305_v56  ;;  %122 = vmatpush.msra.mxu1 %v2310_v57 }
  0x21   :  { %162 = vmatpush.msra.mxu3 %v2318_v58  ;;  %103 = vmatmul.f32.vlgmr.msra.gmra.mxu0 %v1955_v60 }
  0x22   :  { %123 = vmatmul.f32.vlgmr.msra.gmra.mxu1 %v1955_v60  ;;  %163 = vmatmul.f32.vlgmr.msra.gmra.mxu3 %v1955_v60 }
  0x23   :  { %304 = vmatpush.msrb.mxu0 %v1974_v0  ;;  %324 = vmatpush.msrb.mxu1 %v1979_v1 }
  0x24   :  { %364 = vmatpush.msrb.mxu3 %v1984_v2  ;;  %140 = vmatpush.msra.mxu2 %v2340_v62  ;;  %v2358_v2 = vld [vmem:[%s3651_s1 + $0x10] sm:$0xff] }
  0x25   :  { %305 = vmatpush.msrb.mxu0 %v1991_v3  ;;  %325 = vmatpush.msrb.mxu1 %v1996_v4 }
  0x26   :  { %365 = vmatpush.msrb.mxu3 %v2001_v5  ;;  %141 = vmatpush.msra.mxu2 %v2349_v63 }
  0x27   :  { %306 = vmatpush.msrb.mxu0 %v2007_v6  ;;  %326 = vmatpush.msrb.mxu1 %v2012_v7 }
  0x28   :  { %366 = vmatpush.msrb.mxu3 %v2019_v8  ;;  %142 = vmatpush.msra.mxu2 %v2358_v2 }
  0x29   :  { %307 = vmatpush.msrb.mxu0 %v2025_v9  ;;  %327 = vmatpush.msrb.mxu1 %v2030_v10 }
  0x2a   :  { %367 = vmatpush.msrb.mxu3 %v2037_v11  ;;  %143 = vmatmul.f32.vlgmr.msra.gmra.mxu2 %v1955_v60  ;;  %v3688_v60 = vld [vmem:[#allocation4_spill] sm:$0xff] }
  0x2b   :  { %308 = vmatpush.msrb.mxu0 %v2043_v12  ;;  %328 = vmatpush.msrb.mxu1 %v2048_v13 }
  0x2c   :  { %344 = vmatpush.msrb.mxu2 %v2071_v17  ;;  %368 = vmatpush.msrb.mxu3 %v2055_v14 }
  0x2d   :  { %309 = vmatpush.msrb.mxu0 %v2061_v15  ;;  %329 = vmatpush.msrb.mxu1 %v2066_v16 }
  0x2e   :  { %345 = vmatpush.msrb.mxu2 %v2083_v19  ;;  %369 = vmatpush.msrb.mxu3 %v2078_v18 }
  0x2f   :  { %310 = vmatpush.msrb.mxu0 %v2089_v20  ;;  %330 = vmatpush.msrb.mxu1 %v2094_v21 }
  0x30   :  { %346 = vmatpush.msrb.mxu2 %v2107_v23  ;;  %370 = vmatpush.msrb.mxu3 %v2102_v22 }
  0x31   :  { %311 = vmatpush.msrb.mxu0 %v2113_v24  ;;  %331 = vmatpush.msrb.mxu1 %v2118_v25 }
  0x32   :  { %347 = vmatpush.msrb.mxu2 %v2131_v27  ;;  %371 = vmatpush.msrb.mxu3 %v2126_v26 }
  0x33   :  { %312 = vmatpush.msrb.mxu0 %v2137_v28  ;;  %332 = vmatpush.msrb.mxu1 %v2142_v29 }
  0x34   :  { %348 = vmatpush.msrb.mxu2 %v2155_v31  ;;  %372 = vmatpush.msrb.mxu3 %v2150_v30 }
  0x35   :  { %313 = vmatpush.msrb.mxu0 %v2161_v32  ;;  %333 = vmatpush.msrb.mxu1 %v2166_v33 }
  0x36   :  { %349 = vmatpush.msrb.mxu2 %v2179_v35  ;;  %373 = vmatpush.msrb.mxu3 %v2174_v34 }
  0x37   :  { %314 = vmatpush.msrb.mxu0 %v2185_v36  ;;  %334 = vmatpush.msrb.mxu1 %v2190_v37 }
  0x38   :  { %350 = vmatpush.msrb.mxu2 %v2203_v39  ;;  %374 = vmatpush.msrb.mxu3 %v2198_v38 }
  0x39   :  { %315 = vmatpush.msrb.mxu0 %v2209_v40  ;;  %335 = vmatpush.msrb.mxu1 %v2214_v41 }
  0x3a   :  { %351 = vmatpush.msrb.mxu2 %v2227_v43  ;;  %375 = vmatpush.msrb.mxu3 %v2222_v42 }
  0x3b   :  { %316 = vmatpush.msrb.mxu0 %v2233_v44  ;;  %336 = vmatpush.msrb.mxu1 %v2238_v45 }
  0x3c   :  { %352 = vmatpush.msrb.mxu2 %v2251_v47  ;;  %376 = vmatpush.msrb.mxu3 %v2246_v46 }
  0x3d   :  { %317 = vmatpush.msrb.mxu0 %v2257_v48  ;;  %337 = vmatpush.msrb.mxu1 %v2262_v49 }
  0x3e   :  { %353 = vmatpush.msrb.mxu2 %v2275_v51  ;;  %377 = vmatpush.msrb.mxu3 %v2270_v50 }
  0x3f   :  { %318 = vmatpush.msrb.mxu0 %v2281_v52  ;;  %338 = vmatpush.msrb.mxu1 %v2286_v53 }
  0x40   :  { %354 = vmatpush.msrb.mxu2 %v2299_v55  ;;  %378 = vmatpush.msrb.mxu3 %v2294_v54 }
  0x41   :  { %319 = vmatpush.msrb.mxu0 %v2305_v56  ;;  %339 = vmatpush.msrb.mxu1 %v2310_v57 }
  0x42   :  { %355 = vmatpush.msrb.mxu2 %v2327_v59  ;;  %379 = vmatpush.msrb.mxu3 %v2318_v58 }
  0x43   :  { %522 = vmatpush.msra.mxu0 %v1974_v0  ;;  %542 = vmatpush.msra.mxu1 %v1979_v1  ;;  %v19_v0 = vld [vmem:[%s3652_s0] sm:$0xff]  ;;  %v20_v1 = vld [vmem:[%s3652_s0 + $0x8] sm:$0xff] }
  0x44   :  { %356 = vmatpush.msrb.mxu2 %v2333_v61  ;;  %582 = vmatpush.msra.mxu3 %v3688_v60 }
  0x45   :  { %523 = vmatpush.msra.mxu0 %v1991_v3  ;;  %543 = vmatpush.msra.mxu1 %v1996_v4 }
  0x46   :  { %357 = vmatpush.msrb.mxu2 %v2340_v62  ;;  %583 = vmatpush.msra.mxu3 %v2001_v5 }
  0x47   :  { %524 = vmatpush.msra.mxu0 %v2007_v6  ;;  %544 = vmatpush.msra.mxu1 %v2012_v7 }
  0x48   :  { %358 = vmatpush.msrb.mxu2 %v2349_v63  ;;  %584 = vmatpush.msra.mxu3 %v2019_v8 }
  0x49   :  { %525 = vmatpush.msra.mxu0 %v2025_v9  ;;  %545 = vmatpush.msra.mxu1 %v2030_v10  ;;  %v22_v9 = vld [vmem:[%s3652_s0 + $0x18] sm:$0xff] }
  0x4a   :  { %359 = vmatpush.msrb.mxu2 %v2358_v2  ;;  %585 = vmatpush.msra.mxu3 %v2037_v11 }
  0x4b   :  { %526 = vmatpush.msra.mxu0 %v2043_v12  ;;  %546 = vmatpush.msra.mxu1 %v2048_v13 }
  0x4c   :  { %562 = vmatpush.msra.mxu2 %v2071_v17  ;;  %586 = vmatpush.msra.mxu3 %v2055_v14 }
  0x4d   :  { %527 = vmatpush.msra.mxu0 %v2061_v15  ;;  %547 = vmatpush.msra.mxu1 %v2066_v16  ;;  %v21_v16 = vld [vmem:[%s3652_s0 + $0x10] sm:$0xff] }
  0x4e   :  { %563 = vmatpush.msra.mxu2 %v2083_v19  ;;  %587 = vmatpush.msra.mxu3 %v2078_v18 }
  0x4f   :  { %528 = vmatpush.msra.mxu0 %v2089_v20  ;;  %548 = vmatpush.msra.mxu1 %v2094_v21 }
  0x50   :  { %564 = vmatpush.msra.mxu2 %v2107_v23  ;;  %588 = vmatpush.msra.mxu3 %v2102_v22 }
  0x51   :  { %529 = vmatpush.msra.mxu0 %v2113_v24  ;;  %549 = vmatpush.msra.mxu1 %v2118_v25 }
  0x52   :  { %565 = vmatpush.msra.mxu2 %v2131_v27  ;;  %589 = vmatpush.msra.mxu3 %v2126_v26 }
  0x53   :  { %530 = vmatpush.msra.mxu0 %v2137_v28  ;;  %550 = vmatpush.msra.mxu1 %v2142_v29 }
  0x54   :  { %566 = vmatpush.msra.mxu2 %v2155_v31  ;;  %590 = vmatpush.msra.mxu3 %v2150_v30 }
  0x55   :  { %531 = vmatpush.msra.mxu0 %v2161_v32  ;;  %551 = vmatpush.msra.mxu1 %v2166_v33 }
  0x56   :  { %567 = vmatpush.msra.mxu2 %v2179_v35  ;;  %591 = vmatpush.msra.mxu3 %v2174_v34 }
  0x57   :  { %532 = vmatpush.msra.mxu0 %v2185_v36  ;;  %552 = vmatpush.msra.mxu1 %v2190_v37 }
  0x58   :  { %568 = vmatpush.msra.mxu2 %v2203_v39  ;;  %592 = vmatpush.msra.mxu3 %v2198_v38 }
  0x59   :  { %533 = vmatpush.msra.mxu0 %v2209_v40  ;;  %553 = vmatpush.msra.mxu1 %v2214_v41 }
  0x5a   :  { %569 = vmatpush.msra.mxu2 %v2227_v43  ;;  %593 = vmatpush.msra.mxu3 %v2222_v42 }
  0x5b   :  { %534 = vmatpush.msra.mxu0 %v2233_v44  ;;  %554 = vmatpush.msra.mxu1 %v2238_v45 }
  0x5c   :  { %570 = vmatpush.msra.mxu2 %v2251_v47  ;;  %594 = vmatpush.msra.mxu3 %v2246_v46 }
  0x5d   :  { %535 = vmatpush.msra.mxu0 %v2257_v48  ;;  %555 = vmatpush.msra.mxu1 %v2262_v49 }
  0x5e   :  { %571 = vmatpush.msra.mxu2 %v2275_v51  ;;  %595 = vmatpush.msra.mxu3 %v2270_v50 }
  0x5f   :  { %536 = vmatpush.msra.mxu0 %v2281_v52  ;;  %556 = vmatpush.msra.mxu1 %v2286_v53 }
  0x60   :  { %572 = vmatpush.msra.mxu2 %v2299_v55  ;;  %596 = vmatpush.msra.mxu3 %v2294_v54 }
  0x61   :  { %537 = vmatpush.msra.mxu0 %v2305_v56  ;;  %557 = vmatpush.msra.mxu1 %v2310_v57  ;;  %v1770_v57 = vld [vmem:[%s3652_s0 + $0x20] sm:$0xff] }
  0x62   :  { %573 = vmatpush.msra.mxu2 %v2327_v59  ;;  %597 = vmatpush.msra.mxu3 %v2318_v58  ;;  %v1771_v58 = vld [vmem:[%s3652_s0 + $0x28] sm:$0xff] }
  0x64   :  { %574 = vmatpush.msra.mxu2 %v2333_v61 }
  0x66   :  { %575 = vmatpush.msra.mxu2 %v2340_v62 }
  0x68   :  { %576 = vmatpush.msra.mxu2 %v2349_v63 }
  0x6a   :  { %577 = vmatpush.msra.mxu2 %v2358_v2 }
  0x9e   :  { %v104_v3 = vpop.f32.mrf.mxu0 }
  0x9f   :  { %v167_v4 = vadd.f32 %v104_v3, %v19_v0  ;;  %v124_v5 = vpop.f32.mrf.mxu1 }
  0xa0   :  { %v168_v6 = vadd.f32 %v124_v5, %v20_v1  ;;  %v1773_v1 = vld [vmem:[%s3652_s0 + $0x38] sm:$0xff] }
  0xa1   :  { %v1767_v7 = vmul.f32 -1.442695, %v167_v4 }
  0xa2   :  { %v1768_v8 = vmul.f32 -1.442695, %v168_v6 }
  0xa3   :  { %1827 = vpow2.f32 %v1767_v7 }
  0xa4   :  { %1829 = vpow2.f32 %v1768_v8 }
  0xa5   :  { %v164_v2 = vpop.f32.mrf.mxu3 }
  0xa6   :  { %v170_v10 = vadd.f32 %v164_v2, %v22_v9  ;;  %v1772_v2 = vld [vmem:[%s3652_s0 + $0x30] sm:$0xff] }
  0xa8   :  { %v1769_v11 = vmul.f32 -1.442695, %v170_v10 }
  0xa9   :  { %v1828_v12 = vpop.eup %1827 }
  0xaa   :  { %v1830_v13 = vpop.eup %1829  ;;  %v174_v14 = vadd.f32 1.0, %v1828_v12  ;;  %1831 = vpow2.f32 %v1769_v11 }
  0xab   :  { %v193_v15 = vadd.f32 1.0, %v1830_v13 }
  0xac   :  { %1833 = vrcp.f32 %v174_v14  ;;  %v186_v27 = vand.u32 2147483648, %v174_v14  ;;  %v184_v30 = vand.u32 2147483647, %v174_v14  ;;  %vm180_vm2 = vweird.f32 %v174_v14 }
  0xad   :  { %1835 = vrcp.f32 %v193_v15  ;;  %v144_v17 = vpop.f32.mrf.mxu2  ;;  %v205_v28 = vand.u32 2147483648, %v193_v15  ;;  %v203_v32 = vand.u32 2147483647, %v193_v15  ;;  %vm199_vm3 = vweird.f32 %v193_v15 }
  0xae   :  { %v169_v19 = vadd.f32 %v144_v17, %v21_v16  ;;  %v187_v37 = vor.u32 1.1754944e-38, %v186_v27  ;;  %vm185_vm5 = vcmp.eq.f32.partialorder %v184_v30, 8.507059e+37 }
  0xaf   :  { %v206_v39 = vor.u32 1.1754944e-38, %v205_v28  ;;  %vm204_vm7 = vcmp.eq.f32.partialorder %v203_v32, 8.507059e+37 }
  0xb0   :  { %v1832_v18 = vpop.eup %1831 }
  0xb1   :  { %v213_v20 = vadd.f32 1.0, %v1832_v18 }
  0xb2   :  { %v1834_v21 = vpop.eup %1833 }
  0xb3   :  { %v1836_v22 = vpop.eup %1835  ;;  %v176_v23 = vmul.f32 %v1834_v21, %v174_v14  ;;  %1837 = vrcp.f32 %v213_v20  ;;  %vm181_vm0 = vweird.f32 %v1834_v21  ;;  %v225_v50 = vand.u32 2147483648, %v213_v20 }
  0xb4   :  { %v195_v24 = vmul.f32 %v1836_v22, %v193_v15  ;;  %1839 = vtanh.f32 %v169_v19  ;;  %vm200_vm1 = vweird.f32 %v1836_v22  ;;  %vm182_vm4 = vmor %vm180_vm2, %vm181_vm0  ;;  %vm219_vm9 = vweird.f32 %v213_v20 }
  0xb5   :  { %v177_v25 = vsub.f32 1.0, %v176_v23  ;;  %vm201_vm6 = vmor %vm199_vm3, %vm200_vm1  ;;  %v223_v51 = vand.u32 2147483647, %v213_v20  ;;  %v226_v53 = vor.u32 1.1754944e-38, %v225_v50 }
  0xb6   :  { %v196_v26 = vsub.f32 1.0, %v195_v24 }
  0xb7   :  { %v178_v29 = vmul.f32 %v1834_v21, %v177_v25  ;;  %vm224_vm11 = vcmp.eq.f32.partialorder %v223_v51, 8.507059e+37  ;;  %v2528_v51 = vld [vmem:[%s3651_s1 + $0x1e8] sm:$0xff] }
  0xb8   :  { %v197_v31 = vmul.f32 %v1836_v22, %v196_v26 }
  0xb9   :  { %v1838_v33 = vpop.eup %1837  ;;  %v179_v34 = vadd.f32 %v1834_v21, %v178_v29 }
  0xba   :  { %v1840_v35 = vpop.eup %1839  ;;  %v215_v36 = vmul.f32 %v1838_v33, %v213_v20  ;;  %v198_v38 = vadd.f32 %v1836_v22, %v197_v31  ;;  %vm220_vm8 = vweird.f32 %v1838_v33 }
  0xbb   :  { %v183_v40 = vsel %vm182_vm4, %v1834_v21, %v179_v34  ;;  %vm221_vm10 = vmor %vm219_vm9, %vm220_vm8 }
  0xbc   :  { %v216_v41 = vsub.f32 1.0, %v215_v36  ;;  %v188_v42 = vsel %vm185_vm5, %v187_v37, %v183_v40  ;;  %v202_v43 = vsel %vm201_vm6, %v1836_v22, %v198_v38 }
  0xbd   :  { %v207_v44 = vsel %vm204_vm7, %v206_v39, %v202_v43  ;;  %v230_v45 = vmul.f32 %v1840_v35, %v188_v42 }
  0xbe   :  { %v217_v46 = vmul.f32 %v1838_v33, %v216_v41  ;;  %v229_v47 = vmul.f32 0.0, %v207_v44 }
  0xc0   :  { %v2495_v48 = vadd.f32 %v230_v45, %v229_v47  ;;  %v218_v49 = vadd.f32 %v1838_v33, %v217_v46 }
  0xc2   :  { %1841 = vtanh.f32 %v2495_v48  ;;  %v222_v52 = vsel %vm221_vm10, %v1838_v33, %v218_v49 }
  0xc3   :  { %v227_v55 = vsel %vm224_vm11, %v226_v53, %v222_v52  ;;  %v2533_v52 = vld [vmem:[%s3651_s1 + $0x1f0] sm:$0xff]  ;;  %v2540_v53 = vld [vmem:[%s3651_s1 + $0x1f8] sm:$0xff] }
  0xc4   :  { %3690 = vst [vmem:[#allocation5_spill] sm:$0xff] %v2533_v52 }
  0xc5   :  { %3691 = vst [vmem:[#allocation6_spill] sm:$0xff] %v2540_v53 }
  0xc8   :  { %v1842_v54 = vpop.eup %1841 }
  0xc9   :  { %v233_v56 = vmul.f32 %v1842_v54, %v227_v55  ;;  %v2547_v54 = vld [vmem:[%s3651_s1 + $0x1c0] sm:$0xff]  ;;  %v2552_v55 = vld [vmem:[%s3651_s1 + $0x1c8] sm:$0xff] }
  0xca   :  { %3692 = vst [vmem:[#allocation7_spill] sm:$0xff] %v2547_v54 }
  0xcb   :  { %234 = vst [vmem:[%s3653_s2] sm:$0xff] %v233_v56  ;;  %320 = vmatmul.f32.vlgmr.msrb.gmra.mxu0 %v233_v56  ;;  %340 = vmatmul.f32.vlgmr.msrb.gmra.mxu1 %v233_v56 }
  0xcc   :  { %360 = vmatmul.f32.vlgmr.msrb.gmra.mxu2 %v233_v56  ;;  %380 = vmatmul.f32.vlgmr.msrb.gmra.mxu3 %v233_v56  ;;  %3693 = vst [vmem:[#allocation8_spill] sm:$0xff] %v2552_v55  ;;  %v2557_v56 = vld [vmem:[%s3651_s1 + $0x1d0] sm:$0xff] }
  0xcd   :  { %760 = vmatpush.msrb.mxu1 %v2528_v51  ;;  %780 = vmatpush.msrb.mxu2 %v2533_v52 }
  0xce   :  { %800 = vmatpush.msrb.mxu3 %v2540_v53 }
  0xcf   :  { %761 = vmatpush.msrb.mxu1 %v2552_v55  ;;  %781 = vmatpush.msrb.mxu2 %v2557_v56 }
 0x148   :  { %v321_v59 = vpop.f32.mrf.mxu0  ;;  %v341_v61 = vpop.f32.mrf.mxu1 }
 0x149   :  { %v384_v62 = vadd.f32 %v1770_v57, %v321_v59  ;;  %v385_v63 = vadd.f32 %v1771_v58, %v341_v61  ;;  %v2564_v57 = vld [vmem:[%s3651_s1 + $0x1d8] sm:$0xff]  ;;  %v2571_v58 = vld [vmem:[%s3651_s1 + $0x1a0] sm:$0xff]  ;;  %v2576_v59 = vld [vmem:[%s3651_s1 + $0x1a8] sm:$0xff] }
 0x14a   :  { %801 = vmatpush.msrb.mxu3 %v2564_v57  ;;  %v2581_v61 = vld [vmem:[%s3651_s1 + $0x1b0] sm:$0xff]  ;;  %762 = vmatpush.msrb.mxu1 %v2576_v59 }
 0x14b   :  { %v1774_v60 = vmul.f32 -1.442695, %v384_v62  ;;  %v1775_v0 = vmul.f32 -1.442695, %v385_v63  ;;  %v2588_v62 = vld [vmem:[%s3651_s1 + $0x1b8] sm:$0xff]  ;;  %782 = vmatpush.msrb.mxu2 %v2581_v61  ;;  %v2595_v63 = vld [vmem:[%s3651_s1 + $0x180] sm:$0xff] }
 0x14c   :  { %3694 = vst [vmem:[#allocation9_spill] sm:$0xff] %v2588_v62  ;;  %802 = vmatpush.msrb.mxu3 %v2588_v62 }
 0x14d   :  { %1843 = vpow2.f32 %v1774_v60  ;;  %3695 = vst [vmem:[#allocation10_spill] sm:$0xff] %v2595_v63  ;;  %v2600_v60 = vld [vmem:[%s3651_s1 + $0x188] sm:$0xff] }
 0x14e   :  { %1845 = vpow2.f32 %v1775_v0  ;;  %3696 = vst [vmem:[#allocation11_spill] sm:$0xff] %v2600_v60  ;;  %v2605_v0 = vld [vmem:[%s3651_s1 + $0x190] sm:$0xff]  ;;  %763 = vmatpush.msrb.mxu1 %v2600_v60 }
 0x14f   :  { %v381_v3 = vpop.f32.mrf.mxu3  ;;  %v361_v10 = vpop.f32.mrf.mxu2  ;;  %3697 = vst [vmem:[#allocation12_spill] sm:$0xff] %v2605_v0  ;;  %783 = vmatpush.msrb.mxu2 %v2605_v0 }
 0x150   :  { %v387_v4 = vadd.f32 %v1773_v1, %v381_v3  ;;  %v386_v14 = vadd.f32 %v1772_v2, %v361_v10  ;;  %v2612_v1 = vld [vmem:[%s3651_s1 + $0x198] sm:$0xff]  ;;  %v2619_v3 = vld [vmem:[%s3651_s1 + $0x160] sm:$0xff] }
 0x151   :  { %803 = vmatpush.msrb.mxu3 %v2612_v1  ;;  %v2660_v2 = vld [vmem:[%s3651_s1 + $0x158] sm:$0xff]  ;;  %v2667_v10 = vld [vmem:[%s3651_s1 + $0x120] sm:$0xff] }
 0x152   :  { %v1776_v5 = vmul.f32 -1.442695, %v387_v4  ;;  %v2624_v4 = vld [vmem:[%s3651_s1 + $0x168] sm:$0xff] }
 0x153   :  { %v1844_v6 = vpop.eup %1843  ;;  %764 = vmatpush.msrb.mxu1 %v2624_v4 }
 0x154   :  { %v1846_v7 = vpop.eup %1845  ;;  %v391_v8 = vadd.f32 1.0, %v1844_v6  ;;  %1847 = vpow2.f32 %v1776_v5  ;;  %v2629_v5 = vld [vmem:[%s3651_s1 + $0x170] sm:$0xff]  ;;  %v2636_v6 = vld [vmem:[%s3651_s1 + $0x178] sm:$0xff] }
 0x155   :  { %v410_v9 = vadd.f32 1.0, %v1846_v7  ;;  %3698 = vst [vmem:[#allocation13_spill] sm:$0xff] %v2636_v6  ;;  %784 = vmatpush.msrb.mxu2 %v2629_v5  ;;  %804 = vmatpush.msrb.mxu3 %v2636_v6  ;;  %v2643_v7 = vld [vmem:[%s3651_s1 + $0x140] sm:$0xff] }
 0x156   :  { %1849 = vrcp.f32 %v391_v8  ;;  %v403_v20 = vand.u32 2147483648, %v391_v8  ;;  %v401_v23 = vand.u32 2147483647, %v391_v8  ;;  %vm397_vm14 = vweird.f32 %v391_v8 }
 0x157   :  { %1851 = vrcp.f32 %v410_v9  ;;  %v422_v21 = vand.u32 2147483648, %v410_v9  ;;  %v420_v25 = vand.u32 2147483647, %v410_v9  ;;  %vm416_vm15 = vweird.f32 %v410_v9  ;;  %805 = vmatpush.msrb.mxu3 %v2660_v2 }
 0x158   :  { %v404_v28 = vor.u32 1.1754944e-38, %v403_v20  ;;  %vm402_vm2 = vcmp.eq.f32.partialorder %v401_v23, 8.507059e+37  ;;  %v2721_v20 = vld [vmem:[%s3651_s1 + $0xe0] sm:$0xff]  ;;  %v2738_v23 = vld [vmem:[%s3651_s1 + $0xf8] sm:$0xff] }
 0x159   :  { %v423_v31 = vor.u32 1.1754944e-38, %v422_v21  ;;  %vm421_vm3 = vcmp.eq.f32.partialorder %v420_v25, 8.507059e+37  ;;  %v2726_v21 = vld [vmem:[%s3651_s1 + $0xe8] sm:$0xff] }
 0x15a   :  { %v1848_v11 = vpop.eup %1847 }
 0x15b   :  { %v430_v12 = vadd.f32 1.0, %v1848_v11  ;;  %v2672_v11 = vld [vmem:[%s3651_s1 + $0x128] sm:$0xff] }
 0x15c   :  { %v1850_v13 = vpop.eup %1849  ;;  %3700 = vst [vmem:[#allocation15_spill] sm:$0xff] %v2672_v11 }
 0x15d   :  { %v1852_v15 = vpop.eup %1851  ;;  %v393_v16 = vmul.f32 %v1850_v13, %v391_v8  ;;  %1853 = vrcp.f32 %v430_v12  ;;  %vm398_vm12 = vweird.f32 %v1850_v13  ;;  %v442_v43 = vand.u32 2147483648, %v430_v12  ;;  %v2648_v8 = vld [vmem:[%s3651_s1 + $0x148] sm:$0xff] }
 0x15e   :  { %v412_v17 = vmul.f32 %v1852_v15, %v410_v9  ;;  %1855 = vtanh.f32 %v386_v14  ;;  %vm417_vm13 = vweird.f32 %v1852_v15  ;;  %vm399_vm0 = vmor %vm397_vm14, %vm398_vm12  ;;  %vm436_vm5 = vweird.f32 %v430_v12  ;;  %v2653_v9 = vld [vmem:[%s3651_s1 + $0x150] sm:$0xff]  ;;  %765 = vmatpush.msrb.mxu1 %v2648_v8  ;;  %v2691_v14 = vld [vmem:[%s3651_s1 + $0x100] sm:$0xff] }
 0x15f   :  { %v394_v18 = vsub.f32 1.0, %v393_v16  ;;  %vm418_vm1 = vmor %vm416_vm15, %vm417_vm13  ;;  %v440_v44 = vand.u32 2147483647, %v430_v12  ;;  %v443_v46 = vor.u32 1.1754944e-38, %v442_v43  ;;  %3699 = vst [vmem:[#allocation14_spill] sm:$0xff] %v2653_v9  ;;  %785 = vmatpush.msrb.mxu2 %v2653_v9  ;;  %v2701_v16 = vld [vmem:[%s3651_s1 + $0x110] sm:$0xff] }
 0x160   :  { %v413_v19 = vsub.f32 1.0, %v412_v17  ;;  %766 = vmatpush.msrb.mxu1 %v2672_v11  ;;  %v1778_v17 = vld [vmem:[%s3652_s0 + $0x40] sm:$0xff]  ;;  %v2813_v43 = vld [vmem:[%s3651_s1 + $0x98] sm:$0xff] }
 0x161   :  { %v395_v22 = vmul.f32 %v1850_v13, %v394_v18  ;;  %vm441_vm7 = vcmp.eq.f32.partialorder %v440_v44, 8.507059e+37  ;;  %v1779_v18 = vld [vmem:[%s3652_s0 + $0x48] sm:$0xff]  ;;  %v2818_v44 = vld [vmem:[%s3651_s1 + $0x60] sm:$0xff] }
 0x162   :  { %v414_v24 = vmul.f32 %v1852_v15, %v413_v19  ;;  %v2714_v19 = vld [vmem:[%s3651_s1 + $0x118] sm:$0xff] }
 0x163   :  { %v1854_v26 = vpop.eup %1853  ;;  %v396_v27 = vadd.f32 %v1850_v13, %v395_v22  ;;  %v2731_v22 = vld [vmem:[%s3651_s1 + $0xf0] sm:$0xff] }
 0x164   :  { %v415_v29 = vadd.f32 %v1852_v15, %v414_v24  ;;  %v432_v30 = vmul.f32 %v1854_v26, %v430_v12  ;;  %v1856_v33 = vpop.eup %1855  ;;  %vm437_vm4 = vweird.f32 %v1854_v26  ;;  %v2677_v12 = vld [vmem:[%s3651_s1 + $0x130] sm:$0xff] }
 0x165   :  { %v400_v32 = vsel %vm399_vm0, %v1850_v13, %v396_v27  ;;  %vm438_vm6 = vmor %vm436_vm5, %vm437_vm4  ;;  %3701 = vst [vmem:[#allocation16_spill] sm:$0xff] %v2677_v12  ;;  %v2684_v13 = vld [vmem:[%s3651_s1 + $0x138] sm:$0xff]  ;;  %786 = vmatpush.msrb.mxu2 %v2677_v12  ;;  %v2750_v27 = vld [vmem:[%s3651_s1 + $0xc8] sm:$0xff] }
 0x166   :  { %v405_v34 = vsel %vm402_vm2, %v404_v28, %v400_v32  ;;  %v419_v35 = vsel %vm418_vm1, %v1852_v15, %v415_v29  ;;  %v433_v36 = vsub.f32 1.0, %v432_v30  ;;  %3702 = vst [vmem:[#allocation17_spill] sm:$0xff] %v2684_v13  ;;  %806 = vmatpush.msrb.mxu3 %v2684_v13  ;;  %v2696_v15 = vld [vmem:[%s3651_s1 + $0x108] sm:$0xff]  ;;  %v2755_v28 = vld [vmem:[%s3651_s1 + $0xd0] sm:$0xff]  ;;  %v2769_v32 = vld [vmem:[%s3651_s1 + $0xa0] sm:$0xff] }
 0x167   :  { %v424_v37 = vsel %vm421_vm3, %v423_v31, %v419_v35  ;;  %v447_v38 = vmul.f32 %v1856_v33, %v405_v34  ;;  %767 = vmatpush.msrb.mxu1 %v2696_v15  ;;  %787 = vmatpush.msrb.mxu2 %v2701_v16  ;;  %v2762_v31 = vld [vmem:[%s3651_s1 + $0xd8] sm:$0xff]  ;;  %v2774_v33 = vld [vmem:[%s3651_s1 + $0xa8] sm:$0xff]  ;;  %v2779_v34 = vld [vmem:[%s3651_s1 + $0xb0] sm:$0xff] }
 0x168   :  { %v446_v39 = vmul.f32 %v424_v37, %v2495_v48  ;;  %v434_v40 = vmul.f32 %v1854_v26, %v433_v36  ;;  %v2523_v48 = vld [vmem:[%s3651_s1 + $0x1e0] sm:$0xff]  ;;  %807 = vmatpush.msrb.mxu3 %v2714_v19  ;;  %v1781_v37 = vld [vmem:[%s3652_s0 + $0x58] sm:$0xff] }
 0x169   :  { %3689 = vst [vmem:[#allocation4_spill] sm:$0xff] %v2523_v48  ;;  %740 = vmatpush.msrb.mxu0 %v2523_v48  ;;  %768 = vmatpush.msrb.mxu1 %v2726_v21 }
 0x16a   :  { %v2514_v41 = vadd.f32 %v447_v38, %v446_v39  ;;  %v435_v42 = vadd.f32 %v1854_v26, %v434_v40  ;;  %788 = vmatpush.msrb.mxu2 %v2731_v22  ;;  %808 = vmatpush.msrb.mxu3 %v2738_v23  ;;  %v2789_v38 = vld [vmem:[%s3651_s1 + $0xb8] sm:$0xff]  ;;  %v2796_v39 = vld [vmem:[%s3651_s1 + $0x80] sm:$0xff]  ;;  %v2801_v40 = vld [vmem:[%s3651_s1 + $0x88] sm:$0xff] }
 0x16b   :  { %741 = vmatpush.msrb.mxu0 %v2547_v54  ;;  %769 = vmatpush.msrb.mxu1 %v2750_v27 }
 0x16c   :  { %1857 = vtanh.f32 %v2514_v41  ;;  %v439_v45 = vsel %vm438_vm6, %v1854_v26, %v435_v42  ;;  %v2745_v26 = vld [vmem:[%s3651_s1 + $0xc0] sm:$0xff]  ;;  %789 = vmatpush.msrb.mxu2 %v2755_v28  ;;  %809 = vmatpush.msrb.mxu3 %v2762_v31  ;;  %v2806_v42 = vld [vmem:[%s3651_s1 + $0x90] sm:$0xff] }
 0x16d   :  { %v444_v49 = vsel %vm441_vm7, %v443_v46, %v439_v45  ;;  %742 = vmatpush.msrb.mxu0 %v2571_v58  ;;  %770 = vmatpush.msrb.mxu1 %v2774_v33  ;;  %v2823_v45 = vld [vmem:[%s3651_s1 + $0x68] sm:$0xff]  ;;  %v2830_v46 = vld [vmem:[%s3651_s1 + $0x70] sm:$0xff] }
 0x16e   :  { %790 = vmatpush.msrb.mxu2 %v2779_v34  ;;  %810 = vmatpush.msrb.mxu3 %v2789_v38 }
 0x16f   :  { %743 = vmatpush.msrb.mxu0 %v2595_v63  ;;  %771 = vmatpush.msrb.mxu1 %v2801_v40 }
 0x170   :  { %791 = vmatpush.msrb.mxu2 %v2806_v42  ;;  %811 = vmatpush.msrb.mxu3 %v2813_v43 }
 0x171   :  { %744 = vmatpush.msrb.mxu0 %v2619_v3  ;;  %772 = vmatpush.msrb.mxu1 %v2823_v45 }
 0x172   :  { %v1858_v47 = vpop.eup %1857  ;;  %792 = vmatpush.msrb.mxu2 %v2830_v46 }
 0x173   :  { %v450_v50 = vmul.f32 %v1858_v47, %v444_v49  ;;  %745 = vmatpush.msrb.mxu0 %v2643_v7  ;;  %v2835_v47 = vld [vmem:[%s3651_s1 + $0x78] sm:$0xff]  ;;  %v2840_v49 = vld [vmem:[%s3651_s1 + $0x40] sm:$0xff] }
 0x174   :  { %3703 = vst [vmem:[#allocation18_spill] sm:$0xff] %v2835_v47  ;;  %812 = vmatpush.msrb.mxu3 %v2835_v47 }
 0x175   :  { %1777 = vst [vmem:[%s3653_s2 + $0x8] sm:$0xff] %v450_v50  ;;  %538 = vmatmul.f32.vlgmr.msra.gmra.mxu0 %v450_v50  ;;  %558 = vmatmul.f32.vlgmr.msra.gmra.mxu1 %v450_v50 }
 0x176   :  { %578 = vmatmul.f32.vlgmr.msra.gmra.mxu2 %v450_v50  ;;  %598 = vmatmul.f32.vlgmr.msra.gmra.mxu3 %v450_v50  ;;  %3704 = vst [vmem:[#allocation19_spill] sm:$0xff] %v2840_v49 }
 0x177   :  { %746 = vmatpush.msrb.mxu0 %v2667_v10 }
 0x179   :  { %747 = vmatpush.msrb.mxu0 %v2691_v14 }
 0x17b   :  { %748 = vmatpush.msrb.mxu0 %v2721_v20 }
 0x17d   :  { %749 = vmatpush.msrb.mxu0 %v2745_v26 }
 0x17f   :  { %750 = vmatpush.msrb.mxu0 %v2769_v32 }
 0x181   :  { %751 = vmatpush.msrb.mxu0 %v2796_v39 }
 0x183   :  { %752 = vmatpush.msrb.mxu0 %v2818_v44 }
 0x185   :  { %753 = vmatpush.msrb.mxu0 %v2840_v49 }
 0x1f2   :  { %v539_v24 = vpop.f32.mrf.mxu0  ;;  %v559_v25 = vpop.f32.mrf.mxu1 }
 0x1f3   :  { %v602_v29 = vadd.f32 %v1778_v17, %v539_v24  ;;  %v603_v30 = vadd.f32 %v1779_v18, %v559_v25  ;;  %v2847_v17 = vld [vmem:[%s3651_s1 + $0x48] sm:$0xff]  ;;  %v2852_v18 = vld [vmem:[%s3651_s1 + $0x50] sm:$0xff]  ;;  %v2857_v24 = vld [vmem:[%s3651_s1 + $0x58] sm:$0xff] }
 0x1f4   :  { %3705 = vst [vmem:[#allocation20_spill] sm:$0xff] %v2847_v17  ;;  %773 = vmatpush.msrb.mxu1 %v2847_v17  ;;  %793 = vmatpush.msrb.mxu2 %v2852_v18  ;;  %v2893_v17 = vld [vmem:[%s3651_s1 + $0x8] sm:$0xff] }
 0x1f5   :  { %v1782_v35 = vmul.f32 -1.442695, %v602_v29  ;;  %v1783_v36 = vmul.f32 -1.442695, %v603_v30  ;;  %3706 = vst [vmem:[#allocation21_spill] sm:$0xff] %v2852_v18  ;;  %v2864_v29 = vld [vmem:[%s3651_s1 + $0x20] sm:$0xff]  ;;  %813 = vmatpush.msrb.mxu3 %v2857_v24 }
 0x1f6   :  { %3707 = vst [vmem:[#allocation22_spill] sm:$0xff] %v2857_v24  ;;  %v2869_v30 = vld [vmem:[%s3651_s1 + $0x28] sm:$0xff]  ;;  %754 = vmatpush.msrb.mxu0 %v2864_v29  ;;  %v2905_v24 = vld [vmem:[%s3651_s1 + $0x18] sm:$0xff] }
 0x1f7   :  { %1859 = vpow2.f32 %v1782_v35  ;;  %3708 = vst [vmem:[#allocation23_spill] sm:$0xff] %v2864_v29  ;;  %v2876_v35 = vld [vmem:[%s3651_s1 + $0x30] sm:$0xff]  ;;  %774 = vmatpush.msrb.mxu1 %v2869_v30 }
 0x1f8   :  { %1861 = vpow2.f32 %v1783_v36  ;;  %v2881_v36 = vld [vmem:[%s3651_s1 + $0x38] sm:$0xff]  ;;  %794 = vmatpush.msrb.mxu2 %v2876_v35 }
 0x1f9   :  { %v599_v50 = vpop.f32.mrf.mxu3  ;;  %814 = vmatpush.msrb.mxu3 %v2881_v36  ;;  %775 = vmatpush.msrb.mxu1 %v2893_v17 }
 0x1fa   :  { %v605_v25 = vadd.f32 %v1781_v37, %v599_v50  ;;  %v2888_v50 = vld [vmem:[%s3651_s1] sm:$0xff] }
 0x1fb   :  { %755 = vmatpush.msrb.mxu0 %v2888_v50  ;;  %815 = vmatpush.msrb.mxu3 %v2905_v24 }
 0x1fc   :  { %v1784_v37 = vmul.f32 -1.442695, %v605_v25  ;;  %v2900_v25 = vld [vmem:[%s3651_s1 + $0x10] sm:$0xff]  ;;  %978 = vmatpush.msra.mxu1 %v2528_v51 }
 0x1fd   :  { %v1860_v49 = vpop.eup %1859  ;;  %795 = vmatpush.msrb.mxu2 %v2900_v25  ;;  %958 = vmatpush.msra.mxu0 %v2523_v48 }
 0x1fe   :  { %v1862_v18 = vpop.eup %1861  ;;  %v2907_v47 = vadd.f32 1.0, %v1860_v49  ;;  %1863 = vpow2.f32 %v1784_v37  ;;  %1018 = vmatpush.msra.mxu3 %v2540_v53  ;;  %v1780_v49 = vld [vmem:[%s3652_s0 + $0x50] sm:$0xff]  ;;  %979 = vmatpush.msra.mxu1 %v2552_v55 }
 0x1ff   :  { %v2911_v29 = vadd.f32 1.0, %v1862_v18  ;;  %998 = vmatpush.msra.mxu2 %v2533_v52  ;;  %v579_v18 = vpop.f32.mrf.mxu2  ;;  %959 = vmatpush.msra.mxu0 %v2547_v54 }
 0x200   :  { %1865 = vrcp.f32 %v2907_v47  ;;  %1019 = vmatpush.msra.mxu3 %v2564_v57  ;;  %980 = vmatpush.msra.mxu1 %v2576_v59  ;;  %v604_v52 = vadd.f32 %v1780_v49, %v579_v18  ;;  %vm615_vm10 = vweird.f32 %v2907_v47 }
 0x201   :  { %1867 = vrcp.f32 %v2911_v29  ;;  %999 = vmatpush.msra.mxu2 %v2557_v56  ;;  %960 = vmatpush.msra.mxu0 %v2571_v58  ;;  %vm634_vm11 = vweird.f32 %v2911_v29 }
 0x202   :  { %1020 = vmatpush.msra.mxu3 %v2588_v62  ;;  %981 = vmatpush.msra.mxu1 %v2600_v60  ;;  %v621_v62 = vand.u32 2147483648, %v2907_v47  ;;  %v640_v60 = vand.u32 2147483648, %v2911_v29 }
 0x203   :  { %1000 = vmatpush.msra.mxu2 %v2581_v61  ;;  %961 = vmatpush.msra.mxu0 %v2595_v63 }
 0x204   :  { %v1864_v37 = vpop.eup %1863  ;;  %1021 = vmatpush.msra.mxu3 %v2612_v1  ;;  %982 = vmatpush.msra.mxu1 %v2624_v4 }
 0x205   :  { %v2930_v48 = vadd.f32 1.0, %v1864_v37  ;;  %1001 = vmatpush.msra.mxu2 %v2605_v0  ;;  %962 = vmatpush.msra.mxu0 %v2619_v3  ;;  %v619_v0 = vand.u32 2147483647, %v2907_v47 }
 0x206   :  { %v1866_v53 = vpop.eup %1865  ;;  %1022 = vmatpush.msra.mxu3 %v2636_v6  ;;  %983 = vmatpush.msra.mxu1 %v2648_v8 }
 0x207   :  { %v1868_v54 = vpop.eup %1867  ;;  %v611_v55 = vmul.f32 %v1866_v53, %v2907_v47  ;;  %1869 = vrcp.f32 %v2930_v48  ;;  %1002 = vmatpush.msra.mxu2 %v2629_v5  ;;  %vm616_vm8 = vweird.f32 %v1866_v53  ;;  %963 = vmatpush.msra.mxu0 %v2643_v7  ;;  %vm620_vm14 = vcmp.eq.f32.partialorder %v619_v0, 8.507059e+37 }
 0x208   :  { %v630_v37 = vmul.f32 %v1868_v54, %v2911_v29  ;;  %1871 = vtanh.f32 %v604_v52  ;;  %vm635_vm9 = vweird.f32 %v1868_v54  ;;  %1023 = vmatpush.msra.mxu3 %v2660_v2  ;;  %984 = vmatpush.msra.mxu1 %v2672_v11  ;;  %vm617_vm12 = vmor %vm615_vm10, %vm616_vm8  ;;  %v660_v0 = vand.u32 2147483648, %v2930_v48 }
 0x209   :  { %v612_v49 = vsub.f32 1.0, %v611_v55  ;;  %1003 = vmatpush.msra.mxu2 %v2653_v9  ;;  %964 = vmatpush.msra.mxu0 %v2667_v10  ;;  %vm636_vm13 = vmor %vm634_vm11, %vm635_vm9  ;;  %vm654_vm1 = vweird.f32 %v2930_v48 }
 0x20a   :  { %v631_v18 = vsub.f32 1.0, %v630_v37  ;;  %v638_v37 = vand.u32 2147483647, %v2911_v29  ;;  %1024 = vmatpush.msra.mxu3 %v2684_v13  ;;  %985 = vmatpush.msra.mxu1 %v2696_v15 }
 0x20b   :  { %v613_v63 = vmul.f32 %v1866_v53, %v612_v49  ;;  %v622_v49 = vor.u32 1.1754944e-38, %v621_v62  ;;  %1004 = vmatpush.msra.mxu2 %v2677_v12  ;;  %965 = vmatpush.msra.mxu0 %v2691_v14 }
 0x20c   :  { %v632_v55 = vmul.f32 %v1868_v54, %v631_v18  ;;  %vm639_vm15 = vcmp.eq.f32.partialorder %v638_v37, 8.507059e+37  ;;  %1025 = vmatpush.msra.mxu3 %v2714_v19  ;;  %986 = vmatpush.msra.mxu1 %v2726_v21 }
 0x20d   :  { %v2955_v52 = vpop.eup %1869  ;;  %v614_v6 = vadd.f32 %v1866_v53, %v613_v63  ;;  %v641_v63 = vor.u32 1.1754944e-38, %v640_v60  ;;  %1005 = vmatpush.msra.mxu2 %v2701_v16  ;;  %966 = vmatpush.msra.mxu0 %v2721_v20 }
 0x20e   :  { %v633_v18 = vadd.f32 %v1868_v54, %v632_v55  ;;  %v650_v9 = vmul.f32 %v2955_v52, %v2930_v48  ;;  %v1872_v29 = vpop.eup %1871  ;;  %1026 = vmatpush.msra.mxu3 %v2738_v23  ;;  %987 = vmatpush.msra.mxu1 %v2750_v27  ;;  %vm655_vm0 = vweird.f32 %v2955_v52 }
 0x20f   :  { %v618_v47 = vsel %vm617_vm12, %v1866_v53, %v614_v6  ;;  %1006 = vmatpush.msra.mxu2 %v2731_v22  ;;  %967 = vmatpush.msra.mxu0 %v2745_v26  ;;  %v658_v6 = vand.u32 2147483647, %v2930_v48  ;;  %vm656_vm2 = vmor %vm654_vm1, %vm655_vm0  ;;  %v3710_v48 = vld [vmem:[#allocation19_spill] sm:$0xff] }
 0x210   :  { %v623_v11 = vsel %vm620_vm14, %v622_v49, %v618_v47  ;;  %v637_v62 = vsel %vm636_vm13, %v1868_v54, %v633_v18  ;;  %v651_v55 = vsub.f32 1.0, %v650_v9  ;;  %1027 = vmatpush.msra.mxu3 %v2762_v31  ;;  %988 = vmatpush.msra.mxu1 %v2774_v33  ;;  %v3712_v18 = vld [vmem:[#allocation21_spill] sm:$0xff]  ;;  %v3714_v47 = vld [vmem:[#allocation23_spill] sm:$0xff] }
 0x211   :  { %v642_v12 = vsel %vm639_vm15, %v641_v63, %v637_v62  ;;  %v665_v13 = vmul.f32 %v1872_v29, %v623_v11  ;;  %1007 = vmatpush.msra.mxu2 %v2755_v28  ;;  %968 = vmatpush.msra.mxu0 %v2769_v32  ;;  %v661_v11 = vor.u32 1.1754944e-38, %v660_v0  ;;  %vm659_vm3 = vcmp.eq.f32.partialorder %v658_v6, 8.507059e+37  ;;  %v3713_v63 = vld [vmem:[#allocation22_spill] sm:$0xff]  ;;  %v3715_v29 = vld [vmem:[#allocation4_spill] sm:$0xff]  ;;  %v3716_v62 = vld [vmem:[#allocation5_spill] sm:$0xff] }
 0x212   :  { %v664_v53 = vmul.f32 %v642_v12, %v2514_v41  ;;  %v652_v60 = vmul.f32 %v2955_v52, %v651_v55  ;;  %1028 = vmatpush.msra.mxu3 %v2789_v38  ;;  %989 = vmatpush.msra.mxu1 %v2801_v40  ;;  %v3709_v12 = vld [vmem:[#allocation18_spill] sm:$0xff]  ;;  %v3722_v0 = vld [vmem:[#allocation11_spill] sm:$0xff]  ;;  %v3723_v6 = vld [vmem:[#allocation12_spill] sm:$0xff] }
 0x213   :  { %1008 = vmatpush.msra.mxu2 %v2779_v34  ;;  %969 = vmatpush.msra.mxu0 %v2796_v39  ;;  %v3717_v55 = vld [vmem:[#allocation6_spill] sm:$0xff] }
 0x214   :  { %v2979_v54 = vadd.f32 %v665_v13, %v664_v53  ;;  %v653_v41 = vadd.f32 %v2955_v52, %v652_v60  ;;  %1029 = vmatpush.msra.mxu3 %v2813_v43  ;;  %990 = vmatpush.msra.mxu1 %v2823_v45  ;;  %v3711_v13 = vld [vmem:[#allocation20_spill] sm:$0xff]  ;;  %v3718_v53 = vld [vmem:[#allocation7_spill] sm:$0xff] }
 0x215   :  { %1009 = vmatpush.msra.mxu2 %v2806_v42  ;;  %970 = vmatpush.msra.mxu0 %v2818_v44  ;;  %v3719_v60 = vld [vmem:[#allocation8_spill] sm:$0xff] }
 0x216   :  { %1873 = vtanh.f32 %v2979_v54  ;;  %v657_v9 = vsel %vm656_vm2, %v2955_v52, %v653_v41  ;;  %1030 = vmatpush.msra.mxu3 %v3709_v12  ;;  %991 = vmatpush.msra.mxu1 %v3711_v13  ;;  %v3720_v41 = vld [vmem:[#allocation9_spill] sm:$0xff] }
 0x217   :  { %1010 = vmatpush.msra.mxu2 %v2830_v46  ;;  %971 = vmatpush.msra.mxu0 %v3710_v48  ;;  %v662_v49 = vsel %vm659_vm3, %v661_v11, %v657_v9 }
 0x218   :  { %1031 = vmatpush.msra.mxu3 %v3713_v63  ;;  %992 = vmatpush.msra.mxu1 %v2869_v30 }
 0x219   :  { %1011 = vmatpush.msra.mxu2 %v3712_v18  ;;  %972 = vmatpush.msra.mxu0 %v3714_v47 }
 0x21a   :  { %1032 = vmatpush.msra.mxu3 %v2881_v36  ;;  %993 = vmatpush.msra.mxu1 %v2893_v17 }
 0x21b   :  { %1012 = vmatpush.msra.mxu2 %v2876_v35  ;;  %973 = vmatpush.msra.mxu0 %v2888_v50 }
 0x21c   :  { %v1874_v37 = vpop.eup %1873  ;;  %1033 = vmatpush.msra.mxu3 %v2905_v24 }
 0x21d   :  { %v668_v52 = vmul.f32 %v1874_v37, %v662_v49  ;;  %1013 = vmatpush.msra.mxu2 %v2900_v25 }
 0x21f   :  { %1785 = vst [vmem:[%s3653_s2 + $0x10] sm:$0xff] %v668_v52  ;;  %756 = vmatmul.f32.vlgmr.msrb.gmra.mxu0 %v668_v52  ;;  %776 = vmatmul.f32.vlgmr.msrb.gmra.mxu1 %v668_v52 }
 0x220   :  { %796 = vmatmul.f32.vlgmr.msrb.gmra.mxu2 %v668_v52  ;;  %816 = vmatmul.f32.vlgmr.msrb.gmra.mxu3 %v668_v52 }
 0x221   :  { %1176 = vmatpush.msrb.mxu0 %v3715_v29  ;;  %1196 = vmatpush.msrb.mxu1 %v2528_v51  ;;  %v3721_v51 = vld [vmem:[#allocation10_spill] sm:$0xff] }
 0x222   :  { %1216 = vmatpush.msrb.mxu2 %v3716_v62  ;;  %1236 = vmatpush.msrb.mxu3 %v3717_v55 }
 0x223   :  { %1177 = vmatpush.msrb.mxu0 %v3718_v53  ;;  %1197 = vmatpush.msrb.mxu1 %v3719_v60 }
 0x224   :  { %1217 = vmatpush.msrb.mxu2 %v2557_v56  ;;  %1237 = vmatpush.msrb.mxu3 %v2564_v57  ;;  %v3724_v56 = vld [vmem:[#allocation13_spill] sm:$0xff]  ;;  %v3725_v57 = vld [vmem:[#allocation14_spill] sm:$0xff] }
 0x225   :  { %1178 = vmatpush.msrb.mxu0 %v2571_v58  ;;  %1198 = vmatpush.msrb.mxu1 %v2576_v59  ;;  %v3726_v58 = vld [vmem:[#allocation15_spill] sm:$0xff]  ;;  %v3727_v59 = vld [vmem:[#allocation16_spill] sm:$0xff] }
 0x226   :  { %1218 = vmatpush.msrb.mxu2 %v2581_v61  ;;  %1238 = vmatpush.msrb.mxu3 %v3720_v41  ;;  %v3728_v61 = vld [vmem:[#allocation17_spill] sm:$0xff] }
 0x227   :  { %1179 = vmatpush.msrb.mxu0 %v3721_v51  ;;  %1199 = vmatpush.msrb.mxu1 %v3722_v0 }
 0x228   :  { %1219 = vmatpush.msrb.mxu2 %v3723_v6  ;;  %1239 = vmatpush.msrb.mxu3 %v2612_v1  ;;  %v1786_v1 = vld [vmem:[%s3652_s0 + $0x60] sm:$0xff]  ;;  %v1795_v6 = vld [vmem:[%s3652_s0 + $0x88] sm:$0xff] }
 0x229   :  { %1180 = vmatpush.msrb.mxu0 %v2619_v3  ;;  %1200 = vmatpush.msrb.mxu1 %v2624_v4  ;;  %v1787_v3 = vld [vmem:[%s3652_s0 + $0x68] sm:$0xff] }
 0x22a   :  { %1220 = vmatpush.msrb.mxu2 %v2629_v5  ;;  %1240 = vmatpush.msrb.mxu3 %v3724_v56 }
 0x22b   :  { %1181 = vmatpush.msrb.mxu0 %v2643_v7  ;;  %1201 = vmatpush.msrb.mxu1 %v2648_v8 }
 0x22c   :  { %1221 = vmatpush.msrb.mxu2 %v3725_v57  ;;  %1241 = vmatpush.msrb.mxu3 %v2660_v2 }
 0x22d   :  { %1182 = vmatpush.msrb.mxu0 %v2667_v10  ;;  %1202 = vmatpush.msrb.mxu1 %v3726_v58 }
 0x22e   :  { %1222 = vmatpush.msrb.mxu2 %v3727_v59  ;;  %1242 = vmatpush.msrb.mxu3 %v3728_v61 }
 0x22f   :  { %1183 = vmatpush.msrb.mxu0 %v2691_v14  ;;  %1203 = vmatpush.msrb.mxu1 %v2696_v15  ;;  %v1789_v14 = vld [vmem:[%s3652_s0 + $0x78] sm:$0xff] }
 0x230   :  { %1223 = vmatpush.msrb.mxu2 %v2701_v16  ;;  %1243 = vmatpush.msrb.mxu3 %v2714_v19 }
 0x231   :  { %1184 = vmatpush.msrb.mxu0 %v2721_v20  ;;  %1204 = vmatpush.msrb.mxu1 %v2726_v21 }
 0x232   :  { %1224 = vmatpush.msrb.mxu2 %v2731_v22  ;;  %1244 = vmatpush.msrb.mxu3 %v2738_v23 }
 0x233   :  { %1185 = vmatpush.msrb.mxu0 %v2745_v26  ;;  %1205 = vmatpush.msrb.mxu1 %v2750_v27  ;;  %v1788_v26 = vld [vmem:[%s3652_s0 + $0x70] sm:$0xff] }
 0x234   :  { %1225 = vmatpush.msrb.mxu2 %v2755_v28  ;;  %1245 = vmatpush.msrb.mxu3 %v2762_v31 }
 0x235   :  { %1186 = vmatpush.msrb.mxu0 %v2769_v32  ;;  %1206 = vmatpush.msrb.mxu1 %v2774_v33 }
 0x236   :  { %1226 = vmatpush.msrb.mxu2 %v2779_v34  ;;  %1246 = vmatpush.msrb.mxu3 %v2789_v38 }
 0x237   :  { %1187 = vmatpush.msrb.mxu0 %v2796_v39  ;;  %1207 = vmatpush.msrb.mxu1 %v2801_v40 }
 0x238   :  { %1227 = vmatpush.msrb.mxu2 %v2806_v42  ;;  %1247 = vmatpush.msrb.mxu3 %v2813_v43 }
 0x239   :  { %1188 = vmatpush.msrb.mxu0 %v2818_v44  ;;  %1208 = vmatpush.msrb.mxu1 %v2823_v45 }
 0x23a   :  { %1228 = vmatpush.msrb.mxu2 %v2830_v46  ;;  %1248 = vmatpush.msrb.mxu3 %v3709_v12 }
 0x23b   :  { %1189 = vmatpush.msrb.mxu0 %v3710_v48  ;;  %1209 = vmatpush.msrb.mxu1 %v3711_v13 }
 0x23c   :  { %1229 = vmatpush.msrb.mxu2 %v3712_v18  ;;  %1249 = vmatpush.msrb.mxu3 %v3713_v63 }
 0x23d   :  { %1190 = vmatpush.msrb.mxu0 %v3714_v47  ;;  %1210 = vmatpush.msrb.mxu1 %v2869_v30 }
 0x23e   :  { %1230 = vmatpush.msrb.mxu2 %v2876_v35  ;;  %1250 = vmatpush.msrb.mxu3 %v2881_v36 }
 0x23f   :  { %1191 = vmatpush.msrb.mxu0 %v2888_v50  ;;  %1211 = vmatpush.msrb.mxu1 %v2893_v17 }
 0x240   :  { %1231 = vmatpush.msrb.mxu2 %v2900_v25  ;;  %1251 = vmatpush.msrb.mxu3 %v2905_v24 }
 0x29c   :  { %v757_v4 = vpop.f32.mrf.mxu0  ;;  %v777_v5 = vpop.f32.mrf.mxu1 }
 0x29d   :  { %v820_v7 = vadd.f32 %v1786_v1, %v757_v4  ;;  %v821_v8 = vadd.f32 %v1787_v3, %v777_v5  ;;  %v1797_v3 = vld [vmem:[%s3652_s0 + $0x98] sm:$0xff] }
 0x29f   :  { %v1790_v2 = vmul.f32 -1.442695, %v820_v7  ;;  %v1791_v10 = vmul.f32 -1.442695, %v821_v8 }
 0x2a1   :  { %1875 = vpow2.f32 %v1790_v2 }
 0x2a2   :  { %1877 = vpow2.f32 %v1791_v10 }
 0x2a3   :  { %v817_v15 = vpop.f32.mrf.mxu3  ;;  %v797_v27 = vpop.f32.mrf.mxu2 }
 0x2a4   :  { %v823_v16 = vadd.f32 %v1789_v14, %v817_v15  ;;  %v822_v33 = vadd.f32 %v1788_v26, %v797_v27  ;;  %v1796_v15 = vld [vmem:[%s3652_s0 + $0x90] sm:$0xff] }
 0x2a6   :  { %v1792_v19 = vmul.f32 -1.442695, %v823_v16 }
 0x2a7   :  { %v1876_v20 = vpop.eup %1875 }
 0x2a8   :  { %v1878_v21 = vpop.eup %1877  ;;  %v827_v22 = vadd.f32 1.0, %v1876_v20  ;;  %1879 = vpow2.f32 %v1792_v19 }
 0x2a9   :  { %v846_v23 = vadd.f32 1.0, %v1878_v21 }
 0x2aa   :  { %1881 = vrcp.f32 %v827_v22  ;;  %v839_v43 = vand.u32 2147483648, %v827_v22  ;;  %v837_v46 = vand.u32 2147483647, %v827_v22  ;;  %vm833_vm6 = vweird.f32 %v827_v22 }
 0x2ab   :  { %1883 = vrcp.f32 %v846_v23  ;;  %v858_v44 = vand.u32 2147483648, %v846_v23  ;;  %v856_v24 = vand.u32 2147483647, %v846_v23  ;;  %vm852_vm7 = vweird.f32 %v846_v23 }
 0x2ac   :  { %v840_v36 = vor.u32 1.1754944e-38, %v839_v43  ;;  %vm838_vm10 = vcmp.eq.f32.partialorder %v837_v46, 8.507059e+37 }
 0x2ad   :  { %v859_v9 = vor.u32 1.1754944e-38, %v858_v44  ;;  %vm857_vm11 = vcmp.eq.f32.partialorder %v856_v24, 8.507059e+37 }
 0x2ae   :  { %v1880_v28 = vpop.eup %1879 }
 0x2af   :  { %v866_v31 = vadd.f32 1.0, %v1880_v28 }
 0x2b0   :  { %v1882_v32 = vpop.eup %1881 }
 0x2b1   :  { %v1884_v34 = vpop.eup %1883  ;;  %v829_v38 = vmul.f32 %v1882_v32, %v827_v22  ;;  %1885 = vrcp.f32 %v866_v31  ;;  %vm834_vm4 = vweird.f32 %v1882_v32  ;;  %v878_v62 = vand.u32 2147483648, %v866_v31 }
 0x2b2   :  { %v848_v39 = vmul.f32 %v1884_v34, %v846_v23  ;;  %1887 = vtanh.f32 %v822_v33  ;;  %vm853_vm5 = vweird.f32 %v1884_v34  ;;  %vm835_vm8 = vmor %vm833_vm6, %vm834_vm4  ;;  %vm872_vm13 = vweird.f32 %v866_v31 }
 0x2b3   :  { %v830_v40 = vsub.f32 1.0, %v829_v38  ;;  %vm854_vm9 = vmor %vm852_vm7, %vm853_vm5  ;;  %v876_v55 = vand.u32 2147483647, %v866_v31  ;;  %v879_v60 = vor.u32 1.1754944e-38, %v878_v62 }
 0x2b4   :  { %v849_v42 = vsub.f32 1.0, %v848_v39 }
 0x2b5   :  { %v831_v45 = vmul.f32 %v1882_v32, %v830_v40  ;;  %vm877_vm15 = vcmp.eq.f32.partialorder %v876_v55, 8.507059e+37  ;;  %v3127_v55 = vld [vmem:[%s3651_s1 + $0x1e8] sm:$0xff] }
 0x2b6   :  { %v850_v17 = vmul.f32 %v1884_v34, %v849_v42 }
 0x2b7   :  { %v1886_v30 = vpop.eup %1885  ;;  %v832_v35 = vadd.f32 %v1882_v32, %v831_v45 }
 0x2b8   :  { %v851_v50 = vadd.f32 %v1884_v34, %v850_v17  ;;  %v868_v25 = vmul.f32 %v1886_v30, %v866_v31  ;;  %v1888_v12 = vpop.eup %1887  ;;  %vm873_vm12 = vweird.f32 %v1886_v30 }
 0x2b9   :  { %v836_v11 = vsel %vm835_vm8, %v1882_v32, %v832_v35  ;;  %vm874_vm14 = vmor %vm872_vm13, %vm873_vm12 }
 0x2ba   :  { %v841_v48 = vsel %vm838_vm10, %v840_v36, %v836_v11  ;;  %v855_v13 = vsel %vm854_vm9, %v1884_v34, %v851_v50  ;;  %v869_v37 = vsub.f32 1.0, %v868_v25 }
 0x2bb   :  { %v860_v49 = vsel %vm857_vm11, %v859_v9, %v855_v13  ;;  %v883_v18 = vmul.f32 %v1888_v12, %v841_v48 }
 0x2bc   :  { %v882_v63 = vmul.f32 %v860_v49, %v2979_v54  ;;  %v870_v52 = vmul.f32 %v1886_v30, %v869_v37  ;;  %v1794_v54 = vld [vmem:[%s3652_s0 + $0x80] sm:$0xff] }
 0x2be   :  { %v3094_v47 = vadd.f32 %v883_v18, %v882_v63  ;;  %v871_v29 = vadd.f32 %v1886_v30, %v870_v52 }
 0x2c0   :  { %1889 = vtanh.f32 %v3094_v47  ;;  %v875_v53 = vsel %vm874_vm14, %v1886_v30, %v871_v29 }
 0x2c1   :  { %v880_v51 = vsel %vm877_vm15, %v879_v60, %v875_v53  ;;  %v3132_v53 = vld [vmem:[%s3651_s1 + $0x1f0] sm:$0xff]  ;;  %v3139_v60 = vld [vmem:[%s3651_s1 + $0x1f8] sm:$0xff] }
 0x2c6   :  { %v1890_v41 = vpop.eup %1889 }
 0x2c7   :  { %v886_v0 = vmul.f32 %v1890_v41, %v880_v51  ;;  %v3146_v41 = vld [vmem:[%s3651_s1 + $0x1c0] sm:$0xff]  ;;  %v3151_v51 = vld [vmem:[%s3651_s1 + $0x1c8] sm:$0xff] }
 0x2c9   :  { %1793 = vst [vmem:[%s3653_s2 + $0x18] sm:$0xff] %v886_v0  ;;  %974 = vmatmul.f32.vlgmr.msra.gmra.mxu0 %v886_v0  ;;  %994 = vmatmul.f32.vlgmr.msra.gmra.mxu1 %v886_v0 }
 0x2ca   :  { %1014 = vmatmul.f32.vlgmr.msra.gmra.mxu2 %v886_v0  ;;  %1034 = vmatmul.f32.vlgmr.msra.gmra.mxu3 %v886_v0  ;;  %v3156_v0 = vld [vmem:[%s3651_s1 + $0x1d0] sm:$0xff] }
 0x2cb   :  { %1414 = vmatpush.msra.mxu1 %v3127_v55  ;;  %1434 = vmatpush.msra.mxu2 %v3132_v53 }
 0x2cc   :  { %1454 = vmatpush.msra.mxu3 %v3139_v60 }
 0x2cd   :  { %1415 = vmatpush.msra.mxu1 %v3151_v51  ;;  %1435 = vmatpush.msra.mxu2 %v3156_v0 }
 0x346   :  { %v975_v56 = vpop.f32.mrf.mxu0  ;;  %v995_v57 = vpop.f32.mrf.mxu1 }
 0x347   :  { %v1038_v58 = vadd.f32 %v1794_v54, %v975_v56  ;;  %v1039_v59 = vadd.f32 %v1795_v6, %v995_v57  ;;  %v3163_v54 = vld [vmem:[%s3651_s1 + $0x1d8] sm:$0xff]  ;;  %v3170_v6 = vld [vmem:[%s3651_s1 + $0x1a0] sm:$0xff]  ;;  %v3175_v56 = vld [vmem:[%s3651_s1 + $0x1a8] sm:$0xff] }
 0x348   :  { %1455 = vmatpush.msra.mxu3 %v3163_v54  ;;  %v3180_v57 = vld [vmem:[%s3651_s1 + $0x1b0] sm:$0xff]  ;;  %1416 = vmatpush.msra.mxu1 %v3175_v56 }
 0x349   :  { %v1798_v61 = vmul.f32 -1.442695, %v1038_v58  ;;  %v1799_v1 = vmul.f32 -1.442695, %v1039_v59  ;;  %v3187_v58 = vld [vmem:[%s3651_s1 + $0x1b8] sm:$0xff]  ;;  %1436 = vmatpush.msra.mxu2 %v3180_v57  ;;  %v3194_v59 = vld [vmem:[%s3651_s1 + $0x180] sm:$0xff] }
 0x34a   :  { %1456 = vmatpush.msra.mxu3 %v3187_v58 }
 0x34b   :  { %1891 = vpow2.f32 %v1798_v61  ;;  %v3199_v61 = vld [vmem:[%s3651_s1 + $0x188] sm:$0xff] }
 0x34c   :  { %1893 = vpow2.f32 %v1799_v1  ;;  %v3204_v1 = vld [vmem:[%s3651_s1 + $0x190] sm:$0xff]  ;;  %1417 = vmatpush.msra.mxu1 %v3199_v61 }
 0x34d   :  { %v1035_v4 = vpop.f32.mrf.mxu3  ;;  %v1015_v16 = vpop.f32.mrf.mxu2  ;;  %1437 = vmatpush.msra.mxu2 %v3204_v1 }
 0x34e   :  { %v1041_v5 = vadd.f32 %v1797_v3, %v1035_v4  ;;  %v1040_v22 = vadd.f32 %v1796_v15, %v1015_v16  ;;  %v3211_v3 = vld [vmem:[%s3651_s1 + $0x198] sm:$0xff]  ;;  %v3218_v4 = vld [vmem:[%s3651_s1 + $0x160] sm:$0xff] }
 0x34f   :  { %1457 = vmatpush.msra.mxu3 %v3211_v3  ;;  %v3259_v15 = vld [vmem:[%s3651_s1 + $0x158] sm:$0xff]  ;;  %v3266_v16 = vld [vmem:[%s3651_s1 + $0x120] sm:$0xff] }
 0x350   :  { %v1800_v7 = vmul.f32 -1.442695, %v1041_v5  ;;  %v3223_v5 = vld [vmem:[%s3651_s1 + $0x168] sm:$0xff] }
 0x351   :  { %v1892_v8 = vpop.eup %1891  ;;  %1418 = vmatpush.msra.mxu1 %v3223_v5 }
 0x352   :  { %v1894_v2 = vpop.eup %1893  ;;  %v1045_v10 = vadd.f32 1.0, %v1892_v8  ;;  %1895 = vpow2.f32 %v1800_v7  ;;  %v3228_v7 = vld [vmem:[%s3651_s1 + $0x170] sm:$0xff]  ;;  %v3235_v8 = vld [vmem:[%s3651_s1 + $0x178] sm:$0xff] }
 0x353   :  { %v1064_v14 = vadd.f32 1.0, %v1894_v2  ;;  %1438 = vmatpush.msra.mxu2 %v3228_v7  ;;  %1458 = vmatpush.msra.mxu3 %v3235_v8  ;;  %v3242_v2 = vld [vmem:[%s3651_s1 + $0x140] sm:$0xff] }
 0x354   :  { %1897 = vrcp.f32 %v1045_v10  ;;  %v1057_v32 = vand.u32 2147483648, %v1045_v10  ;;  %v1055_v38 = vand.u32 2147483647, %v1045_v10  ;;  %vm1051_vm2 = vweird.f32 %v1045_v10 }
 0x355   :  { %1899 = vrcp.f32 %v1064_v14  ;;  %v1076_v33 = vand.u32 2147483648, %v1064_v14  ;;  %v1074_v40 = vand.u32 2147483647, %v1064_v14  ;;  %vm1070_vm3 = vweird.f32 %v1064_v14  ;;  %1459 = vmatpush.msra.mxu3 %v3259_v15 }
 0x356   :  { %v1058_v44 = vor.u32 1.1754944e-38, %v1057_v32  ;;  %vm1056_vm6 = vcmp.eq.f32.partialorder %v1055_v38, 8.507059e+37  ;;  %v3320_v32 = vld [vmem:[%s3651_s1 + $0xe0] sm:$0xff]  ;;  %v3337_v38 = vld [vmem:[%s3651_s1 + $0xf8] sm:$0xff] }
 0x357   :  { %v1077_v17 = vor.u32 1.1754944e-38, %v1076_v33  ;;  %vm1075_vm7 = vcmp.eq.f32.partialorder %v1074_v40, 8.507059e+37  ;;  %v3325_v33 = vld [vmem:[%s3651_s1 + $0xe8] sm:$0xff] }
 0x358   :  { %v1896_v19 = vpop.eup %1895 }
 0x359   :  { %v1084_v20 = vadd.f32 1.0, %v1896_v19  ;;  %v3271_v19 = vld [vmem:[%s3651_s1 + $0x128] sm:$0xff] }
 0x35a   :  { %v1898_v21 = vpop.eup %1897 }
 0x35b   :  { %v1900_v23 = vpop.eup %1899  ;;  %v1047_v26 = vmul.f32 %v1898_v21, %v1045_v10  ;;  %1901 = vrcp.f32 %v1084_v20  ;;  %vm1052_vm0 = vweird.f32 %v1898_v21  ;;  %v1096_v37 = vand.u32 2147483648, %v1084_v20  ;;  %v3247_v10 = vld [vmem:[%s3651_s1 + $0x148] sm:$0xff] }
 0x35c   :  { %v1066_v27 = vmul.f32 %v1900_v23, %v1064_v14  ;;  %1903 = vtanh.f32 %v1040_v22  ;;  %vm1071_vm1 = vweird.f32 %v1900_v23  ;;  %vm1053_vm4 = vmor %vm1051_vm2, %vm1052_vm0  ;;  %vm1090_vm9 = vweird.f32 %v1084_v20  ;;  %v3252_v14 = vld [vmem:[%s3651_s1 + $0x150] sm:$0xff]  ;;  %1419 = vmatpush.msra.mxu1 %v3247_v10  ;;  %v3290_v22 = vld [vmem:[%s3651_s1 + $0x100] sm:$0xff] }
 0x35d   :  { %v1048_v28 = vsub.f32 1.0, %v1047_v26  ;;  %vm1072_vm5 = vmor %vm1070_vm3, %vm1071_vm1  ;;  %v1094_v49 = vand.u32 2147483647, %v1084_v20  ;;  %v1097_v63 = vor.u32 1.1754944e-38, %v1096_v37  ;;  %1439 = vmatpush.msra.mxu2 %v3252_v14  ;;  %v3300_v26 = vld [vmem:[%s3651_s1 + $0x110] sm:$0xff]  ;;  %v3412_v37 = vld [vmem:[%s3651_s1 + $0x98] sm:$0xff] }
 0x35e   :  { %v1067_v31 = vsub.f32 1.0, %v1066_v27  ;;  %1420 = vmatpush.msra.mxu1 %v3271_v19  ;;  %v1802_v27 = vld [vmem:[%s3652_s0 + $0xa0] sm:$0xff] }
 0x35f   :  { %v1049_v34 = vmul.f32 %v1898_v21, %v1048_v28  ;;  %vm1095_vm11 = vcmp.eq.f32.partialorder %v1094_v49, 8.507059e+37  ;;  %v1803_v28 = vld [vmem:[%s3652_s0 + $0xa8] sm:$0xff]  ;;  %v3417_v49 = vld [vmem:[%s3651_s1 + $0x60] sm:$0xff] }
 0x360   :  { %v1068_v39 = vmul.f32 %v1900_v23, %v1067_v31  ;;  %v3313_v31 = vld [vmem:[%s3651_s1 + $0x118] sm:$0xff] }
 0x361   :  { %v1902_v42 = vpop.eup %1901  ;;  %v1050_v43 = vadd.f32 %v1898_v21, %v1049_v34  ;;  %v3330_v34 = vld [vmem:[%s3651_s1 + $0xf0] sm:$0xff] }
 0x362   :  { %v1069_v45 = vadd.f32 %v1900_v23, %v1068_v39  ;;  %v1086_v46 = vmul.f32 %v1902_v42, %v1084_v20  ;;  %v1904_v30 = vpop.eup %1903  ;;  %vm1091_vm8 = vweird.f32 %v1902_v42  ;;  %v3276_v20 = vld [vmem:[%s3651_s1 + $0x130] sm:$0xff] }
 0x363   :  { %v1054_v24 = vsel %vm1053_vm4, %v1898_v21, %v1050_v43  ;;  %vm1092_vm10 = vmor %vm1090_vm9, %vm1091_vm8  ;;  %v3283_v21 = vld [vmem:[%s3651_s1 + $0x138] sm:$0xff]  ;;  %1440 = vmatpush.msra.mxu2 %v3276_v20  ;;  %v3349_v43 = vld [vmem:[%s3651_s1 + $0xc8] sm:$0xff] }
 0x364   :  { %v1059_v35 = vsel %vm1056_vm6, %v1058_v44, %v1054_v24  ;;  %v1073_v36 = vsel %vm1072_vm5, %v1900_v23, %v1069_v45  ;;  %v1087_v50 = vsub.f32 1.0, %v1086_v46  ;;  %1460 = vmatpush.msra.mxu3 %v3283_v21  ;;  %v3295_v23 = vld [vmem:[%s3651_s1 + $0x108] sm:$0xff]  ;;  %v3354_v44 = vld [vmem:[%s3651_s1 + $0xd0] sm:$0xff]  ;;  %v3368_v24 = vld [vmem:[%s3651_s1 + $0xa0] sm:$0xff] }
 0x365   :  { %v1078_v25 = vsel %vm1075_vm7, %v1077_v17, %v1073_v36  ;;  %v1101_v9 = vmul.f32 %v1904_v30, %v1059_v35  ;;  %1421 = vmatpush.msra.mxu1 %v3295_v23  ;;  %1441 = vmatpush.msra.mxu2 %v3300_v26  ;;  %v3361_v17 = vld [vmem:[%s3651_s1 + $0xd8] sm:$0xff]  ;;  %v3373_v30 = vld [vmem:[%s3651_s1 + $0xa8] sm:$0xff]  ;;  %v3378_v35 = vld [vmem:[%s3651_s1 + $0xb0] sm:$0xff] }
 0x366   :  { %v1100_v11 = vmul.f32 %v1078_v25, %v3094_v47  ;;  %v1088_v12 = vmul.f32 %v1902_v42, %v1087_v50  ;;  %v3122_v47 = vld [vmem:[%s3651_s1 + $0x1e0] sm:$0xff]  ;;  %1461 = vmatpush.msra.mxu3 %v3313_v31  ;;  %v1805_v25 = vld [vmem:[%s3652_s0 + $0xb8] sm:$0xff] }
 0x367   :  { %1394 = vmatpush.msra.mxu0 %v3122_v47  ;;  %1422 = vmatpush.msra.mxu1 %v3325_v33 }
 0x368   :  { %v3113_v48 = vadd.f32 %v1101_v9, %v1100_v11  ;;  %v1089_v13 = vadd.f32 %v1902_v42, %v1088_v12  ;;  %1442 = vmatpush.msra.mxu2 %v3330_v34  ;;  %1462 = vmatpush.msra.mxu3 %v3337_v38  ;;  %v3388_v9 = vld [vmem:[%s3651_s1 + $0xb8] sm:$0xff]  ;;  %v3395_v11 = vld [vmem:[%s3651_s1 + $0x80] sm:$0xff]  ;;  %v3400_v12 = vld [vmem:[%s3651_s1 + $0x88] sm:$0xff] }
 0x369   :  { %1395 = vmatpush.msra.mxu0 %v3146_v41  ;;  %1423 = vmatpush.msra.mxu1 %v3349_v43 }
 0x36a   :  { %1905 = vtanh.f32 %v3113_v48  ;;  %v1093_v18 = vsel %vm1092_vm10, %v1902_v42, %v1089_v13  ;;  %v3344_v42 = vld [vmem:[%s3651_s1 + $0xc0] sm:$0xff]  ;;  %1443 = vmatpush.msra.mxu2 %v3354_v44  ;;  %1463 = vmatpush.msra.mxu3 %v3361_v17  ;;  %v3405_v13 = vld [vmem:[%s3651_s1 + $0x90] sm:$0xff] }
 0x36b   :  { %v1098_v29 = vsel %vm1095_vm11, %v1097_v63, %v1093_v18  ;;  %1396 = vmatpush.msra.mxu0 %v3170_v6  ;;  %1424 = vmatpush.msra.mxu1 %v3373_v30  ;;  %v3422_v18 = vld [vmem:[%s3651_s1 + $0x68] sm:$0xff]  ;;  %v3429_v63 = vld [vmem:[%s3651_s1 + $0x70] sm:$0xff] }
 0x36c   :  { %1444 = vmatpush.msra.mxu2 %v3378_v35  ;;  %1464 = vmatpush.msra.mxu3 %v3388_v9 }
 0x36d   :  { %1397 = vmatpush.msra.mxu0 %v3194_v59  ;;  %1425 = vmatpush.msra.mxu1 %v3400_v12 }
 0x36e   :  { %1445 = vmatpush.msra.mxu2 %v3405_v13  ;;  %1465 = vmatpush.msra.mxu3 %v3412_v37 }
 0x36f   :  { %1398 = vmatpush.msra.mxu0 %v3218_v4  ;;  %1426 = vmatpush.msra.mxu1 %v3422_v18 }
 0x370   :  { %v1906_v52 = vpop.eup %1905  ;;  %1446 = vmatpush.msra.mxu2 %v3429_v63 }
 0x371   :  { %v1104_v62 = vmul.f32 %v1906_v52, %v1098_v29  ;;  %1399 = vmatpush.msra.mxu0 %v3242_v2  ;;  %v3434_v52 = vld [vmem:[%s3651_s1 + $0x78] sm:$0xff]  ;;  %v3439_v29 = vld [vmem:[%s3651_s1 + $0x40] sm:$0xff] }
 0x372   :  { %3729 = vst [vmem:[#allocation18_spill] sm:$0xff] %v3434_v52  ;;  %1466 = vmatpush.msra.mxu3 %v3434_v52 }
 0x373   :  { %1801 = vst [vmem:[%s3653_s2 + $0x20] sm:$0xff] %v1104_v62  ;;  %1192 = vmatmul.f32.vlgmr.msrb.gmra.mxu0 %v1104_v62  ;;  %1212 = vmatmul.f32.vlgmr.msrb.gmra.mxu1 %v1104_v62 }
 0x374   :  { %1232 = vmatmul.f32.vlgmr.msrb.gmra.mxu2 %v1104_v62  ;;  %1252 = vmatmul.f32.vlgmr.msrb.gmra.mxu3 %v1104_v62  ;;  %3730 = vst [vmem:[#allocation19_spill] sm:$0xff] %v3439_v29 }
 0x375   :  { %1400 = vmatpush.msra.mxu0 %v3266_v16 }
 0x377   :  { %1401 = vmatpush.msra.mxu0 %v3290_v22 }
 0x379   :  { %1402 = vmatpush.msra.mxu0 %v3320_v32 }
 0x37b   :  { %1403 = vmatpush.msra.mxu0 %v3344_v42 }
 0x37d   :  { %1404 = vmatpush.msra.mxu0 %v3368_v24 }
 0x37f   :  { %1405 = vmatpush.msra.mxu0 %v3395_v11 }
 0x381   :  { %1406 = vmatpush.msra.mxu0 %v3417_v49 }
 0x383   :  { %1407 = vmatpush.msra.mxu0 %v3439_v29 }
 0x3f0   :  { %v1193_v39 = vpop.f32.mrf.mxu0  ;;  %v1213_v40 = vpop.f32.mrf.mxu1 }
 0x3f1   :  { %v1256_v45 = vadd.f32 %v1802_v27, %v1193_v39  ;;  %v1257_v46 = vadd.f32 %v1803_v28, %v1213_v40  ;;  %v3446_v27 = vld [vmem:[%s3651_s1 + $0x48] sm:$0xff]  ;;  %v3451_v28 = vld [vmem:[%s3651_s1 + $0x50] sm:$0xff]  ;;  %v3456_v39 = vld [vmem:[%s3651_s1 + $0x58] sm:$0xff] }
 0x3f2   :  { %3731 = vst [vmem:[#allocation20_spill] sm:$0xff] %v3446_v27  ;;  %1427 = vmatpush.msra.mxu1 %v3446_v27  ;;  %1447 = vmatpush.msra.mxu2 %v3451_v28  ;;  %v3492_v27 = vld [vmem:[%s3651_s1 + $0x8] sm:$0xff] }
 0x3f3   :  { %v1806_v36 = vmul.f32 -1.442695, %v1256_v45  ;;  %v1807_v50 = vmul.f32 -1.442695, %v1257_v46  ;;  %3732 = vst [vmem:[#allocation21_spill] sm:$0xff] %v3451_v28  ;;  %v3463_v45 = vld [vmem:[%s3651_s1 + $0x20] sm:$0xff]  ;;  %1467 = vmatpush.msra.mxu3 %v3456_v39 }
 0x3f4   :  { %3733 = vst [vmem:[#allocation22_spill] sm:$0xff] %v3456_v39  ;;  %v3468_v46 = vld [vmem:[%s3651_s1 + $0x28] sm:$0xff]  ;;  %1408 = vmatpush.msra.mxu0 %v3463_v45  ;;  %v3504_v39 = vld [vmem:[%s3651_s1 + $0x18] sm:$0xff] }
 0x3f5   :  { %1907 = vpow2.f32 %v1806_v36  ;;  %3734 = vst [vmem:[#allocation23_spill] sm:$0xff] %v3463_v45  ;;  %v3475_v36 = vld [vmem:[%s3651_s1 + $0x30] sm:$0xff]  ;;  %1428 = vmatpush.msra.mxu1 %v3468_v46 }
 0x3f6   :  { %1909 = vpow2.f32 %v1807_v50  ;;  %v3480_v50 = vld [vmem:[%s3651_s1 + $0x38] sm:$0xff]  ;;  %1448 = vmatpush.msra.mxu2 %v3475_v36 }
 0x3f7   :  { %v1253_v62 = vpop.f32.mrf.mxu3  ;;  %1468 = vmatpush.msra.mxu3 %v3480_v50  ;;  %1429 = vmatpush.msra.mxu1 %v3492_v27 }
 0x3f8   :  { %v1259_v40 = vadd.f32 %v1805_v25, %v1253_v62  ;;  %v3487_v62 = vld [vmem:[%s3651_s1] sm:$0xff] }
 0x3f9   :  { %1409 = vmatpush.msra.mxu0 %v3487_v62  ;;  %1469 = vmatpush.msra.mxu3 %v3504_v39 }
 0x3fa   :  { %v1808_v25 = vmul.f32 -1.442695, %v1259_v40  ;;  %v3499_v40 = vld [vmem:[%s3651_s1 + $0x10] sm:$0xff]  ;;  %1632 = vmatpush.msrb.mxu1 %v3127_v55 }
 0x3fb   :  { %v1908_v29 = vpop.eup %1907  ;;  %1449 = vmatpush.msra.mxu2 %v3499_v40  ;;  %1612 = vmatpush.msrb.mxu0 %v3122_v47 }
 0x3fc   :  { %v1910_v28 = vpop.eup %1909  ;;  %v3506_v52 = vadd.f32 1.0, %v1908_v29  ;;  %1911 = vpow2.f32 %v1808_v25  ;;  %1672 = vmatpush.msrb.mxu3 %v3139_v60  ;;  %v1804_v29 = vld [vmem:[%s3652_s0 + $0xb0] sm:$0xff]  ;;  %1633 = vmatpush.msrb.mxu1 %v3151_v51 }
 0x3fd   :  { %v3510_v45 = vadd.f32 1.0, %v1910_v28  ;;  %1652 = vmatpush.msrb.mxu2 %v3132_v53  ;;  %v1233_v28 = vpop.f32.mrf.mxu2  ;;  %1613 = vmatpush.msrb.mxu0 %v3146_v41 }
 0x3fe   :  { %1913 = vrcp.f32 %v3506_v52  ;;  %1673 = vmatpush.msrb.mxu3 %v3163_v54  ;;  %1634 = vmatpush.msrb.mxu1 %v3175_v56  ;;  %v1258_v53 = vadd.f32 %v1804_v29, %v1233_v28  ;;  %vm1269_vm14 = vweird.f32 %v3506_v52 }
 0x3ff   :  { %1915 = vrcp.f32 %v3510_v45  ;;  %1653 = vmatpush.msrb.mxu2 %v3156_v0  ;;  %1614 = vmatpush.msrb.mxu0 %v3170_v6  ;;  %v1275_v6 = vand.u32 2147483648, %v3506_v52  ;;  %v1294_v56 = vand.u32 2147483648, %v3510_v45  ;;  %vm1288_vm15 = vweird.f32 %v3510_v45 }
 0x400   :  { %1674 = vmatpush.msrb.mxu3 %v3187_v58  ;;  %1635 = vmatpush.msrb.mxu1 %v3199_v61  ;;  %v1273_v58 = vand.u32 2147483647, %v3506_v52  ;;  %v1292_v61 = vand.u32 2147483647, %v3510_v45 }
 0x401   :  { %1654 = vmatpush.msrb.mxu2 %v3180_v57  ;;  %1615 = vmatpush.msrb.mxu0 %v3194_v59 }
 0x402   :  { %v1912_v25 = vpop.eup %1911  ;;  %1675 = vmatpush.msrb.mxu3 %v3211_v3  ;;  %1636 = vmatpush.msrb.mxu1 %v3223_v5  ;;  %vm1274_vm2 = vcmp.eq.f32.partialorder %v1273_v58, 8.507059e+37  ;;  %vm1293_vm3 = vcmp.eq.f32.partialorder %v1292_v61, 8.507059e+37 }
 0x403   :  { %v3529_v47 = vadd.f32 1.0, %v1912_v25  ;;  %1655 = vmatpush.msrb.mxu2 %v3204_v1  ;;  %1616 = vmatpush.msrb.mxu0 %v3218_v4  ;;  %v1276_v4 = vor.u32 1.1754944e-38, %v1275_v6 }
 0x404   :  { %v1914_v55 = vpop.eup %1913  ;;  %1676 = vmatpush.msrb.mxu3 %v3235_v8  ;;  %1637 = vmatpush.msrb.mxu1 %v3247_v10  ;;  %v1295_v8 = vor.u32 1.1754944e-38, %v1294_v56 }
 0x405   :  { %v1916_v60 = vpop.eup %1915  ;;  %v1265_v41 = vmul.f32 %v1914_v55, %v3506_v52  ;;  %1917 = vrcp.f32 %v3529_v47  ;;  %1656 = vmatpush.msrb.mxu2 %v3228_v7  ;;  %vm1270_vm12 = vweird.f32 %v1914_v55  ;;  %1617 = vmatpush.msrb.mxu0 %v3242_v2  ;;  %vm1308_vm5 = vweird.f32 %v3529_v47  ;;  %v1813_v52 = vld [vmem:[%s3652_s0 + $0xd8] sm:$0xff] }
 0x406   :  { %v1284_v51 = vmul.f32 %v1916_v60, %v3510_v45  ;;  %1919 = vtanh.f32 %v1258_v53  ;;  %vm1289_vm13 = vweird.f32 %v1916_v60  ;;  %1677 = vmatpush.msrb.mxu3 %v3259_v15  ;;  %1638 = vmatpush.msrb.mxu1 %v3271_v19  ;;  %vm1271_vm0 = vmor %vm1269_vm14, %vm1270_vm12 }
 0x407   :  { %v1266_v0 = vsub.f32 1.0, %v1265_v41  ;;  %1657 = vmatpush.msrb.mxu2 %v3252_v14  ;;  %1618 = vmatpush.msrb.mxu0 %v3266_v16  ;;  %vm1290_vm1 = vmor %vm1288_vm15, %vm1289_vm13 }
 0x408   :  { %v1285_v54 = vsub.f32 1.0, %v1284_v51  ;;  %1678 = vmatpush.msrb.mxu3 %v3283_v21  ;;  %1639 = vmatpush.msrb.mxu1 %v3295_v23 }
 0x409   :  { %v1267_v57 = vmul.f32 %v1914_v55, %v1266_v0  ;;  %1658 = vmatpush.msrb.mxu2 %v3276_v20  ;;  %1619 = vmatpush.msrb.mxu0 %v3290_v22 }
 0x40a   :  { %v1286_v59 = vmul.f32 %v1916_v60, %v1285_v54  ;;  %1679 = vmatpush.msrb.mxu3 %v3313_v31  ;;  %1640 = vmatpush.msrb.mxu1 %v3325_v33  ;;  %v1312_v31 = vand.u32 2147483647, %v3529_v47 }
 0x40b   :  { %v3554_v1 = vpop.eup %1917  ;;  %v1268_v3 = vadd.f32 %v1914_v55, %v1267_v57  ;;  %1659 = vmatpush.msrb.mxu2 %v3300_v26  ;;  %1620 = vmatpush.msrb.mxu0 %v3320_v32  ;;  %v1314_v26 = vand.u32 2147483648, %v3529_v47 }
 0x40c   :  { %v1287_v5 = vadd.f32 %v1916_v60, %v1286_v59  ;;  %v1304_v7 = vmul.f32 %v3554_v1, %v3529_v47  ;;  %v1920_v10 = vpop.eup %1919  ;;  %1680 = vmatpush.msrb.mxu3 %v3337_v38  ;;  %1641 = vmatpush.msrb.mxu1 %v3349_v43  ;;  %vm1309_vm4 = vweird.f32 %v3554_v1  ;;  %vm1313_vm7 = vcmp.eq.f32.partialorder %v1312_v31, 8.507059e+37  ;;  %v3736_v38 = vld [vmem:[#allocation19_spill] sm:$0xff] }
 0x40d   :  { %v1272_v2 = vsel %vm1271_vm0, %v1914_v55, %v1268_v3  ;;  %1660 = vmatpush.msrb.mxu2 %v3330_v34  ;;  %1621 = vmatpush.msrb.mxu0 %v3344_v42  ;;  %vm1310_vm6 = vmor %vm1308_vm5, %vm1309_vm4  ;;  %v1315_v33 = vor.u32 1.1754944e-38, %v1314_v26  ;;  %v3735_v34 = vld [vmem:[#allocation18_spill] sm:$0xff]  ;;  %v3737_v42 = vld [vmem:[#allocation20_spill] sm:$0xff] }
 0x40e   :  { %v1277_v14 = vsel %vm1274_vm2, %v1276_v4, %v1272_v2  ;;  %v1291_v15 = vsel %vm1290_vm1, %v1916_v60, %v1287_v5  ;;  %v1305_v16 = vsub.f32 1.0, %v1304_v7  ;;  %1681 = vmatpush.msrb.mxu3 %v3361_v17  ;;  %1642 = vmatpush.msrb.mxu1 %v3373_v30  ;;  %v3738_v17 = vld [vmem:[#allocation21_spill] sm:$0xff] }
 0x40f   :  { %v1296_v19 = vsel %vm1293_vm3, %v1295_v8, %v1291_v15  ;;  %v1319_v20 = vmul.f32 %v1920_v10, %v1277_v14  ;;  %1661 = vmatpush.msrb.mxu2 %v3354_v44  ;;  %1622 = vmatpush.msrb.mxu0 %v3368_v24  ;;  %v3739_v24 = vld [vmem:[#allocation22_spill] sm:$0xff] }
 0x410   :  { %v1318_v21 = vmul.f32 %v1296_v19, %v3113_v48  ;;  %v1306_v22 = vmul.f32 %v3554_v1, %v1305_v16  ;;  %1682 = vmatpush.msrb.mxu3 %v3388_v9  ;;  %1643 = vmatpush.msrb.mxu1 %v3400_v12  ;;  %v1810_v9 = vld [vmem:[%s3652_s0 + $0xc0] sm:$0xff] }
 0x411   :  { %1662 = vmatpush.msrb.mxu2 %v3378_v35  ;;  %1623 = vmatpush.msrb.mxu0 %v3395_v11  ;;  %v3740_v35 = vld [vmem:[#allocation23_spill] sm:$0xff]  ;;  %v1811_v11 = vld [vmem:[%s3652_s0 + $0xc8] sm:$0xff] }
 0x412   :  { %v3578_v23 = vadd.f32 %v1319_v20, %v1318_v21  ;;  %v1307_v48 = vadd.f32 %v3554_v1, %v1306_v22  ;;  %1683 = vmatpush.msrb.mxu3 %v3412_v37  ;;  %1644 = vmatpush.msrb.mxu1 %v3422_v18 }
 0x413   :  { %1663 = vmatpush.msrb.mxu2 %v3405_v13  ;;  %1624 = vmatpush.msrb.mxu0 %v3417_v49 }
 0x414   :  { %1921 = vtanh.f32 %v3578_v23  ;;  %v1311_v32 = vsel %vm1310_vm6, %v3554_v1, %v1307_v48  ;;  %1684 = vmatpush.msrb.mxu3 %v3735_v34  ;;  %1645 = vmatpush.msrb.mxu1 %v3737_v42 }
 0x415   :  { %1664 = vmatpush.msrb.mxu2 %v3429_v63  ;;  %1625 = vmatpush.msrb.mxu0 %v3736_v38  ;;  %v1316_v44 = vsel %vm1313_vm7, %v1315_v33, %v1311_v32 }
 0x416   :  { %1685 = vmatpush.msrb.mxu3 %v3739_v24  ;;  %1646 = vmatpush.msrb.mxu1 %v3468_v46 }
 0x417   :  { %1665 = vmatpush.msrb.mxu2 %v3738_v17  ;;  %1626 = vmatpush.msrb.mxu0 %v3740_v35 }
 0x418   :  { %1686 = vmatpush.msrb.mxu3 %v3480_v50  ;;  %1647 = vmatpush.msrb.mxu1 %v3492_v27 }
 0x419   :  { %1666 = vmatpush.msrb.mxu2 %v3475_v36  ;;  %1627 = vmatpush.msrb.mxu0 %v3487_v62 }
 0x41a   :  { %v1922_v43 = vpop.eup %1921  ;;  %1687 = vmatpush.msrb.mxu3 %v3504_v39 }
 0x41b   :  { %v1322_v30 = vmul.f32 %v1922_v43, %v1316_v44  ;;  %1667 = vmatpush.msrb.mxu2 %v3499_v40  ;;  %v1812_v40 = vld [vmem:[%s3652_s0 + $0xd0] sm:$0xff]  ;;  %v1819_v43 = vld [vmem:[%s3652_s0 + $0xe8] sm:$0xff] }
 0x41d   :  { %1809 = vst [vmem:[%s3653_s2 + $0x28] sm:$0xff] %v1322_v30  ;;  %1410 = vmatmul.f32.vlgmr.msra.gmra.mxu0 %v1322_v30  ;;  %1430 = vmatmul.f32.vlgmr.msra.gmra.mxu1 %v1322_v30 }
 0x41e   :  { %1450 = vmatmul.f32.vlgmr.msra.gmra.mxu2 %v1322_v30  ;;  %1470 = vmatmul.f32.vlgmr.msra.gmra.mxu3 %v1322_v30 }
 0x49a   :  { %v1411_v12 = vpop.f32.mrf.mxu0  ;;  %v1431_v13 = vpop.f32.mrf.mxu1 }
 0x49b   :  { %v1474_v37 = vadd.f32 %v1810_v9, %v1411_v12  ;;  %v1475_v49 = vadd.f32 %v1811_v11, %v1431_v13  ;;  %v1821_v11 = vld [vmem:[%s3652_s0 + $0xf8] sm:$0xff] }
 0x49d   :  { %v1814_v18 = vmul.f32 -1.442695, %v1474_v37  ;;  %v1815_v63 = vmul.f32 -1.442695, %v1475_v49 }
 0x49f   :  { %1923 = vpow2.f32 %v1814_v18 }
 0x4a0   :  { %1925 = vpow2.f32 %v1815_v63 }
 0x4a1   :  { %v1471_v27 = vpop.f32.mrf.mxu3  ;;  %v1451_v29 = vpop.f32.mrf.mxu2 }
 0x4a2   :  { %v1477_v39 = vadd.f32 %v1813_v52, %v1471_v27  ;;  %v1476_v55 = vadd.f32 %v1812_v40, %v1451_v29  ;;  %v1820_v27 = vld [vmem:[%s3652_s0 + $0xf0] sm:$0xff] }
 0x4a4   :  { %v1816_v45 = vmul.f32 -1.442695, %v1477_v39 }
 0x4a5   :  { %v1924_v46 = vpop.eup %1923 }
 0x4a6   :  { %v1926_v36 = vpop.eup %1925  ;;  %v1481_v50 = vadd.f32 1.0, %v1924_v46  ;;  %1927 = vpow2.f32 %v1816_v45 }
 0x4a7   :  { %v1500_v62 = vadd.f32 1.0, %v1926_v36 }
 0x4a8   :  { %1929 = vrcp.f32 %v1481_v50  ;;  %v1493_v54 = vand.u32 2147483648, %v1481_v50  ;;  %v1491_v57 = vand.u32 2147483647, %v1481_v50  ;;  %vm1487_vm10 = vweird.f32 %v1481_v50 }
 0x4a9   :  { %1931 = vrcp.f32 %v1500_v62  ;;  %v1512_v6 = vand.u32 2147483648, %v1500_v62  ;;  %v1510_v59 = vand.u32 2147483647, %v1500_v62  ;;  %vm1506_vm11 = vweird.f32 %v1500_v62 }
 0x4aa   :  { %v1494_v3 = vor.u32 1.1754944e-38, %v1493_v54  ;;  %vm1492_vm14 = vcmp.eq.f32.partialorder %v1491_v57, 8.507059e+37 }
 0x4ab   :  { %v1513_v7 = vor.u32 1.1754944e-38, %v1512_v6  ;;  %vm1511_vm15 = vcmp.eq.f32.partialorder %v1510_v59, 8.507059e+37 }
 0x4ac   :  { %v1928_v28 = vpop.eup %1927 }
 0x4ad   :  { %v1520_v25 = vadd.f32 1.0, %v1928_v28 }
 0x4ae   :  { %v1930_v47 = vpop.eup %1929 }
 0x4af   :  { %v1932_v53 = vpop.eup %1931  ;;  %v1483_v60 = vmul.f32 %v1930_v47, %v1481_v50  ;;  %1933 = vrcp.f32 %v1520_v25  ;;  %vm1488_vm8 = vweird.f32 %v1930_v47  ;;  %v1532_v26 = vand.u32 2147483648, %v1520_v25 }
 0x4b0   :  { %v1502_v41 = vmul.f32 %v1932_v53, %v1500_v62  ;;  %1935 = vtanh.f32 %v1476_v55  ;;  %vm1507_vm9 = vweird.f32 %v1932_v53  ;;  %vm1489_vm12 = vmor %vm1487_vm10, %vm1488_vm8  ;;  %vm1526_vm1 = vweird.f32 %v1520_v25 }
 0x4b1   :  { %v1484_v51 = vsub.f32 1.0, %v1483_v60  ;;  %vm1508_vm13 = vmor %vm1506_vm11, %vm1507_vm9  ;;  %v1530_v31 = vand.u32 2147483647, %v1520_v25  ;;  %v1533_v33 = vor.u32 1.1754944e-38, %v1532_v26 }
 0x4b2   :  { %v1503_v0 = vsub.f32 1.0, %v1502_v41 }
 0x4b3   :  { %v1485_v56 = vmul.f32 %v1930_v47, %v1484_v51  ;;  %vm1531_vm3 = vcmp.eq.f32.partialorder %v1530_v31, 8.507059e+37 }
 0x4b4   :  { %v1504_v58 = vmul.f32 %v1932_v53, %v1503_v0 }
 0x4b5   :  { %v1934_v61 = vpop.eup %1933  ;;  %v1486_v1 = vadd.f32 %v1930_v47, %v1485_v56 }
 0x4b6   :  { %v1505_v4 = vadd.f32 %v1932_v53, %v1504_v58  ;;  %v1522_v5 = vmul.f32 %v1934_v61, %v1520_v25  ;;  %v1936_v2 = vpop.eup %1935  ;;  %vm1527_vm0 = vweird.f32 %v1934_v61 }
 0x4b7   :  { %v1490_v8 = vsel %vm1489_vm12, %v1930_v47, %v1486_v1  ;;  %vm1528_vm2 = vmor %vm1526_vm1, %vm1527_vm0 }
 0x4b8   :  { %v1495_v10 = vsel %vm1492_vm14, %v1494_v3, %v1490_v8  ;;  %v1509_v14 = vsel %vm1508_vm13, %v1932_v53, %v1505_v4  ;;  %v1523_v15 = vsub.f32 1.0, %v1522_v5 }
 0x4b9   :  { %v1514_v16 = vsel %vm1511_vm15, %v1513_v7, %v1509_v14  ;;  %v1537_v19 = vmul.f32 %v1936_v2, %v1495_v10 }
 0x4ba   :  { %v1536_v20 = vmul.f32 %v1514_v16, %v3578_v23  ;;  %v1524_v21 = vmul.f32 %v1934_v61, %v1523_v15  ;;  %v1818_v23 = vld [vmem:[%s3652_s0 + $0xe0] sm:$0xff] }
 0x4bc   :  { %v3629_v22 = vadd.f32 %v1537_v19, %v1536_v20  ;;  %v1525_v48 = vadd.f32 %v1934_v61, %v1524_v21 }
 0x4be   :  { %1937 = vtanh.f32 %v3629_v22  ;;  %v1529_v32 = vsel %vm1528_vm2, %v1934_v61, %v1525_v48 }
 0x4bf   :  { %v1534_v38 = vsel %vm1531_vm3, %v1533_v33, %v1529_v32 }
 0x4c4   :  { %v1938_v34 = vpop.eup %1937 }
 0x4c5   :  { %v1540_v42 = vmul.f32 %v1938_v34, %v1534_v38 }
 0x4c7   :  { %1817 = vst [vmem:[%s3653_s2 + $0x30] sm:$0xff] %v1540_v42  ;;  %1628 = vmatmul.f32.vlgmr.msrb.gmra.mxu0 %v1540_v42  ;;  %1648 = vmatmul.f32.vlgmr.msrb.gmra.mxu1 %v1540_v42 }
 0x4c8   :  { %1668 = vmatmul.f32.vlgmr.msrb.gmra.mxu2 %v1540_v42  ;;  %1688 = vmatmul.f32.vlgmr.msrb.gmra.mxu3 %v1540_v42 }
 0x544   :  { %v1629_v44 = vpop.f32.mrf.mxu0  ;;  %v1649_v17 = vpop.f32.mrf.mxu1 }
 0x545   :  { %v1692_v24 = vadd.f32 %v1818_v23, %v1629_v44  ;;  %v1693_v30 = vadd.f32 %v1819_v43, %v1649_v17 }
 0x547   :  { %v1822_v35 = vmul.f32 -1.442695, %v1692_v24  ;;  %v1823_v9 = vmul.f32 -1.442695, %v1693_v30 }
 0x549   :  { %1939 = vpow2.f32 %v1822_v35 }
 0x54a   :  { %1941 = vpow2.f32 %v1823_v9 }
 0x54b   :  { %v1689_v12 = vpop.f32.mrf.mxu3  ;;  %v1669_v39 = vpop.f32.mrf.mxu2 }
 0x54c   :  { %v1695_v13 = vadd.f32 %v1821_v11, %v1689_v12  ;;  %v1694_v50 = vadd.f32 %v1820_v27, %v1669_v39 }
 0x54e   :  { %v1824_v37 = vmul.f32 -1.442695, %v1695_v13 }
 0x54f   :  { %v1940_v49 = vpop.eup %1939 }
 0x550   :  { %v1942_v18 = vpop.eup %1941  ;;  %v1699_v63 = vadd.f32 1.0, %v1940_v49  ;;  %1943 = vpow2.f32 %v1824_v37 }
 0x551   :  { %v1718_v52 = vadd.f32 1.0, %v1942_v18 }
 0x552   :  { %1945 = vrcp.f32 %v1699_v63  ;;  %v1711_v47 = vand.u32 2147483648, %v1699_v63  ;;  %v1709_v60 = vand.u32 2147483647, %v1699_v63  ;;  %vm1705_vm6 = vweird.f32 %v1699_v63 }
 0x553   :  { %1947 = vrcp.f32 %v1718_v52  ;;  %v1730_v55 = vand.u32 2147483648, %v1718_v52  ;;  %v1728_v51 = vand.u32 2147483647, %v1718_v52  ;;  %vm1724_vm7 = vweird.f32 %v1718_v52 }
 0x554   :  { %v1712_v6 = vor.u32 1.1754944e-38, %v1711_v47  ;;  %vm1710_vm10 = vcmp.eq.f32.partialorder %v1709_v60, 8.507059e+37 }
 0x555   :  { %v1731_v58 = vor.u32 1.1754944e-38, %v1730_v55  ;;  %vm1729_vm11 = vcmp.eq.f32.partialorder %v1728_v51, 8.507059e+37 }
 0x556   :  { %v1944_v45 = vpop.eup %1943 }
 0x557   :  { %v1738_v46 = vadd.f32 1.0, %v1944_v45 }
 0x558   :  { %v1946_v36 = vpop.eup %1945 }
 0x559   :  { %v1948_v62 = vpop.eup %1947  ;;  %v1701_v40 = vmul.f32 %v1946_v36, %v1699_v63  ;;  %1949 = vrcp.f32 %v1738_v46  ;;  %vm1706_vm4 = vweird.f32 %v1946_v36  ;;  %v1750_v15 = vand.u32 2147483648, %v1738_v46 }
 0x55a   :  { %v1720_v29 = vmul.f32 %v1948_v62, %v1718_v52  ;;  %1951 = vtanh.f32 %v1694_v50  ;;  %vm1725_vm5 = vweird.f32 %v1948_v62  ;;  %vm1707_vm8 = vmor %vm1705_vm6, %vm1706_vm4  ;;  %vm1744_vm13 = vweird.f32 %v1738_v46 }
 0x55b   :  { %v1702_v28 = vsub.f32 1.0, %v1701_v40  ;;  %vm1726_vm9 = vmor %vm1724_vm7, %vm1725_vm5  ;;  %v1748_v16 = vand.u32 2147483647, %v1738_v46  ;;  %v1751_v20 = vor.u32 1.1754944e-38, %v1750_v15 }
 0x55c   :  { %v1721_v25 = vsub.f32 1.0, %v1720_v29 }
 0x55d   :  { %v1703_v53 = vmul.f32 %v1946_v36, %v1702_v28  ;;  %vm1749_vm15 = vcmp.eq.f32.partialorder %v1748_v16, 8.507059e+37 }
 0x55e   :  { %v1722_v41 = vmul.f32 %v1948_v62, %v1721_v25 }
 0x55f   :  { %v1950_v0 = vpop.eup %1949  ;;  %v1704_v54 = vadd.f32 %v1946_v36, %v1703_v53 }
 0x560   :  { %v1723_v56 = vadd.f32 %v1948_v62, %v1722_v41  ;;  %v1740_v57 = vmul.f32 %v1950_v0, %v1738_v46  ;;  %v1952_v61 = vpop.eup %1951  ;;  %vm1745_vm12 = vweird.f32 %v1950_v0 }
 0x561   :  { %v1708_v59 = vsel %vm1707_vm8, %v1946_v36, %v1704_v54  ;;  %vm1746_vm14 = vmor %vm1744_vm13, %vm1745_vm12 }
 0x562   :  { %v1713_v1 = vsel %vm1710_vm10, %v1712_v6, %v1708_v59  ;;  %v1727_v3 = vsel %vm1726_vm9, %v1948_v62, %v1723_v56  ;;  %v1741_v4 = vsub.f32 1.0, %v1740_v57 }
 0x563   :  { %v1732_v5 = vsel %vm1729_vm11, %v1731_v58, %v1727_v3  ;;  %v1755_v7 = vmul.f32 %v1952_v61, %v1713_v1 }
 0x564   :  { %v1754_v8 = vmul.f32 %v1732_v5, %v3629_v22  ;;  %v1742_v2 = vmul.f32 %v1950_v0, %v1741_v4 }
 0x566   :  { %v1756_v10 = vadd.f32 %v1755_v7, %v1754_v8  ;;  %v1743_v14 = vadd.f32 %v1950_v0, %v1742_v2 }
 0x568   :  { %1953 = vtanh.f32 %v1756_v10  ;;  %v1747_v19 = vsel %vm1746_vm14, %v1950_v0, %v1743_v14 }
 0x569   :  { %v1752_v48 = vsel %vm1749_vm15, %v1751_v20, %v1747_v19 }
 0x56e   :  { %v1954_v21 = vpop.eup %1953 }
 0x56f   :  { %v1758_v26 = vmul.f32 %v1954_v21, %v1752_v48 }
 0x571   :  { %1825 = vst [vmem:[%s3653_s2 + $0x38] sm:$0xff] %v1758_v26 }

</bundles_post_ra>
